<compile_context>
chip_gen: v7x
topology: tpu7x:2x2x1
jax: 0.10.0
libtpu: 0.0.40
codegen_flags: <defaults>
</compile_context>

<pallas_src>
import math

import numpy as np
import jax
import jax.numpy as jnp
from jax import lax
from jax.experimental import pallas as pl
from jax.experimental.pallas import tpu as pltpu

# ----------------------------- synthetic config -----------------------------
B = 2                    # batch
T = 8                    # per-modality sequence length (config.block_size before *3)
NUM_INPUTS = 3           # GPT.num_inputs
S = NUM_INPUTS * T       # per-batch transformer sequence length (24)
R = B * S                # batch folded into rows (48)
N_EMBD = 128             # config.n_embd
HALF = N_EMBD // 2
N_HEAD = 4               # config.n_head
N_LAYER = 2              # config.n_layer
HEAD_DIM = N_EMBD // N_HEAD
HIDDEN = 4 * N_EMBD
VOCAB = 16               # config.vocab_size (> 10, column 10 is zeroed)
NUM_STATES1 = 16         # config.num_states = (1, 16)
NUM_SKILLS = 5           # config.num_skills
EPS = 1e-5               # nn.LayerNorm default eps
NEG_BIAS = -1e30         # large finite negative instead of -inf (NaN-safe)
MM_DTYPE = jnp.bfloat16  # MXU operand dtype; accumulation stays float32


# ----------------------------- in-kernel helpers -----------------------------
def _layernorm(x, w, b):
    mu = jnp.mean(x, axis=-1, keepdims=True)
    var = jnp.mean((x - mu) ** 2, axis=-1, keepdims=True)
    return (x - mu) * lax.rsqrt(var + EPS) * w + b


def _erf(x):
    # Abramowitz & Stegun 7.1.26 (uses only exp/div/select; <=1.5e-7 abs error).
    z = jnp.abs(x)
    t = 1.0 / (1.0 + 0.3275911 * z)
    poly = ((((1.061405429 * t - 1.453152027) * t + 1.421413741) * t
             - 0.284496736) * t + 0.254829592) * t
    y = 1.0 - poly * jnp.exp(-z * z)
    return jnp.where(x < 0.0, -y, y)


def _gelu(x):
    # F.gelu default: exact erf-based GELU
    return 0.5 * x * (1.0 + _erf(x * (1.0 / math.sqrt(2.0))))


def _mm(a, w_bf16):
    """Matmul: activation cast to bf16, weight already bf16, f32 accumulation."""
    return jnp.dot(a.astype(MM_DTYPE), w_bf16, preferred_element_type=jnp.float32)


# ----------------------- Pallas kernel: per-layer body ------------------------
def _gpt_kernel(s_half_ref, s_feat_ref, act_ref, skill_ref, pos_ref, bias_ref,
                se_w_ref, se_b_ref, ae_w_ref, ae_b_ref,
                ln1w_ref, ln1b_ref, ln2w_ref, ln2b_ref,
                wqkv_ref, bqkv_ref, wo_ref, bo_ref,
                w1_ref, b1_ref, w2_ref, b2_ref,
                lnfw_ref, lnfb_ref,
                o_ref, x_ref):
    l = pl.program_id(0)

    # ---- layer 0 prologue: fused tanh encoders + grouped token build + pos ----
    @pl.when(l == 0)
    def _init():
        state_enc = jnp.tanh(_mm(s_feat_ref[...], se_w_ref[...]) + se_b_ref[...])  # (B*T, HALF)
        act_emb = jnp.tanh(_mm(act_ref[...], ae_w_ref[...]) + ae_b_ref[...])       # (B*T, C)
        pos = pos_ref[...]                                                          # (S, C), grouped order
        for b in range(B):
            r0, r1 = b * T, (b + 1) * T
            # skill tokens
            x_ref[b * S + 0 * T: b * S + 1 * T, :] = skill_ref[r0:r1, :] + pos[0:T, :]
            # state tokens: [raw half | encoded half] written at lane offsets
            x_ref[b * S + 1 * T: b * S + 2 * T, 0:HALF] = (
                s_half_ref[r0:r1, :] + pos[T:2 * T, 0:HALF])
            x_ref[b * S + 1 * T: b * S + 2 * T, HALF:N_EMBD] = (
                state_enc[r0:r1, :] + pos[T:2 * T, HALF:N_EMBD])
            # action tokens
            x_ref[b * S + 2 * T: b * S + 3 * T, :] = act_emb[r0:r1, :] + pos[2 * T:3 * T, :]

    x = x_ref[...]                          # (R, C) f32, resident across layers
    bias = bias_ref[...]                    # (R, R) block-diagonal causal bias

    # ---- x = x + attn(ln1(x)) ----
    h = _layernorm(x, ln1w_ref[...], ln1b_ref[...])
    qkv = _mm(h, wqkv_ref[...]) + bqkv_ref[...]      # (R, 3C); 1/sqrt(hd) folded into Q part
    wo = wo_ref[...]                                  # (C, C) bf16
    acc = jnp.zeros((R, N_EMBD), jnp.float32)
    for hh in range(N_HEAD):
        c0 = hh * HEAD_DIM
        qh = qkv[:, c0:c0 + HEAD_DIM]
        kh = qkv[:, N_EMBD + c0:N_EMBD + c0 + HEAD_DIM]
        vh = qkv[:, 2 * N_EMBD + c0:2 * N_EMBD + c0 + HEAD_DIM]
        att = lax.dot_general(qh.astype(MM_DTYPE), kh.astype(MM_DTYPE),
                              (((1,), (1,)), ((), ())),
                              preferred_element_type=jnp.float32) + bias      # (R, R)
        att = att - jnp.max(att, axis=-1, keepdims=True)
        p = jnp.exp(att)
        p = p / jnp.sum(p, axis=-1, keepdims=True)    # exact divide (reference parity)
        oh = _mm(p, vh.astype(MM_DTYPE))              # (R, hd)
        acc = acc + _mm(oh, wo[c0:c0 + HEAD_DIM, :])  # fold head through out-proj
    x = x + acc + bo_ref[...]

    # ---- x = x + mlp(ln2(x)) ----
    h2 = _layernorm(x, ln2w_ref[...], ln2b_ref[...])
    m = _gelu(_mm(h2, w1_ref[...]) + b1_ref[...])
    x = x + _mm(m, w2_ref[...]) + b2_ref[...]
    x_ref[...] = x

    # ---- last layer epilogue: ln_f on the state-token rows (== x[:, 1::3, :]) ----
    @pl.when(l == N_LAYER - 1)
    def _final():
        for b in range(B):
            xb = x[b * S + T: b * S + 2 * T, :]
            o_ref[b * T:(b + 1) * T, :] = _layernorm(xb, lnfw_ref[...], lnfb_ref[...])


# ------------------------------- pallas_call ----------------------------------
def gpt_fused(s_half, s_feat, act, skill_emb, pp):
    def inv(shape):
        nd = len(shape)
        return pl.BlockSpec(tuple(shape), lambda l, _n=nd: (0,) * _n)

    def per_layer(arr):
        return pl.BlockSpec((None,) + tuple(arr.shape[1:]), lambda l: (l, 0, 0))

    inv_ops = [s_half, s_feat, act, skill_emb, pp["pos_g"], pp["bias"],
               pp["se_w"], pp["se_b"], pp["ae_w"], pp["ae_b"]]
    layer_ops = [pp["ln1_w"], pp["ln1_b"], pp["ln2_w"], pp["ln2_b"],
                 pp["wqkv"], pp["bqkv"], pp["wo"], pp["bo"],
                 pp["w1"], pp["b1"], pp["w2"], pp["b2"]]
    tail_ops = [pp["lnf_w"], pp["lnf_b"]]
    operands = inv_ops + layer_ops + tail_ops
    in_specs = ([inv(a.shape) for a in inv_ops]
                + [per_layer(a) for a in layer_ops]
                + [inv(a.shape) for a in tail_ops])

    # advisory cost estimate for the XLA scheduler
    flops = (2 * B * T * (NUM_STATES1 * HALF + VOCAB * N_EMBD)
             + N_LAYER * (2 * R * N_EMBD * 3 * N_EMBD      # fused qkv
                          + 4 * R * R * N_EMBD             # scores + pv
                          + 2 * R * N_EMBD * N_EMBD        # out proj (per-head folded)
                          + 4 * R * N_EMBD * HIDDEN))      # mlp
    transcendentals = (B * T * (HALF + N_EMBD)
                       + N_LAYER * (N_HEAD * R * R + R * HIDDEN))
    bytes_accessed = int(sum(int(a.size) * a.dtype.itemsize for a in operands)
                         + B * T * N_EMBD * 4)

    return pl.pallas_call(
        _gpt_kernel,
        out_shape=jax.ShapeDtypeStruct((B * T, N_EMBD), jnp.float32),
        grid=(N_LAYER,),
        in_specs=in_specs,
        out_specs=pl.BlockSpec((B * T, N_EMBD), lambda l: (0, 0)),
        scratch_shapes=[pltpu.VMEM((R, N_EMBD), jnp.float32)],
        compiler_params=pltpu.CompilerParams(dimension_semantics=("arbitrary",)),
        cost_estimate=pl.CostEstimate(flops=int(flops),
                                      transcendentals=int(transcendentals),
                                      bytes_accessed=bytes_accessed),
    )(*operands)


# ------------------------------- full forward ---------------------------------
def gpt_forward(states, actions, pp):
    # states last dim == n_embd//2 + num_states[1] + 1 -> split off skill index
    s_half = states[..., :HALF].reshape(B * T, HALF)
    s_feat = states[..., HALF:HALF + NUM_STATES1].reshape(B * T, NUM_STATES1)
    skill = jnp.round(states[..., -1]).astype(jnp.int32)              # rounded cast
    # actions[:, :, [10]] = 0 (bc branch)
    actions_z = actions.at[:, :, 10].set(0.0).astype(jnp.float32).reshape(B * T, VOCAB)
    # skill embedding gather (tiny glue op)
    skill_emb = pp["skill_embedding"][skill].reshape(B * T, N_EMBD)
    out = gpt_fused(s_half, s_feat, actions_z, skill_emb, pp)          # (B*T, C)
    # kernel already emitted only x[:, 1::num_inputs, :] (state-token rows)
    return out.reshape(B, T, N_EMBD)


# ------------------------------ parameter init ---------------------------------
def init_params(key):
    ks = iter(jax.random.split(key, 24))

    def nrm(shape, std=0.02):
        return std * jax.random.normal(next(ks), shape, dtype=jnp.float32)

    L, C, H = N_LAYER, N_EMBD, HIDDEN
    p = {}
    p["pos_emb"] = nrm((S, C))                       # torch init is zeros; random synthetic here
    p["skill_embedding"] = jax.random.normal(next(ks), (NUM_SKILLS, C), dtype=jnp.float32)
    p["se_w"] = nrm((NUM_STATES1, HALF))             # stored as (in, out) == W.T
    p["se_b"] = nrm((1, HALF), 0.01)
    p["ae_w"] = nrm((VOCAB, C))
    p["ae_b"] = nrm((1, C), 0.01)
    p["ln1_w"] = jnp.ones((L, 1, C), jnp.float32)
    p["ln1_b"] = jnp.zeros((L, 1, C), jnp.float32)
    p["ln2_w"] = jnp.ones((L, 1, C), jnp.float32)
    p["ln2_b"] = jnp.zeros((L, 1, C), jnp.float32)
    p["wq"] = nrm((L, C, C)); p["bq"] = nrm((L, 1, C), 0.01)
    p["wk"] = nrm((L, C, C)); p["bk"] = nrm((L, 1, C), 0.01)
    p["wv"] = nrm((L, C, C)); p["bv"] = nrm((L, 1, C), 0.01)
    p["wo"] = nrm((L, C, C)); p["bo"] = nrm((L, 1, C), 0.01)
    p["w1"] = nrm((L, C, H)); p["b1"] = nrm((L, 1, H), 0.01)
    p["w2"] = nrm((L, H, C)); p["b2"] = nrm((L, 1, C), 0.01)
    p["lnf_w"] = jnp.ones((1, C), jnp.float32)
    p["lnf_b"] = jnp.zeros((1, C), jnp.float32)
    return p


def pack_params(p):
    """One-time offline packing: bf16 weights, fused+scaled QKV, grouped pos, static bias."""
    scale = 1.0 / math.sqrt(HEAD_DIM)
    pp = {}
    pp["skill_embedding"] = p["skill_embedding"]

    # grouped layout per batch: rows [skill(T) | state(T) | action(T)];
    # grouped index g maps to original interleaved position p(g) = 3*(g%T) + g//T
    g = np.arange(S)
    orig_pos = 3 * (g % T) + g // T
    pp["pos_g"] = p["pos_emb"][orig_pos]                               # (S, C)

    # block-diagonal grouped-causal additive bias, fully static -> numpy constant
    p_full = np.tile(orig_pos, B)
    batch_id = np.repeat(np.arange(B), S)
    allowed = (batch_id[:, None] == batch_id[None, :]) & (p_full[None, :] <= p_full[:, None])
    pp["bias"] = jnp.asarray(np.where(allowed, 0.0, NEG_BIAS).astype(np.float32))

    # weights -> bf16 (halves HBM traffic, removes in-kernel weight casts); biases/LN -> f32
    pp["se_w"] = p["se_w"].astype(MM_DTYPE); pp["se_b"] = p["se_b"]
    pp["ae_w"] = p["ae_w"].astype(MM_DTYPE); pp["ae_b"] = p["ae_b"]
    # fused QKV with 1/sqrt(head_dim) folded into the Q part
    pp["wqkv"] = jnp.concatenate([p["wq"] * scale, p["wk"], p["wv"]], axis=-1).astype(MM_DTYPE)
    pp["bqkv"] = jnp.concatenate([p["bq"] * scale, p["bk"], p["bv"]], axis=-1)
    pp["wo"] = p["wo"].astype(MM_DTYPE); pp["bo"] = p["bo"]
    pp["w1"] = p["w1"].astype(MM_DTYPE); pp["b1"] = p["b1"]
    pp["w2"] = p["w2"].astype(MM_DTYPE); pp["b2"] = p["b2"]
    for k in ("ln1_w", "ln1_b", "ln2_w", "ln2_b", "lnf_w", "lnf_b"):
        pp[k] = p[k]
    return pp


# ------------------------------------ main ------------------------------------
if __name__ == "__main__":
    key = jax.random.PRNGKey(0)
    kp, k_s, k_a, k_sk = jax.random.split(key, 4)
    params = init_params(kp)
    packed = pack_params(params)

    # states: (B, T, n_embd//2 + num_states[1] + 1) = (2, 8, 81); last channel = skill id
    s_core = jax.random.normal(k_s, (B, T, HALF + NUM_STATES1), dtype=jnp.float32)
    skill_ids = jax.random.randint(k_sk, (B, T, 1), 0, NUM_SKILLS).astype(jnp.float32)
    states = jnp.concatenate([s_core, skill_ids], axis=-1)
    # actions: (B, T, vocab_size) = (2, 8, 16)
    actions = jax.random.normal(k_a, (B, T, VOCAB), dtype=jnp.float32)

    fwd = jax.jit(gpt_forward)
    out = jax.block_until_ready(fwd(states, actions, packed))

    assert out.shape == (B, T, N_EMBD), out.shape
    assert bool(jnp.all(jnp.isfinite(out)))
    print("KERNEL_OK")
</pallas_src>

<mosaic_0001>
module attributes {stable_mosaic.version = 11 : i64} {
  func.func @_gpt_kernel(%arg0: i32, %arg1: memref<16x64xf32, #tpu.memory_space<vmem>>, %arg2: memref<16x16xf32, #tpu.memory_space<vmem>>, %arg3: memref<16x16xf32, #tpu.memory_space<vmem>>, %arg4: memref<16x128xf32, #tpu.memory_space<vmem>>, %arg5: memref<24x128xf32, #tpu.memory_space<vmem>>, %arg6: memref<48x48xf32, #tpu.memory_space<vmem>>, %arg7: memref<16x64xbf16, #tpu.memory_space<vmem>>, %arg8: memref<1x64xf32, #tpu.memory_space<vmem>>, %arg9: memref<16x128xbf16, #tpu.memory_space<vmem>>, %arg10: memref<1x128xf32, #tpu.memory_space<vmem>>, %arg11: memref<1x1x128xf32, #tpu.memory_space<vmem>>, %arg12: memref<1x1x128xf32, #tpu.memory_space<vmem>>, %arg13: memref<1x1x128xf32, #tpu.memory_space<vmem>>, %arg14: memref<1x1x128xf32, #tpu.memory_space<vmem>>, %arg15: memref<1x128x384xbf16, #tpu.memory_space<vmem>>, %arg16: memref<1x1x384xf32, #tpu.memory_space<vmem>>, %arg17: memref<1x128x128xbf16, #tpu.memory_space<vmem>>, %arg18: memref<1x1x128xf32, #tpu.memory_space<vmem>>, %arg19: memref<1x128x512xbf16, #tpu.memory_space<vmem>>, %arg20: memref<1x1x512xf32, #tpu.memory_space<vmem>>, %arg21: memref<1x512x128xbf16, #tpu.memory_space<vmem>>, %arg22: memref<1x1x128xf32, #tpu.memory_space<vmem>>, %arg23: memref<1x128xf32, #tpu.memory_space<vmem>>, %arg24: memref<1x128xf32, #tpu.memory_space<vmem>>, %arg25: memref<16x128xf32, #tpu.memory_space<vmem>>, %arg26: memref<48x128xf32, #tpu.memory_space<vmem>>) attributes {dimension_semantics = [#tpu.dimension_semantics<arbitrary>], iteration_bounds = array<i64: 2>, scalar_prefetch = 0 : i64, scratch_operands = 1 : i64, tpu.core_type = #tpu.core_type<tc>, window_params = [{pipeline_mode = #tpu.pipeline_mode<synchronous>, transform_indices = @transform_0, window_bounds = array<i64: 16, 64>}, {pipeline_mode = #tpu.pipeline_mode<synchronous>, transform_indices = @transform_1, window_bounds = array<i64: 16, 16>}, {pipeline_mode = #tpu.pipeline_mode<synchronous>, transform_indices = @transform_2, window_bounds = array<i64: 16, 16>}, {pipeline_mode = #tpu.pipeline_mode<synchronous>, transform_indices = @transform_3, window_bounds = array<i64: 16, 128>}, {pipeline_mode = #tpu.pipeline_mode<synchronous>, transform_indices = @transform_4, window_bounds = array<i64: 24, 128>}, {pipeline_mode = #tpu.pipeline_mode<synchronous>, transform_indices = @transform_5, window_bounds = array<i64: 48, 48>}, {pipeline_mode = #tpu.pipeline_mode<synchronous>, transform_indices = @transform_6, window_bounds = array<i64: 16, 64>}, {pipeline_mode = #tpu.pipeline_mode<synchronous>, transform_indices = @transform_7, window_bounds = array<i64: 1, 64>}, {pipeline_mode = #tpu.pipeline_mode<synchronous>, transform_indices = @transform_8, window_bounds = array<i64: 16, 128>}, {pipeline_mode = #tpu.pipeline_mode<synchronous>, transform_indices = @transform_9, window_bounds = array<i64: 1, 128>}, {transform_indices = @transform_10, window_bounds = array<i64: 1, 1, 128>}, {transform_indices = @transform_11, window_bounds = array<i64: 1, 1, 128>}, {transform_indices = @transform_12, window_bounds = array<i64: 1, 1, 128>}, {transform_indices = @transform_13, window_bounds = array<i64: 1, 1, 128>}, {transform_indices = @transform_14, window_bounds = array<i64: 1, 128, 384>}, {transform_indices = @transform_15, window_bounds = array<i64: 1, 1, 384>}, {transform_indices = @transform_16, window_bounds = array<i64: 1, 128, 128>}, {transform_indices = @transform_17, window_bounds = array<i64: 1, 1, 128>}, {transform_indices = @transform_18, window_bounds = array<i64: 1, 128, 512>}, {transform_indices = @transform_19, window_bounds = array<i64: 1, 1, 512>}, {transform_indices = @transform_20, window_bounds = array<i64: 1, 512, 128>}, {transform_indices = @transform_21, window_bounds = array<i64: 1, 1, 128>}, {pipeline_mode = #tpu.pipeline_mode<synchronous>, transform_indices = @transform_22, window_bounds = array<i64: 1, 128>}, {pipeline_mode = #tpu.pipeline_mode<synchronous>, transform_indices = @transform_23, window_bounds = array<i64: 1, 128>}, {pipeline_mode = #tpu.pipeline_mode<synchronous>, transform_indices = @transform_24, window_bounds = array<i64: 16, 128>}]} {
    %c0_i32 = arith.constant 0 : i32
    %0 = arith.cmpi eq, %arg0, %c0_i32 : i32
    %1 = arith.extui %0 : i1 to i32
    %c0_i32_0 = arith.constant 0 : i32
    %2 = arith.cmpi ne, %1, %c0_i32_0 : i32
    scf.if %2 {
      %c0_91 = arith.constant 0 : index
      %c0_92 = arith.constant 0 : index
      %226 = vector.load %arg2[%c0_91, %c0_92] : memref<16x16xf32, #tpu.memory_space<vmem>>, vector<16x16xf32>
      %c0_93 = arith.constant 0 : index
      %c0_94 = arith.constant 0 : index
      %227 = vector.load %arg7[%c0_93, %c0_94] : memref<16x64xbf16, #tpu.memory_space<vmem>>, vector<16x64xbf16>
      %228 = arith.truncf %226 : vector<16x16xf32> to vector<16x16xbf16>
      %cst_95 = arith.constant dense<0.000000e+00> : vector<16x64xf32>
      %229 = tpu.matmul %228, %227, %cst_95 {dimension_numbers = #tpu.dot_dimension_numbers<[1], [0], [0], [1], [0, 0, 1, 1], [], []>} : vector<16x16xbf16>, vector<16x64xbf16>, vector<16x64xf32> -> vector<16x64xf32>
      %c0_96 = arith.constant 0 : index
      %c0_97 = arith.constant 0 : index
      %230 = vector.load %arg8[%c0_96, %c0_97] : memref<1x64xf32, #tpu.memory_space<vmem>>, vector<1x64xf32>
      %231 = vector.broadcast %230 : vector<1x64xf32> to vector<16x64xf32>
      %232 = arith.addf %229, %231 : vector<16x64xf32>
      %233 = math.tanh %232 : vector<16x64xf32>
      %c0_98 = arith.constant 0 : index
      %c0_99 = arith.constant 0 : index
      %234 = vector.load %arg3[%c0_98, %c0_99] : memref<16x16xf32, #tpu.memory_space<vmem>>, vector<16x16xf32>
      %c0_100 = arith.constant 0 : index
      %c0_101 = arith.constant 0 : index
      %235 = vector.load %arg9[%c0_100, %c0_101] : memref<16x128xbf16, #tpu.memory_space<vmem>>, vector<16x128xbf16>
      %236 = arith.truncf %234 : vector<16x16xf32> to vector<16x16xbf16>
      %cst_102 = arith.constant dense<0.000000e+00> : vector<16x128xf32>
      %237 = tpu.matmul %236, %235, %cst_102 {dimension_numbers = #tpu.dot_dimension_numbers<[1], [0], [0], [1], [0, 0, 1, 1], [], []>} : vector<16x16xbf16>, vector<16x128xbf16>, vector<16x128xf32> -> vector<16x128xf32>
      %c0_103 = arith.constant 0 : index
      %c0_104 = arith.constant 0 : index
      %238 = vector.load %arg10[%c0_103, %c0_104] : memref<1x128xf32, #tpu.memory_space<vmem>>, vector<1x128xf32>
      %239 = vector.broadcast %238 : vector<1x128xf32> to vector<16x128xf32>
      %240 = arith.addf %237, %239 : vector<16x128xf32>
      %241 = math.tanh %240 : vector<16x128xf32>
      %c0_105 = arith.constant 0 : index
      %c0_106 = arith.constant 0 : index
      %242 = vector.load %arg5[%c0_105, %c0_106] : memref<24x128xf32, #tpu.memory_space<vmem>>, vector<24x128xf32>
      %c0_107 = arith.constant 0 : index
      %c0_108 = arith.constant 0 : index
      %243 = vector.load %arg4[%c0_107, %c0_108] : memref<16x128xf32, #tpu.memory_space<vmem>>, vector<8x128xf32>
      %244 = vector.extract_strided_slice %242 {offsets = [0, 0], sizes = [8, 128], strides = [1, 1]} : vector<24x128xf32> to vector<8x128xf32>
      %245 = arith.addf %243, %244 : vector<8x128xf32>
      %c0_109 = arith.constant 0 : index
      %c0_110 = arith.constant 0 : index
      %246 = vector.load %arg26[%c0_109, %c0_110] : memref<48x128xf32, #tpu.memory_space<vmem>>, vector<8x128xf32>
      tpu.vector_store %arg26[%c0_109, %c0_110], %245 {strides = array<i32>} : memref<48x128xf32, #tpu.memory_space<vmem>>, vector<8x128xf32>,
      %c0_111 = arith.constant 0 : index
      %c0_112 = arith.constant 0 : index
      %247 = vector.load %arg1[%c0_111, %c0_112] : memref<16x64xf32, #tpu.memory_space<vmem>>, vector<8x64xf32>
      %248 = vector.extract_strided_slice %242 {offsets = [8, 0], sizes = [8, 64], strides = [1, 1]} : vector<24x128xf32> to vector<8x64xf32>
      %249 = arith.addf %247, %248 : vector<8x64xf32>
      %c8 = arith.constant 8 : index
      %c0_113 = arith.constant 0 : index
      %250 = vector.load %arg26[%c8, %c0_113] : memref<48x128xf32, #tpu.memory_space<vmem>>, vector<8x64xf32>
      tpu.vector_store %arg26[%c8, %c0_113], %249 {strides = array<i32>} : memref<48x128xf32, #tpu.memory_space<vmem>>, vector<8x64xf32>,
      %251 = vector.extract_strided_slice %233 {offsets = [0, 0], sizes = [8, 64], strides = [1, 1]} : vector<16x64xf32> to vector<8x64xf32>
      %252 = vector.extract_strided_slice %242 {offsets = [8, 64], sizes = [8, 64], strides = [1, 1]} : vector<24x128xf32> to vector<8x64xf32>
      %253 = arith.addf %251, %252 : vector<8x64xf32>
      %c8_114 = arith.constant 8 : index
      %c64 = arith.constant 64 : index
      %254 = vector.load %arg26[%c8_114, %c64] : memref<48x128xf32, #tpu.memory_space<vmem>>, vector<8x64xf32>
      tpu.vector_store %arg26[%c8_114, %c64], %253 {strides = array<i32>} : memref<48x128xf32, #tpu.memory_space<vmem>>, vector<8x64xf32>,
      %255 = vector.extract_strided_slice %241 {offsets = [0, 0], sizes = [8, 128], strides = [1, 1]} : vector<16x128xf32> to vector<8x128xf32>
      %256 = vector.extract_strided_slice %242 {offsets = [16, 0], sizes = [8, 128], strides = [1, 1]} : vector<24x128xf32> to vector<8x128xf32>
      %257 = arith.addf %255, %256 : vector<8x128xf32>
      %c16 = arith.constant 16 : index
      %c0_115 = arith.constant 0 : index
      %258 = vector.load %arg26[%c16, %c0_115] : memref<48x128xf32, #tpu.memory_space<vmem>>, vector<8x128xf32>
      tpu.vector_store %arg26[%c16, %c0_115], %257 {strides = array<i32>} : memref<48x128xf32, #tpu.memory_space<vmem>>, vector<8x128xf32>,
      %c8_116 = arith.constant 8 : index
      %c0_117 = arith.constant 0 : index
      %259 = vector.load %arg4[%c8_116, %c0_117] : memref<16x128xf32, #tpu.memory_space<vmem>>, vector<8x128xf32>
      %260 = vector.extract_strided_slice %242 {offsets = [0, 0], sizes = [8, 128], strides = [1, 1]} : vector<24x128xf32> to vector<8x128xf32>
      %261 = arith.addf %259, %260 : vector<8x128xf32>
      %c24 = arith.constant 24 : index
      %c0_118 = arith.constant 0 : index
      %262 = vector.load %arg26[%c24, %c0_118] : memref<48x128xf32, #tpu.memory_space<vmem>>, vector<8x128xf32>
      tpu.vector_store %arg26[%c24, %c0_118], %261 {strides = array<i32>} : memref<48x128xf32, #tpu.memory_space<vmem>>, vector<8x128xf32>,
      %c8_119 = arith.constant 8 : index
      %c0_120 = arith.constant 0 : index
      %263 = vector.load %arg1[%c8_119, %c0_120] : memref<16x64xf32, #tpu.memory_space<vmem>>, vector<8x64xf32>
      %264 = vector.extract_strided_slice %242 {offsets = [8, 0], sizes = [8, 64], strides = [1, 1]} : vector<24x128xf32> to vector<8x64xf32>
      %265 = arith.addf %263, %264 : vector<8x64xf32>
      %c32 = arith.constant 32 : index
      %c0_121 = arith.constant 0 : index
      %266 = vector.load %arg26[%c32, %c0_121] : memref<48x128xf32, #tpu.memory_space<vmem>>, vector<8x64xf32>
      tpu.vector_store %arg26[%c32, %c0_121], %265 {strides = array<i32>} : memref<48x128xf32, #tpu.memory_space<vmem>>, vector<8x64xf32>,
      %267 = vector.extract_strided_slice %233 {offsets = [8, 0], sizes = [8, 64], strides = [1, 1]} : vector<16x64xf32> to vector<8x64xf32>
      %268 = vector.extract_strided_slice %242 {offsets = [8, 64], sizes = [8, 64], strides = [1, 1]} : vector<24x128xf32> to vector<8x64xf32>
      %269 = arith.addf %267, %268 : vector<8x64xf32>
      %c32_122 = arith.constant 32 : index
      %c64_123 = arith.constant 64 : index
      %270 = vector.load %arg26[%c32_122, %c64_123] : memref<48x128xf32, #tpu.memory_space<vmem>>, vector<8x64xf32>
      tpu.vector_store %arg26[%c32_122, %c64_123], %269 {strides = array<i32>} : memref<48x128xf32, #tpu.memory_space<vmem>>, vector<8x64xf32>,
      %271 = vector.extract_strided_slice %241 {offsets = [8, 0], sizes = [8, 128], strides = [1, 1]} : vector<16x128xf32> to vector<8x128xf32>
      %272 = vector.extract_strided_slice %242 {offsets = [16, 0], sizes = [8, 128], strides = [1, 1]} : vector<24x128xf32> to vector<8x128xf32>
      %273 = arith.addf %271, %272 : vector<8x128xf32>
      %c40 = arith.constant 40 : index
      %c0_124 = arith.constant 0 : index
      %274 = vector.load %arg26[%c40, %c0_124] : memref<48x128xf32, #tpu.memory_space<vmem>>, vector<8x128xf32>
      tpu.vector_store %arg26[%c40, %c0_124], %273 {strides = array<i32>} : memref<48x128xf32, #tpu.memory_space<vmem>>, vector<8x128xf32>,
    } else {
    }
    %c0 = arith.constant 0 : index
    %c0_1 = arith.constant 0 : index
    %3 = vector.load %arg26[%c0, %c0_1] : memref<48x128xf32, #tpu.memory_space<vmem>>, vector<48x128xf32>
    %c0_2 = arith.constant 0 : index
    %c0_3 = arith.constant 0 : index
    %4 = vector.load %arg6[%c0_2, %c0_3] : memref<48x48xf32, #tpu.memory_space<vmem>>, vector<48x48xf32>
    %c0_4 = arith.constant 0 : index
    %c0_5 = arith.constant 0 : index
    %c0_6 = arith.constant 0 : index
    %5 = vector.load %arg11[%c0_4, %c0_5, %c0_6] : memref<1x1x128xf32, #tpu.memory_space<vmem>>, vector<1x1x128xf32>
    %6 = vector.shape_cast %5 : vector<1x1x128xf32> to vector<1x128xf32>
    %c0_7 = arith.constant 0 : index
    %c0_8 = arith.constant 0 : index
    %c0_9 = arith.constant 0 : index
    %7 = vector.load %arg12[%c0_7, %c0_8, %c0_9] : memref<1x1x128xf32, #tpu.memory_space<vmem>>, vector<1x1x128xf32>
    %8 = vector.shape_cast %7 : vector<1x1x128xf32> to vector<1x128xf32>
    %cst = arith.constant dense<0.000000e+00> : vector<48xf32>
    %9 = vector.multi_reduction <add>, %3, %cst [1] : vector<48x128xf32> to vector<48xf32>
    %10 = vector.shape_cast %9 : vector<48xf32> to vector<48x1xf32>
    %cst_10 = arith.constant 1.280000e+02 : f32
    %11 = vector.broadcast %cst_10 : f32 to vector<48x1xf32>
    %12 = arith.divf %10, %11 : vector<48x1xf32>
    %13 = vector.broadcast %12 : vector<48x1xf32> to vector<48x128xf32>
    %14 = arith.subf %3, %13 : vector<48x128xf32>
    %15 = arith.mulf %14, %14 : vector<48x128xf32>
    %cst_11 = arith.constant dense<0.000000e+00> : vector<48xf32>
    %16 = vector.multi_reduction <add>, %15, %cst_11 [1] : vector<48x128xf32> to vector<48xf32>
    %17 = vector.shape_cast %16 : vector<48xf32> to vector<48x1xf32>
    %cst_12 = arith.constant 1.280000e+02 : f32
    %18 = vector.broadcast %cst_12 : f32 to vector<48x1xf32>
    %19 = arith.divf %17, %18 : vector<48x1xf32>
    %20 = vector.broadcast %12 : vector<48x1xf32> to vector<48x128xf32>
    %21 = arith.subf %3, %20 : vector<48x128xf32>
    %cst_13 = arith.constant 9.99999974E-6 : f32
    %22 = vector.broadcast %cst_13 : f32 to vector<48x1xf32>
    %23 = arith.addf %19, %22 : vector<48x1xf32>
    %24 = math.rsqrt %23 : vector<48x1xf32>
    %25 = vector.broadcast %24 : vector<48x1xf32> to vector<48x128xf32>
    %26 = arith.mulf %21, %25 : vector<48x128xf32>
    %27 = vector.broadcast %6 : vector<1x128xf32> to vector<48x128xf32>
    %28 = arith.mulf %26, %27 : vector<48x128xf32>
    %29 = vector.broadcast %8 : vector<1x128xf32> to vector<48x128xf32>
    %30 = arith.addf %28, %29 : vector<48x128xf32>
    %c0_14 = arith.constant 0 : index
    %c0_15 = arith.constant 0 : index
    %c0_16 = arith.constant 0 : index
    %31 = vector.load %arg15[%c0_14, %c0_15, %c0_16] : memref<1x128x384xbf16, #tpu.memory_space<vmem>>, vector<1x128x384xbf16>
    %32 = vector.shape_cast %31 : vector<1x128x384xbf16> to vector<128x384xbf16>
    %33 = arith.truncf %30 : vector<48x128xf32> to vector<48x128xbf16>
    %cst_17 = arith.constant dense<0.000000e+00> : vector<48x384xf32>
    %34 = tpu.matmul %33, %32, %cst_17 {dimension_numbers = #tpu.dot_dimension_numbers<[1], [0], [0], [1], [0, 0, 1, 1], [], []>} : vector<48x128xbf16>, vector<128x384xbf16>, vector<48x384xf32> -> vector<48x384xf32>
    %c0_18 = arith.constant 0 : index
    %c0_19 = arith.constant 0 : index
    %c0_20 = arith.constant 0 : index
    %35 = vector.load %arg16[%c0_18, %c0_19, %c0_20] : memref<1x1x384xf32, #tpu.memory_space<vmem>>, vector<1x1x384xf32>
    %36 = vector.shape_cast %35 : vector<1x1x384xf32> to vector<1x384xf32>
    %37 = vector.broadcast %36 : vector<1x384xf32> to vector<48x384xf32>
    %38 = arith.addf %34, %37 : vector<48x384xf32>
    %c0_21 = arith.constant 0 : index
    %c0_22 = arith.constant 0 : index
    %c0_23 = arith.constant 0 : index
    %39 = vector.load %arg17[%c0_21, %c0_22, %c0_23] : memref<1x128x128xbf16, #tpu.memory_space<vmem>>, vector<1x128x128xbf16>
    %40 = vector.shape_cast %39 : vector<1x128x128xbf16> to vector<128x128xbf16>
    %cst_24 = arith.constant 0.000000e+00 : f32
    %41 = vector.broadcast %cst_24 : f32 to vector<48x128xf32>
    %42 = vector.extract_strided_slice %38 {offsets = [0, 0], sizes = [48, 32], strides = [1, 1]} : vector<48x384xf32> to vector<48x32xf32>
    %43 = vector.extract_strided_slice %38 {offsets = [0, 128], sizes = [48, 32], strides = [1, 1]} : vector<48x384xf32> to vector<48x32xf32>
    %44 = vector.extract_strided_slice %38 {offsets = [0, 256], sizes = [48, 32], strides = [1, 1]} : vector<48x384xf32> to vector<48x32xf32>
    %45 = arith.truncf %42 : vector<48x32xf32> to vector<48x32xbf16>
    %46 = arith.truncf %43 : vector<48x32xf32> to vector<48x32xbf16>
    %cst_25 = arith.constant dense<0.000000e+00> : vector<48x48xf32>
    %47 = tpu.matmul %45, %46, %cst_25 {dimension_numbers = #tpu.dot_dimension_numbers<[1], [1], [0], [0], [0, 0, 1, 0], [], []>} : vector<48x32xbf16>, vector<48x32xbf16>, vector<48x48xf32> -> vector<48x48xf32>
    %48 = arith.addf %47, %4 : vector<48x48xf32>
    %cst_26 = arith.constant dense<0xFF800000> : vector<48xf32>
    %49 = vector.multi_reduction <maximumf>, %48, %cst_26 [1] : vector<48x48xf32> to vector<48xf32>
    %50 = vector.shape_cast %49 : vector<48xf32> to vector<48x1xf32>
    %51 = vector.broadcast %50 : vector<48x1xf32> to vector<48x48xf32>
    %52 = arith.subf %48, %51 : vector<48x48xf32>
    %53 = math.exp %52 : vector<48x48xf32>
    %cst_27 = arith.constant dense<0.000000e+00> : vector<48xf32>
    %54 = vector.multi_reduction <add>, %53, %cst_27 [1] : vector<48x48xf32> to vector<48xf32>
    %55 = vector.shape_cast %54 : vector<48xf32> to vector<48x1xf32>
    %56 = vector.broadcast %55 : vector<48x1xf32> to vector<48x48xf32>
    %57 = arith.divf %53, %56 : vector<48x48xf32>
    %58 = arith.truncf %44 : vector<48x32xf32> to vector<48x32xbf16>
    %59 = arith.truncf %57 : vector<48x48xf32> to vector<48x48xbf16>
    %cst_28 = arith.constant dense<0.000000e+00> : vector<48x32xf32>
    %60 = tpu.matmul %59, %58, %cst_28 {dimension_numbers = #tpu.dot_dimension_numbers<[1], [0], [0], [1], [0, 0, 1, 1], [], []>} : vector<48x48xbf16>, vector<48x32xbf16>, vector<48x32xf32> -> vector<48x32xf32>
    %61 = vector.extract_strided_slice %40 {offsets = [0, 0], sizes = [32, 128], strides = [1, 1]} : vector<128x128xbf16> to vector<32x128xbf16>
    %62 = arith.truncf %60 : vector<48x32xf32> to vector<48x32xbf16>
    %cst_29 = arith.constant dense<0.000000e+00> : vector<48x128xf32>
    %63 = tpu.matmul %62, %61, %cst_29 {dimension_numbers = #tpu.dot_dimension_numbers<[1], [0], [0], [1], [0, 0, 1, 1], [], []>} : vector<48x32xbf16>, vector<32x128xbf16>, vector<48x128xf32> -> vector<48x128xf32>
    %64 = arith.addf %41, %63 : vector<48x128xf32>
    %65 = vector.extract_strided_slice %38 {offsets = [0, 32], sizes = [48, 32], strides = [1, 1]} : vector<48x384xf32> to vector<48x32xf32>
    %66 = vector.extract_strided_slice %38 {offsets = [0, 160], sizes = [48, 32], strides = [1, 1]} : vector<48x384xf32> to vector<48x32xf32>
    %67 = vector.extract_strided_slice %38 {offsets = [0, 288], sizes = [48, 32], strides = [1, 1]} : vector<48x384xf32> to vector<48x32xf32>
    %68 = arith.truncf %65 : vector<48x32xf32> to vector<48x32xbf16>
    %69 = arith.truncf %66 : vector<48x32xf32> to vector<48x32xbf16>
    %cst_30 = arith.constant dense<0.000000e+00> : vector<48x48xf32>
    %70 = tpu.matmul %68, %69, %cst_30 {dimension_numbers = #tpu.dot_dimension_numbers<[1], [1], [0], [0], [0, 0, 1, 0], [], []>} : vector<48x32xbf16>, vector<48x32xbf16>, vector<48x48xf32> -> vector<48x48xf32>
    %71 = arith.addf %70, %4 : vector<48x48xf32>
    %cst_31 = arith.constant dense<0xFF800000> : vector<48xf32>
    %72 = vector.multi_reduction <maximumf>, %71, %cst_31 [1] : vector<48x48xf32> to vector<48xf32>
    %73 = vector.shape_cast %72 : vector<48xf32> to vector<48x1xf32>
    %74 = vector.broadcast %73 : vector<48x1xf32> to vector<48x48xf32>
    %75 = arith.subf %71, %74 : vector<48x48xf32>
    %76 = math.exp %75 : vector<48x48xf32>
    %cst_32 = arith.constant dense<0.000000e+00> : vector<48xf32>
    %77 = vector.multi_reduction <add>, %76, %cst_32 [1] : vector<48x48xf32> to vector<48xf32>
    %78 = vector.shape_cast %77 : vector<48xf32> to vector<48x1xf32>
    %79 = vector.broadcast %78 : vector<48x1xf32> to vector<48x48xf32>
    %80 = arith.divf %76, %79 : vector<48x48xf32>
    %81 = arith.truncf %67 : vector<48x32xf32> to vector<48x32xbf16>
    %82 = arith.truncf %80 : vector<48x48xf32> to vector<48x48xbf16>
    %cst_33 = arith.constant dense<0.000000e+00> : vector<48x32xf32>
    %83 = tpu.matmul %82, %81, %cst_33 {dimension_numbers = #tpu.dot_dimension_numbers<[1], [0], [0], [1], [0, 0, 1, 1], [], []>} : vector<48x48xbf16>, vector<48x32xbf16>, vector<48x32xf32> -> vector<48x32xf32>
    %84 = vector.extract_strided_slice %40 {offsets = [32, 0], sizes = [32, 128], strides = [1, 1]} : vector<128x128xbf16> to vector<32x128xbf16>
    %85 = arith.truncf %83 : vector<48x32xf32> to vector<48x32xbf16>
    %cst_34 = arith.constant dense<0.000000e+00> : vector<48x128xf32>
    %86 = tpu.matmul %85, %84, %cst_34 {dimension_numbers = #tpu.dot_dimension_numbers<[1], [0], [0], [1], [0, 0, 1, 1], [], []>} : vector<48x32xbf16>, vector<32x128xbf16>, vector<48x128xf32> -> vector<48x128xf32>
    %87 = arith.addf %64, %86 : vector<48x128xf32>
    %88 = vector.extract_strided_slice %38 {offsets = [0, 64], sizes = [48, 32], strides = [1, 1]} : vector<48x384xf32> to vector<48x32xf32>
    %89 = vector.extract_strided_slice %38 {offsets = [0, 192], sizes = [48, 32], strides = [1, 1]} : vector<48x384xf32> to vector<48x32xf32>
    %90 = vector.extract_strided_slice %38 {offsets = [0, 320], sizes = [48, 32], strides = [1, 1]} : vector<48x384xf32> to vector<48x32xf32>
    %91 = arith.truncf %88 : vector<48x32xf32> to vector<48x32xbf16>
    %92 = arith.truncf %89 : vector<48x32xf32> to vector<48x32xbf16>
    %cst_35 = arith.constant dense<0.000000e+00> : vector<48x48xf32>
    %93 = tpu.matmul %91, %92, %cst_35 {dimension_numbers = #tpu.dot_dimension_numbers<[1], [1], [0], [0], [0, 0, 1, 0], [], []>} : vector<48x32xbf16>, vector<48x32xbf16>, vector<48x48xf32> -> vector<48x48xf32>
    %94 = arith.addf %93, %4 : vector<48x48xf32>
    %cst_36 = arith.constant dense<0xFF800000> : vector<48xf32>
    %95 = vector.multi_reduction <maximumf>, %94, %cst_36 [1] : vector<48x48xf32> to vector<48xf32>
    %96 = vector.shape_cast %95 : vector<48xf32> to vector<48x1xf32>
    %97 = vector.broadcast %96 : vector<48x1xf32> to vector<48x48xf32>
    %98 = arith.subf %94, %97 : vector<48x48xf32>
    %99 = math.exp %98 : vector<48x48xf32>
    %cst_37 = arith.constant dense<0.000000e+00> : vector<48xf32>
    %100 = vector.multi_reduction <add>, %99, %cst_37 [1] : vector<48x48xf32> to vector<48xf32>
    %101 = vector.shape_cast %100 : vector<48xf32> to vector<48x1xf32>
    %102 = vector.broadcast %101 : vector<48x1xf32> to vector<48x48xf32>
    %103 = arith.divf %99, %102 : vector<48x48xf32>
    %104 = arith.truncf %90 : vector<48x32xf32> to vector<48x32xbf16>
    %105 = arith.truncf %103 : vector<48x48xf32> to vector<48x48xbf16>
    %cst_38 = arith.constant dense<0.000000e+00> : vector<48x32xf32>
    %106 = tpu.matmul %105, %104, %cst_38 {dimension_numbers = #tpu.dot_dimension_numbers<[1], [0], [0], [1], [0, 0, 1, 1], [], []>} : vector<48x48xbf16>, vector<48x32xbf16>, vector<48x32xf32> -> vector<48x32xf32>
    %107 = vector.extract_strided_slice %40 {offsets = [64, 0], sizes = [32, 128], strides = [1, 1]} : vector<128x128xbf16> to vector<32x128xbf16>
    %108 = arith.truncf %106 : vector<48x32xf32> to vector<48x32xbf16>
    %cst_39 = arith.constant dense<0.000000e+00> : vector<48x128xf32>
    %109 = tpu.matmul %108, %107, %cst_39 {dimension_numbers = #tpu.dot_dimension_numbers<[1], [0], [0], [1], [0, 0, 1, 1], [], []>} : vector<48x32xbf16>, vector<32x128xbf16>, vector<48x128xf32> -> vector<48x128xf32>
    %110 = arith.addf %87, %109 : vector<48x128xf32>
    %111 = vector.extract_strided_slice %38 {offsets = [0, 96], sizes = [48, 32], strides = [1, 1]} : vector<48x384xf32> to vector<48x32xf32>
    %112 = vector.extract_strided_slice %38 {offsets = [0, 224], sizes = [48, 32], strides = [1, 1]} : vector<48x384xf32> to vector<48x32xf32>
    %113 = vector.extract_strided_slice %38 {offsets = [0, 352], sizes = [48, 32], strides = [1, 1]} : vector<48x384xf32> to vector<48x32xf32>
    %114 = arith.truncf %111 : vector<48x32xf32> to vector<48x32xbf16>
    %115 = arith.truncf %112 : vector<48x32xf32> to vector<48x32xbf16>
    %cst_40 = arith.constant dense<0.000000e+00> : vector<48x48xf32>
    %116 = tpu.matmul %114, %115, %cst_40 {dimension_numbers = #tpu.dot_dimension_numbers<[1], [1], [0], [0], [0, 0, 1, 0], [], []>} : vector<48x32xbf16>, vector<48x32xbf16>, vector<48x48xf32> -> vector<48x48xf32>
    %117 = arith.addf %116, %4 : vector<48x48xf32>
    %cst_41 = arith.constant dense<0xFF800000> : vector<48xf32>
    %118 = vector.multi_reduction <maximumf>, %117, %cst_41 [1] : vector<48x48xf32> to vector<48xf32>
    %119 = vector.shape_cast %118 : vector<48xf32> to vector<48x1xf32>
    %120 = vector.broadcast %119 : vector<48x1xf32> to vector<48x48xf32>
    %121 = arith.subf %117, %120 : vector<48x48xf32>
    %122 = math.exp %121 : vector<48x48xf32>
    %cst_42 = arith.constant dense<0.000000e+00> : vector<48xf32>
    %123 = vector.multi_reduction <add>, %122, %cst_42 [1] : vector<48x48xf32> to vector<48xf32>
    %124 = vector.shape_cast %123 : vector<48xf32> to vector<48x1xf32>
    %125 = vector.broadcast %124 : vector<48x1xf32> to vector<48x48xf32>
    %126 = arith.divf %122, %125 : vector<48x48xf32>
    %127 = arith.truncf %113 : vector<48x32xf32> to vector<48x32xbf16>
    %128 = arith.truncf %126 : vector<48x48xf32> to vector<48x48xbf16>
    %cst_43 = arith.constant dense<0.000000e+00> : vector<48x32xf32>
    %129 = tpu.matmul %128, %127, %cst_43 {dimension_numbers = #tpu.dot_dimension_numbers<[1], [0], [0], [1], [0, 0, 1, 1], [], []>} : vector<48x48xbf16>, vector<48x32xbf16>, vector<48x32xf32> -> vector<48x32xf32>
    %130 = vector.extract_strided_slice %40 {offsets = [96, 0], sizes = [32, 128], strides = [1, 1]} : vector<128x128xbf16> to vector<32x128xbf16>
    %131 = arith.truncf %129 : vector<48x32xf32> to vector<48x32xbf16>
    %cst_44 = arith.constant dense<0.000000e+00> : vector<48x128xf32>
    %132 = tpu.matmul %131, %130, %cst_44 {dimension_numbers = #tpu.dot_dimension_numbers<[1], [0], [0], [1], [0, 0, 1, 1], [], []>} : vector<48x32xbf16>, vector<32x128xbf16>, vector<48x128xf32> -> vector<48x128xf32>
    %133 = arith.addf %110, %132 : vector<48x128xf32>
    %134 = arith.addf %3, %133 : vector<48x128xf32>
    %c0_45 = arith.constant 0 : index
    %c0_46 = arith.constant 0 : index
    %c0_47 = arith.constant 0 : index
    %135 = vector.load %arg18[%c0_45, %c0_46, %c0_47] : memref<1x1x128xf32, #tpu.memory_space<vmem>>, vector<1x1x128xf32>
    %136 = vector.shape_cast %135 : vector<1x1x128xf32> to vector<1x128xf32>
    %137 = vector.broadcast %136 : vector<1x128xf32> to vector<48x128xf32>
    %138 = arith.addf %134, %137 : vector<48x128xf32>
    %c0_48 = arith.constant 0 : index
    %c0_49 = arith.constant 0 : index
    %c0_50 = arith.constant 0 : index
    %139 = vector.load %arg13[%c0_48, %c0_49, %c0_50] : memref<1x1x128xf32, #tpu.memory_space<vmem>>, vector<1x1x128xf32>
    %140 = vector.shape_cast %139 : vector<1x1x128xf32> to vector<1x128xf32>
    %c0_51 = arith.constant 0 : index
    %c0_52 = arith.constant 0 : index
    %c0_53 = arith.constant 0 : index
    %141 = vector.load %arg14[%c0_51, %c0_52, %c0_53] : memref<1x1x128xf32, #tpu.memory_space<vmem>>, vector<1x1x128xf32>
    %142 = vector.shape_cast %141 : vector<1x1x128xf32> to vector<1x128xf32>
    %cst_54 = arith.constant dense<0.000000e+00> : vector<48xf32>
    %143 = vector.multi_reduction <add>, %138, %cst_54 [1] : vector<48x128xf32> to vector<48xf32>
    %144 = vector.shape_cast %143 : vector<48xf32> to vector<48x1xf32>
    %cst_55 = arith.constant 1.280000e+02 : f32
    %145 = vector.broadcast %cst_55 : f32 to vector<48x1xf32>
    %146 = arith.divf %144, %145 : vector<48x1xf32>
    %147 = vector.broadcast %146 : vector<48x1xf32> to vector<48x128xf32>
    %148 = arith.subf %138, %147 : vector<48x128xf32>
    %149 = arith.mulf %148, %148 : vector<48x128xf32>
    %cst_56 = arith.constant dense<0.000000e+00> : vector<48xf32>
    %150 = vector.multi_reduction <add>, %149, %cst_56 [1] : vector<48x128xf32> to vector<48xf32>
    %151 = vector.shape_cast %150 : vector<48xf32> to vector<48x1xf32>
    %cst_57 = arith.constant 1.280000e+02 : f32
    %152 = vector.broadcast %cst_57 : f32 to vector<48x1xf32>
    %153 = arith.divf %151, %152 : vector<48x1xf32>
    %154 = vector.broadcast %146 : vector<48x1xf32> to vector<48x128xf32>
    %155 = arith.subf %138, %154 : vector<48x128xf32>
    %cst_58 = arith.constant 9.99999974E-6 : f32
    %156 = vector.broadcast %cst_58 : f32 to vector<48x1xf32>
    %157 = arith.addf %153, %156 : vector<48x1xf32>
    %158 = math.rsqrt %157 : vector<48x1xf32>
    %159 = vector.broadcast %158 : vector<48x1xf32> to vector<48x128xf32>
    %160 = arith.mulf %155, %159 : vector<48x128xf32>
    %161 = vector.broadcast %140 : vector<1x128xf32> to vector<48x128xf32>
    %162 = arith.mulf %160, %161 : vector<48x128xf32>
    %163 = vector.broadcast %142 : vector<1x128xf32> to vector<48x128xf32>
    %164 = arith.addf %162, %163 : vector<48x128xf32>
    %c0_59 = arith.constant 0 : index
    %c0_60 = arith.constant 0 : index
    %c0_61 = arith.constant 0 : index
    %165 = vector.load %arg19[%c0_59, %c0_60, %c0_61] : memref<1x128x512xbf16, #tpu.memory_space<vmem>>, vector<1x128x512xbf16>
    %166 = vector.shape_cast %165 : vector<1x128x512xbf16> to vector<128x512xbf16>
    %167 = arith.truncf %164 : vector<48x128xf32> to vector<48x128xbf16>
    %cst_62 = arith.constant dense<0.000000e+00> : vector<48x512xf32>
    %168 = tpu.matmul %167, %166, %cst_62 {dimension_numbers = #tpu.dot_dimension_numbers<[1], [0], [0], [1], [0, 0, 1, 1], [], []>} : vector<48x128xbf16>, vector<128x512xbf16>, vector<48x512xf32> -> vector<48x512xf32>
    %c0_63 = arith.constant 0 : index
    %c0_64 = arith.constant 0 : index
    %c0_65 = arith.constant 0 : index
    %169 = vector.load %arg20[%c0_63, %c0_64, %c0_65] : memref<1x1x512xf32, #tpu.memory_space<vmem>>, vector<1x1x512xf32>
    %170 = vector.shape_cast %169 : vector<1x1x512xf32> to vector<1x512xf32>
    %171 = vector.broadcast %170 : vector<1x512xf32> to vector<48x512xf32>
    %172 = arith.addf %168, %171 : vector<48x512xf32>
    %cst_66 = arith.constant 5.000000e-01 : f32
    %173 = vector.broadcast %cst_66 : f32 to vector<48x512xf32>
    %174 = arith.mulf %173, %172 : vector<48x512xf32>
    %cst_67 = arith.constant 0.707106769 : f32
    %175 = vector.broadcast %cst_67 : f32 to vector<48x512xf32>
    %176 = arith.mulf %172, %175 : vector<48x512xf32>
    %177 = math.absf %176 : vector<48x512xf32>
    %cst_68 = arith.constant 0.327591091 : f32
    %178 = vector.broadcast %cst_68 : f32 to vector<48x512xf32>
    %179 = arith.mulf %178, %177 : vector<48x512xf32>
    %cst_69 = arith.constant 1.000000e+00 : f32
    %180 = vector.broadcast %cst_69 : f32 to vector<48x512xf32>
    %181 = arith.addf %180, %179 : vector<48x512xf32>
    %cst_70 = arith.constant 1.000000e+00 : f32
    %182 = vector.broadcast %cst_70 : f32 to vector<48x512xf32>
    %183 = arith.divf %182, %181 : vector<48x512xf32>
    %cst_71 = arith.constant 1.06140542 : f32
    %184 = vector.broadcast %cst_71 : f32 to vector<48x512xf32>
    %185 = arith.mulf %184, %183 : vector<48x512xf32>
    %cst_72 = arith.constant 1.45315206 : f32
    %186 = vector.broadcast %cst_72 : f32 to vector<48x512xf32>
    %187 = arith.subf %185, %186 : vector<48x512xf32>
    %188 = arith.mulf %187, %183 : vector<48x512xf32>
    %cst_73 = arith.constant 1.42141378 : f32
    %189 = vector.broadcast %cst_73 : f32 to vector<48x512xf32>
    %190 = arith.addf %188, %189 : vector<48x512xf32>
    %191 = arith.mulf %190, %183 : vector<48x512xf32>
    %cst_74 = arith.constant 0.284496725 : f32
    %192 = vector.broadcast %cst_74 : f32 to vector<48x512xf32>
    %193 = arith.subf %191, %192 : vector<48x512xf32>
    %194 = arith.mulf %193, %183 : vector<48x512xf32>
    %cst_75 = arith.constant 0.254829586 : f32
    %195 = vector.broadcast %cst_75 : f32 to vector<48x512xf32>
    %196 = arith.addf %194, %195 : vector<48x512xf32>
    %197 = arith.mulf %196, %183 : vector<48x512xf32>
    %cst_76 = arith.constant 0.000000e+00 : f32
    %198 = vector.broadcast %cst_76 : f32 to vector<48x512xf32>
    %199 = arith.subf %198, %177 : vector<48x512xf32>
    %200 = arith.mulf %199, %177 : vector<48x512xf32>
    %201 = math.exp %200 : vector<48x512xf32>
    %202 = arith.mulf %197, %201 : vector<48x512xf32>
    %cst_77 = arith.constant 1.000000e+00 : f32
    %203 = vector.broadcast %cst_77 : f32 to vector<48x512xf32>
    %204 = arith.subf %203, %202 : vector<48x512xf32>
    %cst_78 = arith.constant 0.000000e+00 : f32
    %205 = vector.broadcast %cst_78 : f32 to vector<48x512xf32>
    %206 = arith.cmpf olt, %176, %205 : vector<48x512xf32>
    %cst_79 = arith.constant 0.000000e+00 : f32
    %207 = vector.broadcast %cst_79 : f32 to vector<48x512xf32>
    %208 = arith.subf %207, %204 : vector<48x512xf32>
    %209 = arith.select %206, %208, %204 : vector<48x512xi1>, vector<48x512xf32>
    %cst_80 = arith.constant 1.000000e+00 : f32
    %210 = vector.broadcast %cst_80 : f32 to vector<48x512xf32>
    %211 = arith.addf %210, %209 : vector<48x512xf32>
    %212 = arith.mulf %174, %211 : vector<48x512xf32>
    %c0_81 = arith.constant 0 : index
    %c0_82 = arith.constant 0 : index
    %c0_83 = arith.constant 0 : index
    %213 = vector.load %arg21[%c0_81, %c0_82, %c0_83] : memref<1x512x128xbf16, #tpu.memory_space<vmem>>, vector<1x512x128xbf16>
    %214 = vector.shape_cast %213 : vector<1x512x128xbf16> to vector<512x128xbf16>
    %215 = arith.truncf %212 : vector<48x512xf32> to vector<48x512xbf16>
    %cst_84 = arith.constant dense<0.000000e+00> : vector<48x128xf32>
    %216 = tpu.matmul %215, %214, %cst_84 {dimension_numbers = #tpu.dot_dimension_numbers<[1], [0], [0], [1], [0, 0, 1, 1], [], []>} : vector<48x512xbf16>, vector<512x128xbf16>, vector<48x128xf32> -> vector<48x128xf32>
    %217 = arith.addf %138, %216 : vector<48x128xf32>
    %c0_85 = arith.constant 0 : index
    %c0_86 = arith.constant 0 : index
    %c0_87 = arith.constant 0 : index
    %218 = vector.load %arg22[%c0_85, %c0_86, %c0_87] : memref<1x1x128xf32, #tpu.memory_space<vmem>>, vector<1x1x128xf32>
    %219 = vector.shape_cast %218 : vector<1x1x128xf32> to vector<1x128xf32>
    %220 = vector.broadcast %219 : vector<1x128xf32> to vector<48x128xf32>
    %221 = arith.addf %217, %220 : vector<48x128xf32>
    %c0_88 = arith.constant 0 : index
    %c0_89 = arith.constant 0 : index
    %222 = vector.load %arg26[%c0_88, %c0_89] : memref<48x128xf32, #tpu.memory_space<vmem>>, vector<48x128xf32>
    tpu.vector_store %arg26[%c0_88, %c0_89], %221 {strides = array<i32>} : memref<48x128xf32, #tpu.memory_space<vmem>>, vector<48x128xf32>,
    %c1_i32 = arith.constant 1 : i32
    %223 = arith.cmpi eq, %arg0, %c1_i32 : i32
    %224 = arith.extui %223 : i1 to i32
    %c0_i32_90 = arith.constant 0 : i32
    %225 = arith.cmpi ne, %224, %c0_i32_90 : i32
    scf.if %225 {
      %226 = vector.extract_strided_slice %221 {offsets = [8, 0], sizes = [8, 128], strides = [1, 1]} : vector<48x128xf32> to vector<8x128xf32>
      %c0_91 = arith.constant 0 : index
      %c0_92 = arith.constant 0 : index
      %227 = vector.load %arg23[%c0_91, %c0_92] : memref<1x128xf32, #tpu.memory_space<vmem>>, vector<1x128xf32>
      %c0_93 = arith.constant 0 : index
      %c0_94 = arith.constant 0 : index
      %228 = vector.load %arg24[%c0_93, %c0_94] : memref<1x128xf32, #tpu.memory_space<vmem>>, vector<1x128xf32>
      %cst_95 = arith.constant dense<0.000000e+00> : vector<8xf32>
      %229 = vector.multi_reduction <add>, %226, %cst_95 [1] : vector<8x128xf32> to vector<8xf32>
      %230 = vector.shape_cast %229 : vector<8xf32> to vector<8x1xf32>
      %cst_96 = arith.constant 1.280000e+02 : f32
      %231 = vector.broadcast %cst_96 : f32 to vector<8x1xf32>
      %232 = arith.divf %230, %231 : vector<8x1xf32>
      %233 = vector.broadcast %232 : vector<8x1xf32> to vector<8x128xf32>
      %234 = arith.subf %226, %233 : vector<8x128xf32>
      %235 = arith.mulf %234, %234 : vector<8x128xf32>
      %cst_97 = arith.constant dense<0.000000e+00> : vector<8xf32>
      %236 = vector.multi_reduction <add>, %235, %cst_97 [1] : vector<8x128xf32> to vector<8xf32>
      %237 = vector.shape_cast %236 : vector<8xf32> to vector<8x1xf32>
      %cst_98 = arith.constant 1.280000e+02 : f32
      %238 = vector.broadcast %cst_98 : f32 to vector<8x1xf32>
      %239 = arith.divf %237, %238 : vector<8x1xf32>
      %240 = vector.broadcast %232 : vector<8x1xf32> to vector<8x128xf32>
      %241 = arith.subf %226, %240 : vector<8x128xf32>
      %cst_99 = arith.constant 9.99999974E-6 : f32
      %242 = vector.broadcast %cst_99 : f32 to vector<8x1xf32>
      %243 = arith.addf %239, %242 : vector<8x1xf32>
      %244 = math.rsqrt %243 : vector<8x1xf32>
      %245 = vector.broadcast %244 : vector<8x1xf32> to vector<8x128xf32>
      %246 = arith.mulf %241, %245 : vector<8x128xf32>
      %247 = vector.broadcast %227 : vector<1x128xf32> to vector<8x128xf32>
      %248 = arith.mulf %246, %247 : vector<8x128xf32>
      %249 = vector.broadcast %228 : vector<1x128xf32> to vector<8x128xf32>
      %250 = arith.addf %248, %249 : vector<8x128xf32>
      %c0_100 = arith.constant 0 : index
      %c0_101 = arith.constant 0 : index
      %251 = vector.load %arg25[%c0_100, %c0_101] : memref<16x128xf32, #tpu.memory_space<vmem>>, vector<8x128xf32>
      tpu.vector_store %arg25[%c0_100, %c0_101], %250 {strides = array<i32>} : memref<16x128xf32, #tpu.memory_space<vmem>>, vector<8x128xf32>,
      %252 = vector.extract_strided_slice %221 {offsets = [32, 0], sizes = [8, 128], strides = [1, 1]} : vector<48x128xf32> to vector<8x128xf32>
      %c0_102 = arith.constant 0 : index
      %c0_103 = arith.constant 0 : index
      %253 = vector.load %arg23[%c0_102, %c0_103] : memref<1x128xf32, #tpu.memory_space<vmem>>, vector<1x128xf32>
      %c0_104 = arith.constant 0 : index
      %c0_105 = arith.constant 0 : index
      %254 = vector.load %arg24[%c0_104, %c0_105] : memref<1x128xf32, #tpu.memory_space<vmem>>, vector<1x128xf32>
      %cst_106 = arith.constant dense<0.000000e+00> : vector<8xf32>
      %255 = vector.multi_reduction <add>, %252, %cst_106 [1] : vector<8x128xf32> to vector<8xf32>
      %256 = vector.shape_cast %255 : vector<8xf32> to vector<8x1xf32>
      %cst_107 = arith.constant 1.280000e+02 : f32
      %257 = vector.broadcast %cst_107 : f32 to vector<8x1xf32>
      %258 = arith.divf %256, %257 : vector<8x1xf32>
      %259 = vector.broadcast %258 : vector<8x1xf32> to vector<8x128xf32>
      %260 = arith.subf %252, %259 : vector<8x128xf32>
      %261 = arith.mulf %260, %260 : vector<8x128xf32>
      %cst_108 = arith.constant dense<0.000000e+00> : vector<8xf32>
      %262 = vector.multi_reduction <add>, %261, %cst_108 [1] : vector<8x128xf32> to vector<8xf32>
      %263 = vector.shape_cast %262 : vector<8xf32> to vector<8x1xf32>
      %cst_109 = arith.constant 1.280000e+02 : f32
      %264 = vector.broadcast %cst_109 : f32 to vector<8x1xf32>
      %265 = arith.divf %263, %264 : vector<8x1xf32>
      %266 = vector.broadcast %258 : vector<8x1xf32> to vector<8x128xf32>
      %267 = arith.subf %252, %266 : vector<8x128xf32>
      %cst_110 = arith.constant 9.99999974E-6 : f32
      %268 = vector.broadcast %cst_110 : f32 to vector<8x1xf32>
      %269 = arith.addf %265, %268 : vector<8x1xf32>
      %270 = math.rsqrt %269 : vector<8x1xf32>
      %271 = vector.broadcast %270 : vector<8x1xf32> to vector<8x128xf32>
      %272 = arith.mulf %267, %271 : vector<8x128xf32>
      %273 = vector.broadcast %253 : vector<1x128xf32> to vector<8x128xf32>
      %274 = arith.mulf %272, %273 : vector<8x128xf32>
      %275 = vector.broadcast %254 : vector<1x128xf32> to vector<8x128xf32>
      %276 = arith.addf %274, %275 : vector<8x128xf32>
      %c8 = arith.constant 8 : index
      %c0_111 = arith.constant 0 : index
      %277 = vector.load %arg25[%c8, %c0_111] : memref<16x128xf32, #tpu.memory_space<vmem>>, vector<8x128xf32>
      tpu.vector_store %arg25[%c8, %c0_111], %276 {strides = array<i32>} : memref<16x128xf32, #tpu.memory_space<vmem>>, vector<8x128xf32>,
    } else {
    }
    return
  }
  func.func @transform_0(%arg0: i32) -> (i32, i32) {
    %c0_i32 = arith.constant 0 : i32
    %c0_i32_0 = arith.constant 0 : i32
    %c0_i32_1 = arith.constant 0 : i32
    return %c0_i32, %c0_i32_0 : i32, i32
  }
  func.func @transform_1(%arg0: i32) -> (i32, i32) {
    %c0_i32 = arith.constant 0 : i32
    %c0_i32_0 = arith.constant 0 : i32
    %c0_i32_1 = arith.constant 0 : i32
    return %c0_i32, %c0_i32_0 : i32, i32
  }
  func.func @transform_2(%arg0: i32) -> (i32, i32) {
    %c0_i32 = arith.constant 0 : i32
    %c0_i32_0 = arith.constant 0 : i32
    %c0_i32_1 = arith.constant 0 : i32
    return %c0_i32, %c0_i32_0 : i32, i32
  }
  func.func @transform_3(%arg0: i32) -> (i32, i32) {
    %c0_i32 = arith.constant 0 : i32
    %c0_i32_0 = arith.constant 0 : i32
    %c0_i32_1 = arith.constant 0 : i32
    return %c0_i32, %c0_i32_0 : i32, i32
  }
  func.func @transform_4(%arg0: i32) -> (i32, i32) {
    %c0_i32 = arith.constant 0 : i32
    %c0_i32_0 = arith.constant 0 : i32
    %c0_i32_1 = arith.constant 0 : i32
    return %c0_i32, %c0_i32_0 : i32, i32
  }
  func.func @transform_5(%arg0: i32) -> (i32, i32) {
    %c0_i32 = arith.constant 0 : i32
    %c0_i32_0 = arith.constant 0 : i32
    %c0_i32_1 = arith.constant 0 : i32
    return %c0_i32, %c0_i32_0 : i32, i32
  }
  func.func @transform_6(%arg0: i32) -> (i32, i32) {
    %c0_i32 = arith.constant 0 : i32
    %c0_i32_0 = arith.constant 0 : i32
    %c0_i32_1 = arith.constant 0 : i32
    return %c0_i32, %c0_i32_0 : i32, i32
  }
  func.func @transform_7(%arg0: i32) -> (i32, i32) {
    %c0_i32 = arith.constant 0 : i32
    %c0_i32_0 = arith.constant 0 : i32
    %c0_i32_1 = arith.constant 0 : i32
    return %c0_i32, %c0_i32_0 : i32, i32
  }
  func.func @transform_8(%arg0: i32) -> (i32, i32) {
    %c0_i32 = arith.constant 0 : i32
    %c0_i32_0 = arith.constant 0 : i32
    %c0_i32_1 = arith.constant 0 : i32
    return %c0_i32, %c0_i32_0 : i32, i32
  }
  func.func @transform_9(%arg0: i32) -> (i32, i32) {
    %c0_i32 = arith.constant 0 : i32
    %c0_i32_0 = arith.constant 0 : i32
    %c0_i32_1 = arith.constant 0 : i32
    return %c0_i32, %c0_i32_0 : i32, i32
  }
  func.func @transform_10(%arg0: i32) -> (i32, i32, i32) {
    %c0_i32 = arith.constant 0 : i32
    %c0_i32_0 = arith.constant 0 : i32
    %c0_i32_1 = arith.constant 0 : i32
    return %arg0, %c0_i32, %c0_i32_0 : i32, i32, i32
  }
  func.func @transform_11(%arg0: i32) -> (i32, i32, i32) {
    %c0_i32 = arith.constant 0 : i32
    %c0_i32_0 = arith.constant 0 : i32
    %c0_i32_1 = arith.constant 0 : i32
    return %arg0, %c0_i32, %c0_i32_0 : i32, i32, i32
  }
  func.func @transform_12(%arg0: i32) -> (i32, i32, i32) {
    %c0_i32 = arith.constant 0 : i32
    %c0_i32_0 = arith.constant 0 : i32
    %c0_i32_1 = arith.constant 0 : i32
    return %arg0, %c0_i32, %c0_i32_0 : i32, i32, i32
  }
  func.func @transform_13(%arg0: i32) -> (i32, i32, i32) {
    %c0_i32 = arith.constant 0 : i32
    %c0_i32_0 = arith.constant 0 : i32
    %c0_i32_1 = arith.constant 0 : i32
    return %arg0, %c0_i32, %c0_i32_0 : i32, i32, i32
  }
  func.func @transform_14(%arg0: i32) -> (i32, i32, i32) {
    %c0_i32 = arith.constant 0 : i32
    %c0_i32_0 = arith.constant 0 : i32
    %c0_i32_1 = arith.constant 0 : i32
    return %arg0, %c0_i32, %c0_i32_0 : i32, i32, i32
  }
  func.func @transform_15(%arg0: i32) -> (i32, i32, i32) {
    %c0_i32 = arith.constant 0 : i32
    %c0_i32_0 = arith.constant 0 : i32
    %c0_i32_1 = arith.constant 0 : i32
    return %arg0, %c0_i32, %c0_i32_0 : i32, i32, i32
  }
  func.func @transform_16(%arg0: i32) -> (i32, i32, i32) {
    %c0_i32 = arith.constant 0 : i32
    %c0_i32_0 = arith.constant 0 : i32
    %c0_i32_1 = arith.constant 0 : i32
    return %arg0, %c0_i32, %c0_i32_0 : i32, i32, i32
  }
  func.func @transform_17(%arg0: i32) -> (i32, i32, i32) {
    %c0_i32 = arith.constant 0 : i32
    %c0_i32_0 = arith.constant 0 : i32
    %c0_i32_1 = arith.constant 0 : i32
    return %arg0, %c0_i32, %c0_i32_0 : i32, i32, i32
  }
  func.func @transform_18(%arg0: i32) -> (i32, i32, i32) {
    %c0_i32 = arith.constant 0 : i32
    %c0_i32_0 = arith.constant 0 : i32
    %c0_i32_1 = arith.constant 0 : i32
    return %arg0, %c0_i32, %c0_i32_0 : i32, i32, i32
  }
  func.func @transform_19(%arg0: i32) -> (i32, i32, i32) {
    %c0_i32 = arith.constant 0 : i32
    %c0_i32_0 = arith.constant 0 : i32
    %c0_i32_1 = arith.constant 0 : i32
    return %arg0, %c0_i32, %c0_i32_0 : i32, i32, i32
  }
  func.func @transform_20(%arg0: i32) -> (i32, i32, i32) {
    %c0_i32 = arith.constant 0 : i32
    %c0_i32_0 = arith.constant 0 : i32
    %c0_i32_1 = arith.constant 0 : i32
    return %arg0, %c0_i32, %c0_i32_0 : i32, i32, i32
  }
  func.func @transform_21(%arg0: i32) -> (i32, i32, i32) {
    %c0_i32 = arith.constant 0 : i32
    %c0_i32_0 = arith.constant 0 : i32
    %c0_i32_1 = arith.constant 0 : i32
    return %arg0, %c0_i32, %c0_i32_0 : i32, i32, i32
  }
  func.func @transform_22(%arg0: i32) -> (i32, i32) {
    %c0_i32 = arith.constant 0 : i32
    %c0_i32_0 = arith.constant 0 : i32
    %c0_i32_1 = arith.constant 0 : i32
    return %c0_i32, %c0_i32_0 : i32, i32
  }
  func.func @transform_23(%arg0: i32) -> (i32, i32) {
    %c0_i32 = arith.constant 0 : i32
    %c0_i32_0 = arith.constant 0 : i32
    %c0_i32_1 = arith.constant 0 : i32
    return %c0_i32, %c0_i32_0 : i32, i32
  }
  func.func @transform_24(%arg0: i32) -> (i32, i32) {
    %c0_i32 = arith.constant 0 : i32
    %c0_i32_0 = arith.constant 0 : i32
    %c0_i32_1 = arith.constant 0 : i32
    return %c0_i32, %c0_i32_0 : i32, i32
  }
}

</mosaic_0001>

<bundles_post_ra>
// kernel: gpt_forward.1
= control target key start
LH: loop header
LB: loop body
LE: loop exit
PB: predicated region body
PF: predicated region fallthrough
CT: control target
= control target key end

     0   :  { %s7688_s0 = inlined_call_operand.vmem [shape: f32[16,64], index: 0, kind: input, shape index: {}]   ;;  %s7689_s1 = inlined_call_operand.vmem [shape: f32[16,16], index: 1, kind: input, shape index: {}]   ;;  %s7690_s2 = inlined_call_operand.vmem [shape: f32[16,16], index: 2, kind: input, shape index: {}]   ;;  %s7691_s3 = inlined_call_operand.vmem [shape: f32[16,128], index: 3, kind: input, shape index: {}]   ;;  %s7692_s4 = inlined_call_operand.vmem [shape: f32[24,128], index: 4, kind: input, shape index: {}]   ;;  %s7693_s5 = inlined_call_operand.vmem [shape: f32[48,48], index: 5, kind: input, shape index: {}]   ;;  %s7694_s6 = inlined_call_operand.vmem [shape: bf16[16,64], index: 6, kind: input, shape index: {}]   ;;  %s7695_s7 = inlined_call_operand.vmem [shape: f32[1,64], index: 7, kind: input, shape index: {}]   ;;  %s7696_s8 = inlined_call_operand.vmem [shape: bf16[16,128], index: 8, kind: input, shape index: {}]   ;;  %s7697_s9 = inlined_call_operand.vmem [shape: f32[1,128], index: 9, kind: input, shape index: {}]   ;;  %s7698_s10 = inlined_call_operand.vmem [shape: f32[2,1,128], index: 10, kind: input, shape index: {}]   ;;  %s7699_s11 = inlined_call_operand.vmem [shape: f32[2,1,128], index: 11, kind: input, shape index: {}]   ;;  %s7700_s12 = inlined_call_operand.vmem [shape: f32[2,1,128], index: 12, kind: input, shape index: {}]   ;;  %s7701_s13 = inlined_call_operand.vmem [shape: f32[2,1,128], index: 13, kind: input, shape index: {}]   ;;  %s7702_s14 = inlined_call_operand.hbm [shape: bf16[2,128,384], index: 14, kind: input, shape index: {}]   ;;  %s7703_s15 = inlined_call_operand.vmem [shape: f32[2,1,384], index: 15, kind: input, shape index: {}]   ;;  %s7704_s16 = inlined_call_operand.vmem [shape: bf16[2,128,128], index: 16, kind: input, shape index: {}]   ;;  %s7705_s17 = inlined_call_operand.vmem [shape: f32[2,1,128], index: 17, kind: input, shape index: {}]   ;;  %s7706_s18 = inlined_call_operand.hbm [shape: bf16[2,128,512], index: 18, kind: input, shape index: {}]   ;;  %s7707_s19 = inlined_call_operand.vmem [shape: f32[2,1,512], index: 19, kind: input, shape index: {}]   ;;  %s7708_s20 = inlined_call_operand.hbm [shape: bf16[2,512,128], index: 20, kind: input, shape index: {}]   ;;  %s7709_s21 = inlined_call_operand.vmem [shape: f32[2,1,128], index: 21, kind: input, shape index: {}]   ;;  %s7710_s22 = inlined_call_operand.vmem [shape: f32[1,128], index: 22, kind: input, shape index: {}]   ;;  %s7711_s23 = inlined_call_operand.vmem [shape: f32[1,128], index: 23, kind: input, shape index: {}]   ;;  %s7712_s24 = inlined_call_operand.hbm [shape: f32[16,128], index: 24, kind: output, shape index: {}]  }
   0x1   :  { %7747 = sst [smem:[#allocation37_spill]] %s7688_s0 }
   0x2   :  { %7748 = sst [smem:[#allocation38_spill]] %s7689_s1 }
   0x3   :  { %7749 = sst [smem:[#allocation39_spill]] %s7690_s2 }
   0x4   :  { %7750 = sst [smem:[#allocation40_spill]] %s7691_s3 }
   0x5   :  { %7751 = sst [smem:[#allocation41_spill]] %s7692_s4 }
   0x6   :  { %7752 = sst [smem:[#allocation42_spill]] %s7693_s5 }
   0x7   :  { %7753 = sst [smem:[#allocation43_spill]] %s7694_s6 }
   0x8   :  { %7754 = sst [smem:[#allocation44_spill]] %s7695_s7 }
   0x9   :  { %7755 = sst [smem:[#allocation45_spill]] %s7696_s8 }
   0xa   :  { %7756 = sst [smem:[#allocation46_spill]] %s7697_s9 }
   0xb   :  { %7757 = sst [smem:[#allocation47_spill]] %s7702_s14 }
   0xc   :  { %7758 = sst [smem:[#allocation48_spill]] %s7706_s18 }
   0xd   :  { %7759 = sst [smem:[#allocation49_spill]] %s7708_s20 }
   0xe   :  { %7760 = sst [smem:[#allocation50_spill]] %s7709_s21 }
   0xf   :  { %7761 = sst [smem:[#allocation51_spill]] %s7710_s22 }
  0x10   :  { %7762 = sst [smem:[#allocation52_spill]] %s7711_s23 }
  0x11   :  { %7763 = sst [smem:[#allocation53_spill]] %s7712_s24 }
  0x12   :  { %29 = vsyncpa [#allocation4], 0 }
  0x13   :  { %31 = vsyncpa [#allocation4 + $0x1], 0 }
  0x14   :  { %32 = vsyncpa [#allocation7], 0 }
  0x15   :  { %34 = vsyncpa [#allocation7 + $0x1], 0 }
  0x16   :  { %35 = vsyncpa [#allocation5], 0  ;;  %s5933_s5 = smov 0   ;;  %s5935_s26 = smov 0  }
  0x17   :  { %s5937_s27 = smov 0   ;;  %s5939_s28 = smov 0  }
  0x18 LB: > { %7764 = sst [smem:[#allocation13_spill]] %s5781_s27  ;;  %s5952_s6 = sadd.s32 4294967295, %s5785_s28   ;;  %s5785_s28 = sphi %s5939_s28, %s7852_s28   ;;  %s5781_s27 = sphi %s5937_s27, %s7854_s27   ;;  %s5777_s26 = sphi %s5935_s26, %s7856_s26   ;;  %s5773_s5 = sphi %s5933_s5, %s7855_s5  }
  0x19   : > { %s5955_s2 = sadd.s32 1, %s5785_s28   ;;  %s362_s0 = sadd.s32 1, %s5781_s27 }
  0x1a   : > { %7765 = sst [smem:[#allocation14_spill]] %s5955_s2  ;;  %s359_s29 = ssub.s32 %s5785_s28, %s5955_s2 }
  0x1b   : > { %p360_p0 = scmp.eq.s32.totalorder %s359_s29, 0  ;;  %p369_p1 = scmp.ne.s32.totalorder %s5781_s27, %s5777_s26 }
  0x1c   : > { %p370_p2 = scmp.eq.s32.totalorder %s5785_s28, 0  ;;  %p375_p3 = scmp.ne.s32.totalorder %s5777_s26, %s5773_s5 }
  0x1d   : > { %s5965_s7 = scalar_select %p360_p0, %s5781_s27, %s362_s0  }
  0x1e   : > { %p371_p4 = por %p370_p2, %p369_p1  ;;  %p376_p5 = scmp.eq.s32.totalorder %s5952_s6, 0 }
  0x1f   : > { %7766 = sst [smem:[#allocation15_spill]] %s5965_s7  ;;  %p5215_p6 = scmp.lt.s32.totalorder %s5785_s28, 2 }
  0x20   : > { %p5969_p7 = por %p376_p5, %p375_p3  ;;  %s5974_s3 = sand.u32 1, %s5781_s27  }
  0x21   : > { %p5976_p8 = pnand %p5215_p6, %p371_p4  ;;  %s746_s8 = sand.u32 1, %s5785_s28  }
  0x22   : > { %s7767_s30 = scalar_select %p5969_p7, 1, 0 }
  0x23   : > { %s7723_s4 = sshll.u32 %s5974_s3, 8  ;;  %s7724_s1 = sshll.u32 %s5785_s28, 12 }
  0x24   : > { %s750_s5 = scalar_lea.vmem [#allocation6], %s7723_s4  ;;  %s7769_s18 = sld [smem:[#allocation48_spill]] }
  0x25   : > { %s757_s29 = sshll.u32 %s750_s5, 4  ;;  %s5994_s27 = scalar_lea.sflag [#allocation7], %s746_s8  ;;  %s5992_s29 = int_to_ptr.vmem [resolvable:$true] %s757_s29 }
  0x26   : > { %p6000_p10 = pneg %p5976_p8 }
  0x2a   : > { %s5990_s2 = scalar_lea.hbm %s7769_s18, %s7724_s1  ;;  %s5632_s0 = scalar_lea.hbm %s7769_s18, 8192 }
  0x2b   : > { %s5627_s24 = scalar_lea.hbm %s5990_s2, 4096  ;;  %p5633_p13 = scmp.lt.u32.totalorder %s5990_s2, %s7769_s18 }
  0x2c   : > { %p5628_p9 = scmp.ne.s32.totalorder %s5990_s2, %s5627_s24  ;;  %p5634_p0 = scmp.lt.u32.totalorder %s5632_s0, %s5627_s24 }
  0x2d   : > { %p5636_p2 = scmp.lt.u32.totalorder %s5627_s24, %s5990_s2 }
  0x2e   : > { %p5630_p11 = pnand %p6000_p10, %p5628_p9  ;;  %p5635_p1 = por %p5634_p0, %p5633_p13 }
  0x30   : > { %p5631_p12 = pneg %p5630_p11  ;;  %p5637_p3 = por %p5636_p2, %p5635_p1 }
  0x32   : > { %p5638_p4 = pnand %p5637_p3, %p5631_p12 }
  0x34   : > { %5641 = shalt.err (!%p5638_p4)
}
  0x35   : > { %s5642_s8 = scalar_lea.vmem %s5992_s29, 4096  ;;  %s5787_s7 = smov [#allocation6]  }
  0x36   : > { %p5643_p5 = scmp.ne.s32.totalorder %s5992_s29, %s5642_s8  ;;  %s5647_s5 = sshll.u32 %s5787_s7, 4  ;;  %s5648_s5 = int_to_ptr.vmem [resolvable:$false] %s5647_s5 }
  0x37   : > { %s5649_s23 = scalar_lea.vmem %s5648_s5, 8192  ;;  %p5650_p11 = scmp.lt.s32.totalorder %s5992_s29, %s5648_s5 }
  0x38   : > { %p5645_p6 = pnand %p5643_p5, %p6000_p10  ;;  %p5651_p7 = scmp.lt.s32.totalorder %s5649_s23, %s5642_s8 }
  0x3a   : > { %p5646_p9 = pneg %p5645_p6  ;;  %p5652_p13 = por %p5651_p7, %p5650_p11 }
  0x3c   : > { %p5653_p0 = pnand %p5652_p13, %p5646_p9 }
  0x3e   : > { %5656 = shalt.err (!%p5653_p0)
}
  0x3f   : > { %s5788_s24 = smov 256   ;;  %s5789_s1 = smov 16  }
  0x40   : > { %5211 = dma.hbm_to_vmem [thread:$0]  (!%p5976_p8), %s5990_s2, 4096, %s5992_s29, %s5994_s27, %s5788_s24, %s5788_s24, %s5789_s1  }
  0x41   : > { %s7771_s0 = sshll.u32 %s5785_s28, 12  ;;  %s7772_s20 = sld [smem:[#allocation49_spill]] }
  0x42   : > { %s7773_s23 = sshll.u32 %s5974_s3, 8  ;;  %p4581_p7 = scmp.ge.s32.totalorder %s5785_s28, 1 }
  0x43   : > { %s778_s18 = scalar_lea.vmem [#allocation8], %s7773_s23  ;;  %p799_p12 = scmp.lt.s32.totalorder %s5785_s28, 3 }
  0x44   : > { %s785_s22 = sshll.u32 %s778_s18, 4  ;;  %s5191_s9 = smul.u32 192, %s5974_s3  ;;  %s6034_s22 = int_to_ptr.vmem [resolvable:$true] %s785_s22 }
  0x45   : > { %p6038_p1 = pnand %p4581_p7, %p799_p12  ;;  %s5192_s2 = smul.u32 3072, %s5785_s28 }
  0x46   : > { %s7775_s14 = sld [smem:[#allocation47_spill]]  ;;  %s708_s18 = scalar_lea.vmem [#allocation3], %s5191_s9 }
  0x47   : > { %s6029_s5 = scalar_lea.hbm %s7772_s20, %s7771_s0  ;;  %s715_s0 = sshll.u32 %s708_s18, 4  ;;  %s6048_s0 = int_to_ptr.vmem [resolvable:$true] %s715_s0 }
  0x48   : > { %s7774_s21 = scalar_select %p6038_p1, 1, 0 }
  0x49   : > { %s705_s8 = scalar_lea.sflag [#allocation4], %s5974_s3 }
  0x4c   : > { %s6046_s1 = scalar_lea.hbm %s7775_s14, %s5192_s2  ;;  %s5662_s29 = scalar_lea.hbm %s7775_s14, 6144 }
  0x4d   : > { %s5657_s7 = scalar_lea.hbm %s6046_s1, 3072  ;;  %p5663_p5 = scmp.lt.u32.totalorder %s6046_s1, %s7775_s14 }
  0x4e   : > { %p5658_p2 = scmp.ne.s32.totalorder %s6046_s1, %s5657_s7  ;;  %p5664_p6 = scmp.lt.u32.totalorder %s5662_s29, %s5657_s7 }
  0x4f   : > { %p5666_p11 = scmp.lt.u32.totalorder %s5657_s7, %s6046_s1 }
  0x50   : > { %p5660_p3 = pnand %p5658_p2, %p6000_p10  ;;  %p5665_p9 = por %p5664_p6, %p5663_p5 }
  0x52   : > { %p5661_p4 = pneg %p5660_p3  ;;  %p5667_p13 = por %p5666_p11, %p5665_p9 }
  0x54   : > { %p5668_p0 = pnand %p5667_p13, %p5661_p4 }
  0x56   : > { %5671 = shalt.err (!%p5668_p0)
}
  0x57   : > { %s5672_s9 = scalar_lea.vmem %s6048_s0, 3072  ;;  %s5790_s18 = smov [#allocation3]  }
  0x58   : > { %p5673_p7 = scmp.ne.s32.totalorder %s6048_s0, %s5672_s9  ;;  %s5677_s28 = sshll.u32 %s5790_s18, 4  ;;  %s5678_s28 = int_to_ptr.vmem [resolvable:$false] %s5677_s28 }
  0x59   : > { %s5679_s23 = scalar_lea.vmem %s5678_s28, 6144  ;;  %p5680_p3 = scmp.lt.s32.totalorder %s6048_s0, %s5678_s28 }
  0x5a   : > { %p5675_p12 = pnand %p5673_p7, %p6000_p10  ;;  %p5681_p1 = scmp.lt.s32.totalorder %s5679_s23, %s5672_s9 }
  0x5c   : > { %p5676_p2 = pneg %p5675_p12  ;;  %p5682_p5 = por %p5681_p1, %p5680_p3 }
  0x5e   : > { %p5683_p6 = pnand %p5682_p5, %p5676_p2 }
  0x60   : > { %5686 = shalt.err (!%p5683_p6)
}
  0x61   : > { %s5791_s7 = smov 192   ;;  %s5792_s29 = smov 12  }
  0x62   : > { %5208 = dma.hbm_to_vmem [thread:$0]  (!%p5976_p8), %s6046_s1, 3072, %s6048_s0, %s705_s8, %s5791_s7, %s5791_s7, %s5792_s29  }
  0x63   : > { %s5687_s2 = scalar_lea.hbm %s6029_s5, 4096  ;;  %s5692_s18 = scalar_lea.hbm %s7772_s20, 8192 }
  0x64   : > { %p5688_p4 = scmp.ne.s32.totalorder %s6029_s5, %s5687_s2  ;;  %p5693_p11 = scmp.lt.u32.totalorder %s6029_s5, %s7772_s20 }
  0x65   : > { %p5694_p13 = scmp.lt.u32.totalorder %s5692_s18, %s5687_s2  ;;  %p5696_p7 = scmp.lt.u32.totalorder %s5687_s2, %s6029_s5 }
  0x66   : > { %p5690_p1 = pnand %p5688_p4, %p6000_p10 }
  0x67   : > { %p5695_p0 = por %p5694_p13, %p5693_p11 }
  0x68   : > { %p5691_p9 = pneg %p5690_p1 }
  0x69   : > { %p5697_p12 = por %p5696_p7, %p5695_p0 }
  0x6b   : > { %p5698_p2 = pnand %p5697_p12, %p5691_p9 }
  0x6d   : > { %5701 = shalt.err (!%p5698_p2)
}
  0x6e   : > { %s5702_s3 = scalar_lea.vmem %s6034_s22, 4096  ;;  %s5793_s1 = smov [#allocation8]  }
  0x6f   : > { %p5703_p3 = scmp.ne.s32.totalorder %s6034_s22, %s5702_s3  ;;  %s5707_s0 = sshll.u32 %s5793_s1, 4  ;;  %s5708_s0 = int_to_ptr.vmem [resolvable:$false] %s5707_s0 }
  0x70   : > { %s5709_s8 = scalar_lea.vmem %s5708_s0, 8192  ;;  %p5710_p4 = scmp.lt.s32.totalorder %s6034_s22, %s5708_s0 }
  0x71   : > { %p5705_p5 = pnand %p5703_p3, %p6000_p10  ;;  %p5711_p1 = scmp.lt.s32.totalorder %s5709_s8, %s5702_s3 }
  0x73   : > { %p5706_p6 = pneg %p5705_p5  ;;  %p5712_p11 = por %p5711_p1, %p5710_p4 }
  0x75   : > { %p5713_p13 = pnand %p5712_p11, %p5706_p6 }
  0x77   : > { %5716 = shalt.err (!%p5713_p13)
}
  0x78   : > { %s5794_s7 = smov 64   ;;  %s5795_s29 = smov 4  }
  0x79   : > { %5214 = dma.hbm_to_vmem [thread:$0]  (!%p5976_p8), %s6029_s5, 4096, %s6034_s22, %s5994_s27, %s5794_s7, %s5794_s7, %s5795_s29  }
  0x7a   : > { %p7776_p10 = scmp.ne.s32.totalorder %s7774_s21, 0 }
  0x7c   : > { %803 = sbr.rel (%p7776_p10) target bundleno = 4870 (0x1306), region = 116 }
  0x83   : > { %s805_s4 = sand.u32 1, %s5777_s26   ;;  %p7777_p9 = scmp.ne.s32.totalorder %s7767_s30, 0 }
  0x84   : > { %s5193_s2 = smul.u32 192, %s805_s4  ;;  %s806_s24 = scalar_lea.sflag [#allocation4], %s805_s4 }
  0x86   : > { %s6099_s9 = scalar_lea.vmem [#allocation3], %s5193_s2 }
  0x87   : > { %5760 = dma.done.wait (%p7777_p9), %s806_s24, 3072  }
  0x88   : > { %5762 = vsyncadd (%p7777_p9), %s806_s24, 4294964224  ;;  %s814_s18 = sand.u32 1, %s5952_s6   ;;  %s4582_s25 = sshll.u32 %s805_s4, 8 }
  0x89   : > { %s815_s22 = scalar_lea.sflag [#allocation7], %s814_s18  ;;  %s6106_s27 = scalar_lea.vmem [#allocation6], %s4582_s25 }
  0x8a   : > { %5764 = dma.done.wait (%p7777_p9), %s815_s22, 8192  }
  0x8b   : > { %5766 = vsyncadd (%p7777_p9), %s815_s22, 4294959104  ;;  %p928_p8 = scmp.lt.s32.totalorder %s5952_s6, 1  ;;  %s6158_s5 = scalar_lea.vmem [#allocation8], %s4582_s25 }
  0x8c   : > { %p4587_p0 = scmp.ne.s32.totalorder %s5952_s6, 0 }
  0x8d   : > { %s6114_s21 = scalar_select %p928_p8, %s5952_s6, 1 }
  0x8e   : > { %963 = sbr.rel (%p4587_p0) target bundleno = 500 (0x1f4), region = 132  ;;  %s7779_s1 = sld [smem:[#allocation43_spill]] (!%p4587_p0)  ;;  %v5796_v1 = vmov (!%p4587_p0), 0.0   ;;  %vm5797_vm0 = vmmov (!%p4587_p0), 0   ;;  %vm982_vm1 = vcmask (!%p4587_p0), 130048   ;;  %vm1101_vm2 = vcmask (!%p4587_p0), 523264  }
  0x8f   : > { %s5194_s24 = smul.u32 3, %s6114_s21  ;;  %s4791_s18 = sshll.u32 %s6114_s21, 6  ;;  %4943 = vmatprep.subr.bf16.mxu0 (!%p4587_p0), %v5796_v1  ;;  %4949 = vmatprep.subr.bf16.mxu1 (!%p4587_p0), %v5796_v1  ;;  %vm1112_vm3 = vcmask (!%p4587_p0), 1048064  }
  0x90   : > { %s6137_s28 = scalar_lea.vmem %s7704_s16, %s4791_s18  ;;  %s4586_s8 = sshll.u32 %s6114_s21, 2  ;;  %4945 = vmatprep.mubr.msk.bf16.mxu0 (!%p4587_p0), %vm5797_vm0, %v5796_v1  ;;  %4951 = vmatprep.mubr.msk.bf16.mxu1 (!%p4587_p0), %vm5797_vm0, %v5796_v1 }
  0x91   : > { %s6146_s0 = scalar_lea.vmem %s7703_s15, %s5194_s24  ;;  %s6152_s4 = scalar_lea.vmem %s7707_s19, %s4586_s8 }
  0x92   : > { %s7780_s7 = sld [smem:[#allocation38_spill]] (!%p4587_p0)  ;;  %s7781_s2 = sld [smem:[#allocation45_spill]] (!%p4587_p0) }
  0x93   : > { %s7782_s23 = sld [smem:[#allocation41_spill]] (!%p4587_p0)  ;;  %s7783_s8 = sld [smem:[#allocation39_spill]] (!%p4587_p0) }
  0x94   : > { %v5268_v0 = vld [vmem:[%s7779_s1] sm:$0xff] (!%p4587_p0)   ;;  %s7726_s1 = smov (!%p4587_p0), 64   ;;  %s7785_s18 = sld [smem:[#allocation44_spill]] (!%p4587_p0) }
  0x95   : > { %4944 = vmatpush3.bf16.msra.mxu0 %v5268_v0 }
  0x98   : > { %v964_v2 = vld [vmem:[%s7780_s7] sm:$0xff]  ;;  %v965_v3 = vld [vmem:[%s7780_s7 + $0x8] sm:$0xff] }
  0x99   : > { %v968_v4 = vpack.c.bf16 %v965_v3, %v964_v2  ;;  %v5269_v5 = vld [vmem:[%s7781_s2] sm:$0xff]   ;;  %v1094_v6 = vld [vmem:[%s7782_s23 + $0x8] sm:$0xff]  ;;  %s7784_s2 = sld [smem:[#allocation37_spill]]  ;;  %v1095_v36 = vld [vmem:[%s7782_s23 + $0x10] sm:$0xff] }
  0x9a   : > { %1104 = vrot.lane.b32.xlu0 %v1094_v6, %s7726_s1  ;;  %v1029_v7 = vld [vmem:[%s7783_s8] sm:$0xff]  ;;  %4950 = vmatpush3.bf16.msra.mxu1 %v5269_v5  ;;  %v1030_v8 = vld [vmem:[%s7783_s8 + $0x8] sm:$0xff]  ;;  %s7786_s1 = sld [smem:[#allocation46_spill]] }
  0x9b   : > { %4946 = vmatmul.mubr.msk.bf16.vlgmr.msra.gmra.mrb[0].mxu0 %vm982_vm1, %v968_v4  ;;  %v1033_v9 = vpack.c.bf16 %v1030_v8, %v1029_v7  ;;  %v4588_v14 = vld [vmem:[%s7785_s18] ss:$0 sm:$0xff] }
  0x9c   : > { %v1093_v21 = vld [vmem:[%s7782_s23] sm:$0xff] }
  0x9d   : > { %4952 = vmatmul.mubr.msk.bf16.vlgmr.msra.gmra.mrb[0].mxu1 %vm982_vm1, %v1033_v9 }
  0x9f   : > { %v1099_v10 = vld [vmem:[%s7784_s2] sm:$0xff]  ;;  %v1119_v11 = vld [vmem:[%s7784_s2 + $0x8] sm:$0xff]  ;;  %s7787_s2 = sld [smem:[#allocation40_spill]] }
  0xa0   : > { %v1100_v12 = vadd.f32 %v1099_v10, %v1094_v6  ;;  %v1120_v13 = vadd.f32 %v1119_v11, %v1094_v6  ;;  %v4591_v16 = vld [vmem:[%s7786_s1] ss:$0 sm:$0xff]  ;;  %s7788_s1 = smov 64  }
  0xa2   : > { %1102 = vst.msk [vmem:[#allocation2 + $0x8] sm:$0xff] %vm1101_vm2, %v1100_v12  ;;  %1121 = vst.msk [vmem:[#allocation2 + $0x20] sm:$0xff] %vm1101_vm2, %v1120_v13 }
  0xa5   : > { %v1096_v22 = vld [vmem:[%s7787_s2] sm:$0xff]  ;;  %v1116_v23 = vld [vmem:[%s7787_s2 + $0x8] sm:$0xff] }
  0xa6   : > { %v1097_v28 = vadd.f32 %v1096_v22, %v1093_v21  ;;  %v1117_v30 = vadd.f32 %v1116_v23, %v1093_v21 }
  0xa8   : > { %1098 = vst [vmem:[#allocation2] sm:$0xff] %v1097_v28  ;;  %1118 = vst [vmem:[#allocation2 + $0x18] sm:$0xff] %v1117_v30 }
 0x10c   : > { %v1105_v33 = vpop.permute.xlu0 %1104 }
 0x16e   : > { %v1020_v15 = vpop.f32.mrb[0].mxu0 }
 0x16f   : > { %v1021_v17 = vadd.f32 %v4588_v14, %v1020_v15  ;;  %v4947_v18 = vpop.f32.mrb[1].mxu0 }
 0x170   : > { %v1023_v19 = vpop.f32.mrb[2].mxu0  ;;  %v1084_v20 = vpop.f32.mrb[0].mxu1 }
 0x171   : > { %5270 = vtanh.f32 %v1021_v17  ;;  %v1024_v24 = vadd.f32 %v4588_v14, %v1023_v19  ;;  %v4948_v25 = vpop.f32.mrb[3].mxu0  ;;  %v1085_v26 = vadd.f32 %v4591_v16, %v1084_v20  ;;  %v4953_v27 = vpop.f32.mrb[1].mxu1 }
 0x172   : > { %v1087_v29 = vpop.f32.mrb[2].mxu1 }
 0x173   : > { %5272 = vtanh.f32 %v1024_v24  ;;  %v1088_v31 = vadd.f32 %v4591_v16, %v1087_v29  ;;  %v4954_v32 = vpop.f32.mrb[3].mxu1 }
 0x174   : > { %5274 = vtanh.f32 %v1085_v26 }
 0x175   : > { %5276 = vtanh.f32 %v1088_v31 }
 0x17b   : > { %v5271_v34 = vpop.eup %5270 }
 0x17c   : > { %v1107_v35 = vadd.f32 %v5271_v34, %v1105_v33 }
 0x17d   : > { %v5273_v37 = vpop.eup %5272 }
 0x17e   : > { %v5275_v38 = vpop.eup %5274  ;;  %1109 = vrot.lane.b32.xlu0 %v1107_v35, %s7788_s1  ;;  %v1122_v39 = vadd.f32 %v5273_v37, %v1105_v33 }
 0x17f   : > { %v5277_v40 = vpop.eup %5276  ;;  %v1114_v41 = vadd.f32 %v5275_v38, %v1095_v36 }
 0x180   : > { %1124 = vrot.lane.b32.xlu1 %v1122_v39, %s7788_s1  ;;  %v1128_v42 = vadd.f32 %v5277_v40, %v1095_v36 }
 0x181   : > { %1115 = vst [vmem:[#allocation2 + $0x10] sm:$0xff] %v1114_v41 }
 0x182   : > { %1129 = vst [vmem:[#allocation2 + $0x28] sm:$0xff] %v1128_v42 }
 0x1f0   : > { %v1110_v43 = vpop.permute.xlu0 %1109 }
 0x1f1   : > { %1113 = vst.msk [vmem:[#allocation2 + $0x8] sm:$0xff] %vm1112_vm3, %v1110_v43 }
 0x1f2   : > { %v1125_v44 = vpop.permute.xlu1 %1124 }
 0x1f3   : > { %1127 = vst.msk [vmem:[#allocation2 + $0x20] sm:$0xff] %vm1112_vm3, %v1125_v44 }
 0x1f4 PF: > { %v1130_v45 = vld [vmem:[#allocation2] sm:$0xff]  ;;  %v1132_v46 = vld [vmem:[#allocation2 + $0x10] sm:$0xff]  ;;  %v1133_v48 = vld [vmem:[#allocation2 + $0x18] sm:$0xff]  ;;  %v5799_v53 = vmov 0.0   ;;  %v5800_v34 = vmov 0   ;;  %vm5801_vm4 = vmmov 0   ;;  %s7789_s18 = scalar_lea.vmem %s7698_s10, %s6114_s21  ;;  %s7790_s25 = scalar_lea.vmem %s7699_s11, %s6114_s21 }
 0x1f5   : > { %1144 = vadd.xlane.f32.xlu0 %v1130_v45  ;;  %1148 = vadd.xlane.f32.xlu1 %v1132_v46  ;;  %v1135_v50 = vld [vmem:[#allocation2 + $0x28] sm:$0xff]  ;;  %v5278_v51 = vld [vmem:[%s6099_s9 + $0x4] ss:$12 sps:$4 sm:$0xff]   ;;  %v5280_v52 = vld [vmem:[%s6099_s9] ss:$12 sps:$4 sm:$0xff]   ;;  %vm1557_vm5 = vcmask 261120   ;;  %s7792_s20 = scalar_lea.vmem %s7705_s17, %s6114_s21  ;;  %s7799_s22 = scalar_lea.vmem %s7700_s12, %s6114_s21 }
 0x1f6   : > { %4955 = vmatprep.subr.bf16.mxu1 %v5799_v53  ;;  %v5281_v54 = vld [vmem:[%s6099_s9 + $0x8] ss:$12 sps:$4 sm:$0xff]   ;;  %1415 = vmatprep.subr.bf16.mxu0 %v5278_v51  ;;  %v5284_v16 = vld [vmem:[%s6099_s9 + $0x18] ss:$12 sps:$4 sm:$0xff]   ;;  %v5285_v17 = vld [vmem:[%s6099_s9 + $0x20] ss:$12 sps:$4 sm:$0xff]   ;;  %s7800_s30 = scalar_lea.vmem %s7701_s13, %s6114_s21 }
 0x1f7   : > { %v5282_v55 = vld [vmem:[%s6099_s9 + $0x1c] ss:$12 sps:$4 sm:$0xff]   ;;  %1416 = vmatpush1.bf16.msra.mxu0 %v5280_v52  ;;  %4956 = vmatpush3.bf16.msra.mxu1 %v5281_v54  ;;  %v5286_v18 = vld [vmem:[%s6099_s9 + $0x34] ss:$12 sps:$4 sm:$0xff]   ;;  %v5289_v20 = vld [vmem:[%s6099_s9 + $0x38] ss:$12 sps:$4 sm:$0xff]  }
 0x1f8   : > { %v1131_v47 = vld [vmem:[#allocation2 + $0x8] sm:$0xff]  ;;  %1417 = vmatprep.subr.bf16.mxu0 %v5282_v55  ;;  %4957 = vmatprep.subr.bf16.mxu1 %v5799_v53  ;;  %v5292_v22 = vld [vmem:[%s6099_s9 + $0x48] ss:$12 sps:$4 sm:$0xff]   ;;  %v5294_v24 = vld [vmem:[%s6099_s9 + $0x64] ss:$12 sps:$4 sm:$0xff]   ;;  %s7791_s24 = sld [smem:[#allocation42_spill]] }
 0x1f9   : > { %1146 = vadd.xlane.f32.xlu0 %v1131_v47  ;;  %1150 = vadd.xlane.f32.xlu1 %v1133_v48  ;;  %v5288_v19 = vld [vmem:[%s6099_s9 + $0x30] ss:$12 sps:$4 sm:$0xff]   ;;  %v5290_v21 = vld [vmem:[%s6099_s9 + $0x4c] ss:$12 sps:$4 sm:$0xff]   ;;  %v5297_v26 = vld [vmem:[%s6099_s9 + $0x68] ss:$12 sps:$4 sm:$0xff]  }
 0x1fa   : > { %v1134_v49 = vld [vmem:[#allocation2 + $0x20] sm:$0xff]  ;;  %v5296_v25 = vld [vmem:[%s6099_s9 + $0x60] ss:$12 sps:$4 sm:$0xff]   ;;  %v5298_v27 = vld [vmem:[%s6099_s9 + $0x7c] ss:$12 sps:$4 sm:$0xff]   ;;  %1447 = vmatprep.mubr.bf16.mxu0 %v5800_v34  ;;  %4971 = vmatprep.mubr.msk.bf16.mxu1 %vm5801_vm4, %v5799_v53  ;;  %vm1633_vm6 = vcmask 392192  }
 0x1fb   : > { %1418 = vmatpush1.bf16.msra.mxu0 %v5284_v16  ;;  %4958 = vmatpush3.bf16.msra.mxu1 %v5285_v17  ;;  %v5293_v23 = vld [vmem:[%s6099_s9 + $0x50] ss:$12 sps:$4 sm:$0xff]   ;;  %v5300_v28 = vld [vmem:[%s6099_s9 + $0x78] ss:$12 sps:$4 sm:$0xff]   ;;  %v5301_v29 = vld [vmem:[%s6099_s9 + $0x80] ss:$12 sps:$4 sm:$0xff]  }
 0x1fc   : > { %4959 = vmatprep.subr.bf16.mxu1 %v5799_v53  ;;  %1419 = vmatprep.subr.bf16.mxu0 %v5286_v18  ;;  %v5302_v30 = vld [vmem:[%s6099_s9 + $0x94] ss:$12 sps:$4 sm:$0xff]   ;;  %v5304_v31 = vld [vmem:[%s6099_s9 + $0x90] ss:$12 sps:$4 sm:$0xff]   ;;  %v5305_v32 = vld [vmem:[%s6099_s9 + $0x98] ss:$12 sps:$4 sm:$0xff]  }
 0x1fd   : > { %1152 = vadd.xlane.f32.xlu0 %v1134_v49  ;;  %1154 = vadd.xlane.f32.xlu1 %v1135_v50  ;;  %v5306_v33 = vld [vmem:[%s6099_s9 + $0xac] ss:$12 sps:$4 sm:$0xff]   ;;  %v5308_v35 = vld [vmem:[%s6099_s9 + $0xa8] ss:$12 sps:$4 sm:$0xff]   ;;  %v5309_v36 = vld [vmem:[%s6099_s9 + $0xb0] ss:$12 sps:$4 sm:$0xff]  }
 0x1fe   : > { %s5803_s14 = smov 64   ;;  %s7841_s7 = sld [smem:[#allocation50_spill]] }
 0x1ff   : > { %1420 = vmatpush1.bf16.msra.mxu0 %v5288_v19  ;;  %4960 = vmatpush3.bf16.msra.mxu1 %v5289_v20  ;;  %p4780_p7 = scmp.ne.s32.totalorder %s5952_s6, 1 }
 0x200   : > { %4961 = vmatprep.subr.bf16.mxu1 %v5799_v53  ;;  %1421 = vmatprep.subr.bf16.mxu0 %v5290_v21  ;;  %s7849_s3 = sld [smem:[#allocation51_spill]] (!%p4780_p7)  ;;  %s7850_s29 = sld [smem:[#allocation52_spill]] (!%p4780_p7) }
 0x203   : > { %1422 = vmatpush1.bf16.msra.mxu0 %v5292_v22  ;;  %4962 = vmatpush3.bf16.msra.mxu1 %v5293_v23 }
 0x204   : > { %4963 = vmatprep.subr.bf16.mxu1 %v5799_v53  ;;  %1423 = vmatprep.subr.bf16.mxu0 %v5294_v24  ;;  %s7842_s1 = scalar_lea.vmem %s7841_s7, %s6114_s21 }
 0x207   : > { %1424 = vmatpush1.bf16.msra.mxu0 %v5296_v25  ;;  %4964 = vmatpush3.bf16.msra.mxu1 %v5297_v26  ;;  %v1270_v25 = vld [vmem:[%s6146_s0] sm:$0x7]  ;;  %s5802_s0 = smov 96  }
 0x208   : > { %4965 = vmatprep.subr.bf16.mxu1 %v5799_v53  ;;  %1425 = vmatprep.subr.bf16.mxu0 %v5298_v27 }
 0x20b   : > { %1426 = vmatpush1.bf16.msra.mxu0 %v5300_v28  ;;  %4966 = vmatpush3.bf16.msra.mxu1 %v5301_v29 }
 0x20c   : > { %1427 = vmatprep.subr.bf16.mxu0 %v5302_v30  ;;  %4967 = vmatprep.subr.bf16.mxu1 %v5799_v53 }
 0x20f   : > { %1428 = vmatpush1.bf16.msra.mxu0 %v5304_v31  ;;  %4968 = vmatpush3.bf16.msra.mxu1 %v5305_v32 }
 0x210   : > { %1429 = vmatprep.subr.bf16.mxu0 %v5306_v33  ;;  %4969 = vmatprep.subr.bf16.mxu1 %v5799_v53 }
 0x213   : > { %1430 = vmatpush1.bf16.msra.mxu0 %v5308_v35  ;;  %4970 = vmatpush3.bf16.msra.mxu1 %v5309_v36 }
 0x214   : > { %5001 = vmatprep.subr.bf16.mxu1 %v5799_v53  ;;  %4983 = vmatprep.subr.bf16.mxu0 %v5799_v53 }
 0x282   : > { %v1145_v56 = vpop.xlane.xlu0 %1144  ;;  %v1149_v57 = vpop.xlane.xlu1 %1148 }
 0x283   : > { %v1157_v58 = vmul.f32 0.0078125, %v1145_v56  ;;  %v1159_v59 = vmul.f32 0.0078125, %v1149_v57 }
 0x285   : > { %v6215_v60 = vsub.f32 %v1132_v46, %v1159_v59  ;;  %v6217_v61 = vsub.f32 %v1130_v45, %v1157_v58  ;;  %v4594_v58 = vld [vmem:[%s7789_s18] ss:$0 sm:$0xff] }
 0x286   : > { %v1147_v62 = vpop.xlane.xlu0 %1146  ;;  %v1151_v63 = vpop.xlane.xlu1 %1150 }
 0x287   : > { %v1158_v0 = vmul.f32 0.0078125, %v1147_v62  ;;  %v1169_v1 = vmul.f32 %v6217_v61, %v6217_v61  ;;  %v1160_v2 = vmul.f32 0.0078125, %v1151_v63  ;;  %v1171_v5 = vmul.f32 %v6215_v60, %v6215_v60 }
 0x289   : > { %v6221_v3 = vsub.f32 %v1131_v47, %v1158_v0  ;;  %1175 = vadd.xlane.f32.xlu0 %v1169_v1  ;;  %v6223_v4 = vsub.f32 %v1133_v48, %v1160_v2  ;;  %v4595_v1 = vld [vmem:[%s7790_s25] ss:$0 sm:$0xff] }
 0x28a   : > { %v1153_v6 = vpop.xlane.xlu0 %1152  ;;  %v1155_v7 = vpop.xlane.xlu1 %1154 }
 0x28b   : > { %v1161_v8 = vmul.f32 0.0078125, %v1153_v6  ;;  %v1170_v9 = vmul.f32 %v6221_v3, %v6221_v3  ;;  %v1162_v10 = vmul.f32 0.0078125, %v1155_v7  ;;  %v1172_v13 = vmul.f32 %v6223_v4, %v6223_v4 }
 0x28d   : > { %v6229_v11 = vsub.f32 %v1134_v49, %v1161_v8  ;;  %1179 = vadd.xlane.f32.xlu0 %v1171_v5  ;;  %1177 = vadd.xlane.f32.xlu1 %v1170_v9  ;;  %v6231_v12 = vsub.f32 %v1135_v50, %v1162_v10 }
 0x28f   : > { %v1173_v14 = vmul.f32 %v6229_v11, %v6229_v11  ;;  %v1174_v15 = vmul.f32 %v6231_v12, %v6231_v12 }
 0x291   : > { %1181 = vadd.xlane.f32.xlu1 %v1172_v13  ;;  %1183 = vadd.xlane.f32.xlu0 %v1173_v14 }
 0x295   : > { %1185 = vadd.xlane.f32.xlu1 %v1174_v15 }
 0x316   : > { %v1176_v37 = vpop.xlane.xlu0 %1175 }
 0x317   : > { %v1187_v38 = vmul.f32 0.0078125, %v1176_v37 }
 0x319   : > { %v1193_v39 = vadd.f32 1e-05, %v1187_v38 }
 0x31a   : > { %v1178_v40 = vpop.xlane.xlu1 %1177  ;;  %v1180_v41 = vpop.xlane.xlu0 %1179 }
 0x31b   : > { %5398 = vrsqrt.f32 %v1193_v39  ;;  %v1188_v42 = vmul.f32 0.0078125, %v1178_v40  ;;  %v1189_v43 = vmul.f32 0.0078125, %v1180_v41 }
 0x31d   : > { %v1194_v44 = vadd.f32 1e-05, %v1188_v42  ;;  %v1195_v45 = vadd.f32 1e-05, %v1189_v43 }
 0x31e   : > { %v1182_v46 = vpop.xlane.xlu1 %1181  ;;  %v1184_v47 = vpop.xlane.xlu0 %1183 }
 0x31f   : > { %5400 = vrsqrt.f32 %v1194_v44  ;;  %v1190_v48 = vmul.f32 0.0078125, %v1182_v46  ;;  %v1191_v50 = vmul.f32 0.0078125, %v1184_v47 }
 0x320   : > { %5402 = vrsqrt.f32 %v1195_v45 }
 0x321   : > { %v1196_v49 = vadd.f32 1e-05, %v1190_v48  ;;  %v1197_v55 = vadd.f32 1e-05, %v1191_v50 }
 0x322   : > { %v1186_v51 = vpop.xlane.xlu1 %1185 }
 0x323   : > { %5404 = vrsqrt.f32 %v1196_v49  ;;  %v1192_v52 = vmul.f32 0.0078125, %v1186_v51 }
 0x325   : > { %v5399_v54 = vpop.eup %5398  ;;  %v1198_v56 = vadd.f32 1e-05, %v1192_v52 }
 0x326   : > { %v1205_v57 = vmul.f32 %v5399_v54, %v6217_v61 }
 0x327   : > { %5406 = vrsqrt.f32 %v1198_v56 }
 0x328   : > { %5408 = vrsqrt.f32 %v1197_v55  ;;  %v1217_v63 = vmul.f32 %v4594_v58, %v1205_v57 }
 0x329   : > { %v5401_v59 = vpop.eup %5400 }
 0x32a   : > { %v1206_v62 = vmul.f32 %v5401_v59, %v6221_v3  ;;  %v5403_v0 = vpop.eup %5402  ;;  %v1229_v61 = vadd.f32 %v4595_v1, %v1217_v63 }
 0x32b   : > { %v1207_v7 = vmul.f32 %v5403_v0, %v6215_v60 }
 0x32c   : > { %v1218_v2 = vmul.f32 %v4594_v58, %v1206_v62 }
 0x32d   : > { %v5405_v5 = vpop.eup %5404  ;;  %v1219_v3 = vmul.f32 %v4594_v58, %v1207_v7 }
 0x32e   : > { %v1230_v6 = vadd.f32 %v4595_v1, %v1218_v2  ;;  %v1208_v8 = vmul.f32 %v5405_v5, %v6223_v4 }
 0x32f   : > { %v1231_v17 = vadd.f32 %v4595_v1, %v1219_v3 }
 0x330   : > { %v1267_v9 = vpack.c.bf16 %v1230_v6, %v1229_v61  ;;  %v1220_v10 = vmul.f32 %v4594_v58, %v1208_v8 }
 0x331   : > { %v5407_v13 = vpop.eup %5406 }
 0x332   : > { %1448 = vmatmul.mubr.bf16.vlgmr.msra.gmra.mrb[0].mxu0 %v1267_v9  ;;  %4972 = vmatmul.mubr.bf16.vlgmr.msra.gmra.mrb[0].mxu1 %v1267_v9  ;;  %v5409_v14 = vpop.eup %5408  ;;  %v1232_v15 = vadd.f32 %v4595_v1, %v1220_v10  ;;  %v1210_v16 = vmul.f32 %v5407_v13, %v6231_v12 }
 0x333   : > { %1457 = vmatprep.mubr.bf16.mxu0 %v5800_v34  ;;  %4975 = vmatprep.mubr.msk.bf16.mxu1 %vm5801_vm4, %v5799_v53  ;;  %v1209_v60 = vmul.f32 %v5409_v14, %v6229_v11  ;;  %v1272_v11 = vlaneseq }
 0x334   : > { %v1268_v18 = vpack.c.bf16 %v1232_v15, %v1231_v17  ;;  %v1222_v4 = vmul.f32 %v4594_v58, %v1210_v16 }
 0x335   : > { %v1221_v19 = vmul.f32 %v4594_v58, %v1209_v60  ;;  %v6296_v12 = vshrl.u32 %v1272_v11, 7 }
 0x336   : > { %v1234_v20 = vadd.f32 %v4595_v1, %v1222_v4 }
 0x337   : > { %v1233_v21 = vadd.f32 %v4595_v1, %v1221_v19  ;;  %v1274_v23 = vsub.s32 0, %v6296_v12  ;;  %v1282_v24 = vsub.s32 2, %v6296_v12  ;;  %v1278_v26 = vsub.s32 1, %v6296_v12 }
 0x339   : > { %v1269_v22 = vpack.c.bf16 %v1234_v20, %v1233_v21  ;;  %v1275_v27 = vrot.slane %v1270_v25, %v1274_v23  ;;  %v1283_v28 = vrot.slane %v1270_v25, %v1282_v24  ;;  %v1279_v31 = vrot.slane %v1270_v25, %v1278_v26 }
 0x33a   : > { %1458 = vmatmul.mubr.bf16.gmra.mrb[4].mxu0 %v1268_v18  ;;  %4976 = vmatmul.mubr.bf16.gmra.mrb[4].mxu1 %v1268_v18 }
 0x33b   : > { %1467 = vmatprep.mubr.bf16.mxu0 %v5800_v34  ;;  %4979 = vmatprep.mubr.msk.bf16.mxu1 %vm5801_vm4, %v5799_v53 }
 0x342   : > { %1468 = vmatmul.mubr.bf16.gmra.mrb[8].mxu0 %v1269_v22  ;;  %4980 = vmatmul.mubr.bf16.gmra.mrb[8].mxu1 %v1269_v22 }
 0x343   : > { %4989 = vmatprep.mubr.msk.bf16.mxu0 %vm5801_vm4, %v5799_v53  ;;  %5007 = vmatprep.mubr.msk.bf16.mxu1 %vm5801_vm4, %v5799_v53 }
 0x405   : > { %v1449_v29 = vpop.f32.mrb[0].mxu0  ;;  %v1512_v30 = vpop.f32.mrb[0].mxu1 }
 0x406   : > { %v1451_v32 = vpop.f32.mrb[1].mxu0  ;;  %v4973_v33 = vpop.f32.mrb[1].mxu1  ;;  %v1450_v37 = vadd.f32 %v1449_v29, %v1275_v27  ;;  %v1513_v38 = vadd.f32 %v1512_v30, %v1283_v28 }
 0x407   : > { %v1453_v35 = vpop.f32.mrb[2].mxu0  ;;  %v1515_v36 = vpop.f32.mrb[2].mxu1  ;;  %v1452_v43 = vadd.f32 %v1451_v32, %v1279_v31 }
 0x408   : > { %v1454_v39 = vadd.f32 %v1453_v35, %v1275_v27  ;;  %v1516_v40 = vadd.f32 %v1515_v36, %v1283_v28  ;;  %v1455_v41 = vpop.f32.mrb[3].mxu0  ;;  %v4974_v42 = vpop.f32.mrb[3].mxu1  ;;  %v6383_v36 = vld [vmem:[%s7791_s24] sm:$0xff] }
 0x409   : > { %v1456_v44 = vadd.f32 %v1455_v41, %v1279_v31 }
 0x40a   : > { %v6308_v45 = vpack.c.bf16 %v1454_v39, %v1450_v37  ;;  %v6310_v46 = vpack.c.bf16 %v1516_v40, %v1513_v38  ;;  %v6388_v38 = vld [vmem:[%s7791_s24 + $0x8] sm:$0xff] }
 0x40b   : > { %v6312_v47 = vpack.c.bf16 %v1456_v44, %v1452_v43 }
 0x40c   : > { %5002 = vmatpush3.bf16.msra.mxu1 %v6310_v46 }
 0x40d   : > { %1787 = vrot.lane.b32.xlu0 %v6312_v47, %s5802_s0  ;;  %v1459_v48 = vpop.f32.mrb[4].mxu0  ;;  %v1520_v49 = vpop.f32.mrb[4].mxu1  ;;  %v1568_v50 = vsel %vm1557_vm5, %v6312_v47, 0  ;;  %5003 = vmatprep.subr.bf16.mxu1 %v5799_v53 }
 0x40e   : > { %v1461_v51 = vpop.f32.mrb[5].mxu0  ;;  %v4977_v52 = vpop.f32.mrb[5].mxu1  ;;  %4984 = vmatpush3.bf16.xpose.msra.mxu0 %v1568_v50  ;;  %v1460_v56 = vadd.f32 %v1459_v48, %v1275_v27  ;;  %v1521_v57 = vadd.f32 %v1520_v49, %v1283_v28  ;;  %v6403_v49 = vld [vmem:[%s7791_s24 + $0x10] sm:$0xff] }
 0x40f   : > { %v1463_v54 = vpop.f32.mrb[6].mxu0  ;;  %v1523_v55 = vpop.f32.mrb[6].mxu1  ;;  %4985 = vmatprep.subr.bf16.mxu0 %v5799_v53  ;;  %v1462_v0 = vadd.f32 %v1461_v51, %v1279_v31  ;;  %v6408_v51 = vld [vmem:[%s7791_s24 + $0x18] sm:$0xff] }
 0x410   : > { %v1464_v58 = vadd.f32 %v1463_v54, %v1275_v27  ;;  %v1524_v59 = vadd.f32 %v1523_v55, %v1283_v28  ;;  %v1465_v62 = vpop.f32.mrb[7].mxu0  ;;  %v4978_v63 = vpop.f32.mrb[7].mxu1 }
 0x411   : > { %v1466_v1 = vadd.f32 %v1465_v62, %v1279_v31 }
 0x412   : > { %v6321_v2 = vpack.c.bf16 %v1464_v58, %v1460_v56  ;;  %v6323_v5 = vpack.c.bf16 %v1524_v59, %v1521_v57  ;;  %v6418_v59 = vld [vmem:[%s7791_s24 + $0x20] sm:$0xff] }
 0x413   : > { %v6325_v61 = vpack.c.bf16 %v1466_v1, %v1462_v0  ;;  %v6425_v0 = vld [vmem:[%s7791_s24 + $0x28] sm:$0xff] }
 0x414   : > { %5004 = vmatpush3.bf16.msra.mxu1 %v6323_v5  ;;  %1780 = vrot.lane.b32.xlu0 %v6321_v2, %s5802_s0 }
 0x415   : > { %1789 = vrot.lane.b32.xlu1 %v6325_v61, %s5802_s0  ;;  %v1469_v6 = vpop.f32.mrb[8].mxu0  ;;  %v1528_v7 = vpop.f32.mrb[8].mxu1  ;;  %v1571_v8 = vsel %vm1557_vm5, %v6325_v61, 0  ;;  %5005 = vmatprep.subr.bf16.mxu1 %v5799_v53 }
 0x416   : > { %v1471_v9 = vpop.f32.mrb[9].mxu0  ;;  %v4981_v10 = vpop.f32.mrb[9].mxu1  ;;  %4986 = vmatpush3.bf16.xpose.msra.mxu0 %v1571_v8  ;;  %v1470_v14 = vadd.f32 %v1469_v6, %v1275_v27  ;;  %v1529_v15 = vadd.f32 %v1528_v7, %v1283_v28 }
 0x417   : > { %v1473_v13 = vpop.f32.mrb[10].mxu0  ;;  %v1531_v3 = vpop.f32.mrb[10].mxu1  ;;  %4987 = vmatprep.subr.bf16.mxu0 %v5799_v53  ;;  %v1472_v4 = vadd.f32 %v1471_v9, %v1279_v31 }
 0x418   : > { %v1474_v16 = vadd.f32 %v1473_v13, %v1275_v27  ;;  %v1532_v17 = vadd.f32 %v1531_v3, %v1283_v28  ;;  %v1475_v60 = vpop.f32.mrb[11].mxu0  ;;  %v4982_v18 = vpop.f32.mrb[11].mxu1 }
 0x419   : > { %v1476_v19 = vadd.f32 %v1475_v60, %v1279_v31 }
 0x41a   : > { %v6336_v20 = vpack.c.bf16 %v1474_v16, %v1470_v14  ;;  %v6338_v21 = vpack.c.bf16 %v1532_v17, %v1529_v15 }
 0x41b   : > { %v6340_v22 = vpack.c.bf16 %v1476_v19, %v1472_v4 }
 0x41c   : > { %5006 = vmatpush3.bf16.msra.mxu1 %v6338_v21 }
 0x41d   : > { %1791 = vrot.lane.b32.xlu1 %v6340_v22, %s5802_s0  ;;  %v1574_v11 = vsel %vm1557_vm5, %v6340_v22, 0  ;;  %5037 = vmatprep.subr.bf16.mxu1 %v5799_v53 }
 0x41e   : > { %4988 = vmatpush3.bf16.xpose.msra.mxu0 %v1574_v11 }
 0x41f   : > { %5019 = vmatprep.subr.bf16.mxu0 %v5799_v53 }
 0x421   : > { %1778 = vrot.lane.b32.xlu1 %v6308_v45, %s5802_s0 }
 0x425   : > { %4990 = vmatmul.mubr.msk.bf16.vlgmr.msra.gmra.mrb[12].mxu0 %vm1557_vm5, %v6308_v45  ;;  %1782 = vrot.lane.b32.xlu1 %v6336_v20, %s5802_s0 }
 0x426   : > { %4993 = vmatprep.mubr.msk.bf16.mxu0 %vm5801_vm4, %v5799_v53 }
 0x42d   : > { %4994 = vmatmul.mubr.msk.bf16.gmra.mrb[16].mxu0 %vm1557_vm5, %v6321_v2 }
 0x42e   : > { %4997 = vmatprep.mubr.msk.bf16.mxu0 %vm5801_vm4, %v5799_v53 }
 0x435   : > { %4998 = vmatmul.mubr.msk.bf16.gmra.mrb[20].mxu0 %vm1557_vm5, %v6336_v20 }
 0x436   : > { %5025 = vmatprep.mubr.msk.bf16.mxu0 %vm5801_vm4, %v5799_v53 }
 0x47f   : > { %v1788_v25 = vpop.permute.xlu0 %1787 }
 0x480   : > { %v1803_v27 = vsel %vm1557_vm5, %v1788_v25, 0 }
 0x481   : > { %5020 = vmatpush3.bf16.xpose.msra.mxu0 %v1803_v27 }
 0x482   : > { %5021 = vmatprep.subr.bf16.mxu0 %v5799_v53 }
 0x486   : > { %v1781_v33 = vpop.permute.xlu0 %1780 }
 0x487   : > { %v1790_v28 = vpop.permute.xlu1 %1789 }
 0x488   : > { %v1806_v29 = vsel %vm1557_vm5, %v1790_v28, 0 }
 0x489   : > { %5022 = vmatpush3.bf16.xpose.msra.mxu0 %v1806_v29 }
 0x48a   : > { %5023 = vmatprep.subr.bf16.mxu0 %v5799_v53 }
 0x48f   : > { %v1792_v30 = vpop.permute.xlu1 %1791 }
 0x490   : > { %v1809_v31 = vsel %vm1557_vm5, %v1792_v30, 0 }
 0x491   : > { %5024 = vmatpush3.bf16.xpose.msra.mxu0 %v1809_v31 }
 0x492   : > { %5055 = vmatprep.subr.bf16.mxu0 %v5799_v53 }
 0x493   : > { %v1779_v32 = vpop.permute.xlu1 %1778 }
 0x497   : > { %v1783_v35 = vpop.permute.xlu1 %1782 }
 0x498   : > { %5026 = vmatmul.mubr.msk.bf16.vlgmr.msra.gmra.mrb[24].mxu0 %vm1557_vm5, %v1779_v32 }
 0x499   : > { %5029 = vmatprep.mubr.msk.bf16.mxu0 %vm5801_vm4, %v5799_v53 }
 0x4a0   : > { %5030 = vmatmul.mubr.msk.bf16.gmra.mrb[28].mxu0 %vm1557_vm5, %v1781_v33 }
 0x4a1   : > { %5033 = vmatprep.mubr.msk.bf16.mxu0 %vm5801_vm4, %v5799_v53 }
 0x4a8   : > { %5034 = vmatmul.mubr.msk.bf16.gmra.mrb[32].mxu0 %vm1557_vm5, %v1783_v35 }
 0x4a9   : > { %5059 = vmatprep.mubr.msk.bf16.mxu0 %vm5801_vm4, %v5799_v53 }
 0x4f8   : > { %v1610_v37 = vpop.f32.mrb[12].mxu0 }
 0x4f9   : > { %v6391_v39 = vadd.f32 %v1610_v37, %v6383_v36  ;;  %v4991_v40 = vpop.f32.mrb[13].mxu0 }
 0x4fa   : > { %v1613_v41 = vpop.f32.mrb[14].mxu0 }
 0x4fb   : > { %v6394_v42 = vadd.f32 %v1613_v41, %v6388_v38  ;;  %v4992_v43 = vpop.f32.mrb[15].mxu0  ;;  %v1634_v44 = vsel %vm1633_vm6, %v6391_v39, -inf }
 0x4fc   : > { %1635 = vmax.xlane.f32.xlu0 %v1634_v44 }
 0x4fd   : > { %v1637_v48 = vsel %vm1633_vm6, %v6394_v42, -inf }
 0x4fe   : > { %1638 = vmax.xlane.f32.xlu1 %v1637_v48 }
 0x500   : > { %v1618_v50 = vpop.f32.mrb[16].mxu0 }
 0x501   : > { %v1619_v52 = vadd.f32 %v1618_v50, %v6403_v49  ;;  %v4995_v54 = vpop.f32.mrb[17].mxu0 }
 0x502   : > { %v1621_v55 = vpop.f32.mrb[18].mxu0 }
 0x503   : > { %v6412_v56 = vadd.f32 %v1621_v55, %v6408_v51  ;;  %v4996_v57 = vpop.f32.mrb[19].mxu0  ;;  %v1640_v58 = vsel %vm1633_vm6, %v1619_v52, -inf }
 0x504   : > { %1641 = vmax.xlane.f32.xlu0 %v1640_v58 }
 0x505   : > { %v1643_v62 = vsel %vm1633_vm6, %v6412_v56, -inf }
 0x508   : > { %1644 = vmax.xlane.f32.xlu0 %v1643_v62  ;;  %v1626_v63 = vpop.f32.mrb[20].mxu0 }
 0x509   : > { %v6428_v1 = vadd.f32 %v1626_v63, %v6418_v59  ;;  %v4999_v6 = vpop.f32.mrb[21].mxu0 }
 0x50a   : > { %v1629_v7 = vpop.f32.mrb[22].mxu0 }
 0x50b   : > { %v6431_v8 = vadd.f32 %v1629_v7, %v6425_v0  ;;  %v5000_v9 = vpop.f32.mrb[23].mxu0  ;;  %v1646_v10 = vsel %vm1633_vm6, %v6428_v1, -inf }
 0x50c   : > { %1647 = vmax.xlane.f32.xlu0 %v1646_v10 }
 0x50d   : > { %v1649_v13 = vsel %vm1633_vm6, %v6431_v8, -inf }
 0x50e   : > { %1650 = vmax.xlane.f32.xlu1 %v1649_v13 }
 0x56b   : > { %v1845_v3 = vpop.f32.mrb[24].mxu0 }
 0x56c   : > { %v6438_v14 = vadd.f32 %v1845_v3, %v6383_v36  ;;  %v5027_v15 = vpop.f32.mrb[25].mxu0 }
 0x56d   : > { %v1848_v16 = vpop.f32.mrb[26].mxu0 }
 0x56e   : > { %v6441_v17 = vadd.f32 %v1848_v16, %v6388_v38  ;;  %v5028_v60 = vpop.f32.mrb[27].mxu0  ;;  %v1868_v18 = vsel %vm1633_vm6, %v6438_v14, -inf }
 0x56f   : > { %1869 = vmax.xlane.f32.xlu0 %v1868_v18 }
 0x570   : > { %v1871_v4 = vsel %vm1633_vm6, %v6441_v17, -inf }
 0x571   : > { %1872 = vmax.xlane.f32.xlu1 %v1871_v4 }
 0x573   : > { %v1853_v19 = vpop.f32.mrb[28].mxu0 }
 0x574   : > { %v6448_v11 = vadd.f32 %v1853_v19, %v6403_v49  ;;  %v5031_v25 = vpop.f32.mrb[29].mxu0 }
 0x575   : > { %v1856_v27 = vpop.f32.mrb[30].mxu0 }
 0x576   : > { %v6451_v28 = vadd.f32 %v1856_v27, %v6408_v51  ;;  %v5032_v29 = vpop.f32.mrb[31].mxu0  ;;  %v1874_v30 = vsel %vm1633_vm6, %v6448_v11, -inf }
 0x577   : > { %1875 = vmax.xlane.f32.xlu0 %v1874_v30 }
 0x578   : > { %v1877_v31 = vsel %vm1633_vm6, %v6451_v28, -inf }
 0x579   : > { %1878 = vmax.xlane.f32.xlu1 %v1877_v31 }
 0x57b   : > { %v1861_v32 = vpop.f32.mrb[32].mxu0 }
 0x57c   : > { %v6458_v33 = vadd.f32 %v1861_v32, %v6418_v59  ;;  %v5035_v35 = vpop.f32.mrb[33].mxu0 }
 0x57d   : > { %v1864_v37 = vpop.f32.mrb[34].mxu0 }
 0x57e   : > { %v6461_v40 = vadd.f32 %v1864_v37, %v6425_v0  ;;  %v5036_v41 = vpop.f32.mrb[35].mxu0  ;;  %v1880_v43 = vsel %vm1633_vm6, %v6458_v33, -inf }
 0x57f   : > { %1881 = vmax.xlane.f32.xlu0 %v1880_v43 }
 0x580   : > { %v1883_v44 = vsel %vm1633_vm6, %v6461_v40, -inf }
 0x581   : > { %1884 = vmax.xlane.f32.xlu1 %v1883_v44 }
 0x589   : > { %v1636_v48 = vpop.xlane.xlu0 %1635 }
 0x58a   : > { %v1652_v50 = vsub.f32 %v6391_v39, %v1636_v48 }
 0x58b   : > { %v1639_v54 = vpop.xlane.xlu1 %1638 }
 0x58c   : > { %v1658_v55 = vmul.f32 1.442695, %v1652_v50  ;;  %v1653_v57 = vsub.f32 %v6394_v42, %v1639_v54 }
 0x58e   : > { %5410 = vpow2.f32 %v1658_v55  ;;  %v1660_v58 = vmul.f32 1.442695, %v1653_v57 }
 0x590   : > { %5412 = vpow2.f32 %v1660_v58 }
 0x591   : > { %v1642_v62 = vpop.xlane.xlu0 %1641 }
 0x592   : > { %v1654_v63 = vsub.f32 %v1619_v52, %v1642_v62 }
 0x594   : > { %v1662_v6 = vmul.f32 1.442695, %v1654_v63 }
 0x595   : > { %v1645_v7 = vpop.xlane.xlu0 %1644 }
 0x596   : > { %5414 = vpow2.f32 %v1662_v6  ;;  %v1655_v9 = vsub.f32 %v6412_v56, %v1645_v7 }
 0x598   : > { %v6470_v10 = vpop.eup %5410  ;;  %v1664_v13 = vmul.f32 1.442695, %v1655_v9 }
 0x599   : > { %v1648_v3 = vpop.xlane.xlu0 %1647  ;;  %v1670_v39 = vsel %vm1633_vm6, %v6470_v10, 0.0 }
 0x59a   : > { %v6474_v15 = vpop.eup %5412  ;;  %5416 = vpow2.f32 %v1664_v13  ;;  %v1656_v42 = vsub.f32 %v6428_v1, %v1648_v3  ;;  %1671 = vadd.xlane.f32.xlu0 %v1670_v39 }
 0x59b   : > { %v1651_v16 = vpop.xlane.xlu1 %1650  ;;  %v1673_v52 = vsel %vm1633_vm6, %v6474_v15, 0.0 }
 0x59c   : > { %v1666_v60 = vmul.f32 1.442695, %v1656_v42  ;;  %v1657_v56 = vsub.f32 %v6431_v8, %v1651_v16  ;;  %1674 = vadd.xlane.f32.xlu1 %v1673_v52 }
 0x59e   : > { %5418 = vpow2.f32 %v1666_v60  ;;  %v1668_v18 = vmul.f32 1.442695, %v1657_v56 }
 0x5a0   : > { %v6480_v4 = vpop.eup %5414  ;;  %5420 = vpow2.f32 %v1668_v18 }
 0x5a1   : > { %v1676_v19 = vsel %vm1633_vm6, %v6480_v4, 0.0 }
 0x5a2   : > { %1677 = vadd.xlane.f32.xlu0 %v1676_v19 }
 0x5a4   : > { %v6484_v25 = vpop.eup %5416 }
 0x5a5   : > { %v1679_v1 = vsel %vm1633_vm6, %v6484_v25, 0.0 }
 0x5a6   : > { %1680 = vadd.xlane.f32.xlu1 %v1679_v1 }
 0x5a8   : > { %v6488_v27 = vpop.eup %5418 }
 0x5a9   : > { %v1682_v8 = vsel %vm1633_vm6, %v6488_v27, 0.0 }
 0x5aa   : > { %v6492_v29 = vpop.eup %5420  ;;  %1683 = vadd.xlane.f32.xlu0 %v1682_v8 }
 0x5ab   : > { %v1685_v30 = vsel %vm1633_vm6, %v6492_v29, 0.0 }
 0x5ac   : > { %1686 = vadd.xlane.f32.xlu1 %v1685_v30 }
 0x5fc   : > { %v1870_v31 = vpop.xlane.xlu0 %1869 }
 0x5fd   : > { %v1886_v32 = vsub.f32 %v6438_v14, %v1870_v31 }
 0x5fe   : > { %v1873_v35 = vpop.xlane.xlu1 %1872 }
 0x5ff   : > { %v1892_v37 = vmul.f32 1.442695, %v1886_v32  ;;  %v1887_v41 = vsub.f32 %v6441_v17, %v1873_v35 }
 0x601   : > { %5422 = vpow2.f32 %v1892_v37  ;;  %v1894_v43 = vmul.f32 1.442695, %v1887_v41 }
 0x603   : > { %5424 = vpow2.f32 %v1894_v43 }
 0x604   : > { %v1876_v44 = vpop.xlane.xlu0 %1875 }
 0x605   : > { %v1888_v48 = vsub.f32 %v6448_v11, %v1876_v44 }
 0x606   : > { %v1879_v50 = vpop.xlane.xlu1 %1878 }
 0x607   : > { %v1896_v54 = vmul.f32 1.442695, %v1888_v48  ;;  %v1889_v55 = vsub.f32 %v6451_v28, %v1879_v50 }
 0x609   : > { %5426 = vpow2.f32 %v1896_v54  ;;  %v1898_v57 = vmul.f32 1.442695, %v1889_v55 }
 0x60b   : > { %v6500_v58 = vpop.eup %5422  ;;  %5428 = vpow2.f32 %v1898_v57 }
 0x60c   : > { %v1882_v14 = vpop.xlane.xlu0 %1881  ;;  %v1904_v62 = vsel %vm1633_vm6, %v6500_v58, 0.0 }
 0x60d   : > { %v6504_v17 = vpop.eup %5424  ;;  %v1890_v63 = vsub.f32 %v6458_v33, %v1882_v14  ;;  %1905 = vadd.xlane.f32.xlu0 %v1904_v62 }
 0x60e   : > { %v1907_v11 = vsel %vm1633_vm6, %v6504_v17, 0.0  ;;  %v1885_v39 = vpop.xlane.xlu1 %1884 }
 0x60f   : > { %v1900_v6 = vmul.f32 1.442695, %v1890_v63  ;;  %1908 = vadd.xlane.f32.xlu1 %v1907_v11  ;;  %v1891_v8 = vsub.f32 %v6461_v40, %v1885_v39 }
 0x611   : > { %5430 = vpow2.f32 %v1900_v6  ;;  %v1902_v35 = vmul.f32 1.442695, %v1891_v8 }
 0x613   : > { %v6509_v28 = vpop.eup %5426 }
 0x614   : > { %v1910_v7 = vsel %vm1633_vm6, %v6509_v28, 0.0 }
 0x615   : > { %v6513_v9 = vpop.eup %5428  ;;  %1911 = vadd.xlane.f32.xlu0 %v1910_v7 }
 0x616   : > { %v1913_v13 = vsel %vm1633_vm6, %v6513_v9, 0.0 }
 0x617   : > { %1914 = vadd.xlane.f32.xlu1 %v1913_v13 }
 0x61b   : > { %v6517_v33 = vpop.eup %5430 }
 0x61c   : > { %v1916_v3 = vsel %vm1633_vm6, %v6517_v33, 0.0 }
 0x61d   : > { %1917 = vadd.xlane.f32.xlu0 %v1916_v3 }
 0x627   : > { %v1672_v42 = vpop.xlane.xlu0 %1671 }
 0x628   : > { %5432 = vrcp.f32 %v1672_v42  ;;  %1942 = vrot.lane.b32.xlu1 %v6323_v5, %s5802_s0 }
 0x629   : > { %v1675_v16 = vpop.xlane.xlu1 %1674 }
 0x62a   : > { %5434 = vrcp.f32 %v1675_v16 }
 0x62f   : > { %v1678_v52 = vpop.xlane.xlu0 %1677 }
 0x630   : > { %5436 = vrcp.f32 %v1678_v52  ;;  %v5310_v52 = vld [vmem:[%s6137_s28] sm:$0xff]  }
 0x632   : > { %v5433_v60 = vpop.eup %5432 }
 0x633   : > { %v1681_v56 = vpop.xlane.xlu1 %1680  ;;  %1940 = vrot.lane.b32.xlu0 %v6310_v46, %s5802_s0  ;;  %v1689_v19 = vmul.f32 %v5433_v60, %v6470_v10 }
 0x634   : > { %v5435_v18 = vpop.eup %5434  ;;  %5438 = vrcp.f32 %v1681_v56 }
 0x635   : > { %v1691_v1 = vmul.f32 %v5435_v18, %v6474_v15 }
 0x637   : > { %v1703_v30 = vpack.c.bf16 %v1691_v1, %v1689_v19  ;;  %2182 = vrot.lane.b32.xlu0 %v6325_v61, %s5803_s14  ;;  %v1684_v31 = vpop.xlane.xlu0 %1683  ;;  %v5311_v19 = vld [vmem:[%s6137_s28 + $0x8] sm:$0xff]  }
 0x638   : > { %5440 = vrcp.f32 %v1684_v31 }
 0x639   : > { %v1687_v32 = vpop.xlane.xlu1 %1686  ;;  %5008 = vmatmul.mubr.msk.bf16.vlgmr.msra.gmra.mrb[12].mxu1 %vm1633_vm6, %v1703_v30 }
 0x63a   : > { %5442 = vrcp.f32 %v1687_v32  ;;  %5011 = vmatprep.mubr.msk.bf16.mxu1 %vm5801_vm4, %v5799_v53  ;;  %v5437_v10 = vpop.eup %5436 }
 0x63b   : > { %2174 = vrot.lane.b32.xlu0 %v6308_v45, %s5803_s14  ;;  %5444 = vpow2.f32 %v1902_v35  ;;  %v1693_v15 = vmul.f32 %v5437_v10, %v6480_v4 }
 0x63e   : > { %v5439_v40 = vpop.eup %5438 }
 0x63f   : > { %2178 = vrot.lane.b32.xlu0 %v6336_v20, %s5803_s14  ;;  %v1695_v37 = vmul.f32 %v5439_v40, %v6484_v25 }
 0x641   : > { %v1704_v41 = vpack.c.bf16 %v1695_v37, %v1693_v15 }
 0x642   : > { %v5441_v43 = vpop.eup %5440 }
 0x643   : > { %5012 = vmatmul.mubr.msk.bf16.gmra.mrb[16].mxu1 %vm1633_vm6, %v1704_v41  ;;  %v1697_v50 = vmul.f32 %v5441_v43, %v6488_v27  ;;  %v5312_v27 = vld [vmem:[%s6137_s28 + $0x10] sm:$0xff]  }
 0x644   : > { %v5443_v44 = vpop.eup %5442  ;;  %5015 = vmatprep.mubr.msk.bf16.mxu1 %vm5801_vm4, %v5799_v53  ;;  %5056 = vmatpush3.bf16.msra.mxu0 %v5312_v27 }
 0x645   : > { %v1699_v48 = vmul.f32 %v5443_v44, %v6492_v29  ;;  %v5445_v54 = vpop.eup %5444  ;;  %v5313_v29 = vld [vmem:[%s6137_s28 + $0x18] sm:$0xff]   ;;  %5057 = vmatprep.subr.bf16.mxu0 %v5799_v53 }
 0x646   : > { %v1919_v4 = vsel %vm1633_vm6, %v5445_v54, 0.0 }
 0x647   : > { %v1705_v55 = vpack.c.bf16 %v1699_v48, %v1697_v50 }
 0x648   : > { %5058 = vmatpush3.bf16.msra.mxu0 %v5313_v29 }
 0x649   : > { %5087 = vmatprep.subr.bf16.mxu0 %v5799_v53 }
 0x64b   : > { %5016 = vmatmul.mubr.msk.bf16.gmra.mrb[20].mxu1 %vm1633_vm6, %v1705_v55 }
 0x64c   : > { %1920 = vadd.xlane.f32.xlu1 %v1919_v4  ;;  %5043 = vmatprep.mubr.msk.bf16.mxu1 %vm5801_vm4, %v5799_v53 }
 0x65d   : > { %1944 = vrot.lane.b32.xlu1 %v6338_v21, %s5802_s0  ;;  %s5804_s0 = smov 32  }
 0x661   : > { %2180 = vrot.lane.b32.xlu1 %v6312_v47, %s5803_s14 }
 0x665   : > { %2184 = vrot.lane.b32.xlu1 %v6340_v22, %s5803_s14 }
 0x669   : > { %2176 = vrot.lane.b32.xlu1 %v6321_v2, %s5803_s14 }
 0x69a   : > { %v1906_v25 = vpop.xlane.xlu0 %1905 }
 0x69c   : > { %v1909_v14 = vpop.xlane.xlu1 %1908 }
 0x69d   : > { %5446 = vrcp.f32 %v1909_v14 }
 0x69e   : > { %5448 = vrcp.f32 %v1906_v25 }
 0x6a2   : > { %v1912_v57 = vpop.xlane.xlu0 %1911 }
 0x6a4   : > { %v1915_v63 = vpop.xlane.xlu1 %1914 }
 0x6a5   : > { %5450 = vrcp.f32 %v1915_v63 }
 0x6a6   : > { %5452 = vrcp.f32 %v1912_v57 }
 0x6a7   : > { %v5447_v7 = vpop.eup %5446 }
 0x6a8   : > { %v1943_v6 = vpop.permute.xlu1 %1942  ;;  %v5449_v3 = vpop.eup %5448  ;;  %v1925_v39 = vmul.f32 %v5447_v7, %v6504_v17 }
 0x6a9   : > { %v1923_v42 = vmul.f32 %v5449_v3, %v6500_v58 }
 0x6aa   : > { %v1918_v62 = vpop.xlane.xlu0 %1917 }
 0x6ab   : > { %v1934_v60 = vpack.c.bf16 %v1925_v39, %v1923_v42 }
 0x6ae   : > { %v1941_v11 = vpop.permute.xlu0 %1940 }
 0x6af   : > { %5038 = vmatpush3.bf16.msra.mxu1 %v1941_v11  ;;  %v5451_v56 = vpop.eup %5450 }
 0x6b0   : > { %5039 = vmatprep.subr.bf16.mxu1 %v5799_v53  ;;  %v5453_v18 = vpop.eup %5452  ;;  %v1929_v17 = vmul.f32 %v5451_v56, %v6513_v9 }
 0x6b1   : > { %v1927_v58 = vmul.f32 %v5453_v18, %v6509_v28 }
 0x6b2   : > { %v2183_v7 = vpop.permute.xlu0 %2182 }
 0x6b3   : > { %5040 = vmatpush3.bf16.msra.mxu1 %v1943_v6  ;;  %v1935_v1 = vpack.c.bf16 %v1929_v17, %v1927_v58  ;;  %v2199_v42 = vsel %vm1557_vm5, %v2183_v7, 0 }
 0x6b4   : > { %5041 = vmatprep.subr.bf16.mxu1 %v5799_v53 }
 0x6b6   : > { %v2175_v58 = vpop.permute.xlu0 %2174 }
 0x6d9   : > { %v1921_v13 = vpop.xlane.xlu1 %1920 }
 0x6da   : > { %5454 = vrcp.f32 %v1921_v13 }
 0x6db   : > { %5456 = vrcp.f32 %v1918_v62 }
 0x6dd   : > { %v1945_v16 = vpop.permute.xlu1 %1944 }
 0x6de   : > { %5042 = vmatpush3.bf16.msra.mxu1 %v1945_v16 }
 0x6df   : > { %5071 = vmatprep.subr.bf16.mxu1 %v5799_v53 }
 0x6e1   : > { %5044 = vmatmul.mubr.msk.bf16.vlgmr.msra.gmra.mrb[24].mxu1 %vm1633_vm6, %v1934_v60  ;;  %v2181_v29 = vpop.permute.xlu1 %2180 }
 0x6e2   : > { %5047 = vmatprep.mubr.msk.bf16.mxu1 %vm5801_vm4, %v5799_v53  ;;  %5072 = vmatpush3.bf16.msra.mxu1 %v5310_v52  ;;  %v2196_v63 = vsel %vm1557_vm5, %v2181_v29, 0 }
 0x6e3   : > { %5073 = vmatprep.subr.bf16.mxu1 %v5799_v53 }
 0x6e4   : > { %v5455_v8 = vpop.eup %5454 }
 0x6e5   : > { %v5457_v30 = vpop.eup %5456  ;;  %v1933_v31 = vmul.f32 %v5455_v8, %v5445_v54  ;;  %v2185_v60 = vpop.permute.xlu1 %2184 }
 0x6e6   : > { %5074 = vmatpush3.bf16.msra.mxu1 %v5311_v19  ;;  %v1931_v32 = vmul.f32 %v5457_v30, %v6517_v33  ;;  %v2202_v17 = vsel %vm1557_vm5, %v2185_v60, 0  ;;  %v2179_v8 = vpop.permute.xlu0 %2178 }
 0x6e7   : > { %5105 = vmatprep.subr.bf16.mxu1 %v5799_v53 }
 0x6e8   : > { %v1936_v35 = vpack.c.bf16 %v1933_v31, %v1931_v32 }
 0x6e9   : > { %5048 = vmatmul.mubr.msk.bf16.gmra.mrb[28].mxu1 %vm1633_vm6, %v1935_v1  ;;  %v2177_v1 = vpop.permute.xlu1 %2176 }
 0x6ea   : > { %5051 = vmatprep.mubr.msk.bf16.mxu1 %vm5801_vm4, %v5799_v53 }
 0x6f1   : > { %5052 = vmatmul.mubr.msk.bf16.gmra.mrb[32].mxu1 %vm1633_vm6, %v1936_v35 }
 0x6f2   : > { %5075 = vmatprep.mubr.msk.bf16.mxu1 %vm5801_vm4, %v5799_v53 }
 0x70c   : > { %v1749_v28 = vpop.f32.mrb[12].mxu1 }
 0x70d   : > { %v5009_v9 = vpop.f32.mrb[13].mxu1 }
 0x70e   : > { %v1752_v10 = vpop.f32.mrb[14].mxu1 }
 0x70f   : > { %v1772_v40 = vpack.c.bf16 %v1752_v10, %v1749_v28  ;;  %v5010_v15 = vpop.f32.mrb[15].mxu1 }
 0x711   : > { %5076 = vmatmul.mubr.msk.bf16.vlgmr.msra.gmra.mrb[36].mxu1 %vm1557_vm5, %v1772_v40 }
 0x712   : > { %5079 = vmatprep.mubr.msk.bf16.mxu1 %vm5801_vm4, %v5799_v53 }
 0x716   : > { %v1757_v37 = vpop.f32.mrb[16].mxu1 }
 0x717   : > { %v5013_v41 = vpop.f32.mrb[17].mxu1 }
 0x718   : > { %v1760_v43 = vpop.f32.mrb[18].mxu1 }
 0x719   : > { %v1773_v33 = vpack.c.bf16 %v1760_v43, %v1757_v37  ;;  %v5014_v44 = vpop.f32.mrb[19].mxu1 }
 0x71b   : > { %5080 = vmatmul.mubr.msk.bf16.gmra.mrb[40].mxu1 %vm1557_vm5, %v1773_v33 }
 0x71c   : > { %5083 = vmatprep.mubr.msk.bf16.mxu1 %vm5801_vm4, %v5799_v53 }
 0x71e   : > { %v1765_v48 = vpop.f32.mrb[20].mxu1 }
 0x71f   : > { %v5017_v50 = vpop.f32.mrb[21].mxu1 }
 0x720   : > { %v1768_v54 = vpop.f32.mrb[22].mxu1 }
 0x721   : > { %v1774_v55 = vpack.c.bf16 %v1768_v54, %v1765_v48  ;;  %v5018_v4 = vpop.f32.mrb[23].mxu1 }
 0x723   : > { %5084 = vmatmul.mubr.msk.bf16.gmra.mrb[44].mxu1 %vm1557_vm5, %v1774_v55 }
 0x724   : > { %5111 = vmatprep.mubr.msk.bf16.mxu1 %vm5801_vm4, %v5799_v53 }
 0x7b4   : > { %v1992_v25 = vpop.f32.mrb[24].mxu1 }
 0x7b5   : > { %v5045_v27 = vpop.f32.mrb[25].mxu1 }
 0x7b6   : > { %v1995_v57 = vpop.f32.mrb[26].mxu1 }
 0x7b7   : > { %v2015_v14 = vpack.c.bf16 %v1995_v57, %v1992_v25  ;;  %v5046_v62 = vpop.f32.mrb[27].mxu1 }
 0x7b9   : > { %5060 = vmatmul.mubr.msk.bf16.vlgmr.msra.gmra.mrb[36].mxu0 %vm1557_vm5, %v2015_v14 }
 0x7ba   : > { %5088 = vmatpush3.bf16.xpose.msra.mxu0 %v2196_v63  ;;  %5063 = vmatprep.mubr.msk.bf16.mxu0 %vm5801_vm4, %v5799_v53 }
 0x7bb   : > { %5089 = vmatprep.subr.bf16.mxu0 %v5799_v53 }
 0x7bc   : > { %v2000_v11 = vpop.f32.mrb[28].mxu1 }
 0x7bd   : > { %v5049_v6 = vpop.f32.mrb[29].mxu1 }
 0x7be   : > { %v2003_v13 = vpop.f32.mrb[30].mxu1 }
 0x7bf   : > { %v2016_v3 = vpack.c.bf16 %v2003_v13, %v2000_v11  ;;  %v5050_v39 = vpop.f32.mrb[31].mxu1 }
 0x7c1   : > { %5064 = vmatmul.mubr.msk.bf16.gmra.mrb[40].mxu0 %vm1557_vm5, %v2016_v3 }
 0x7c2   : > { %5090 = vmatpush3.bf16.xpose.msra.mxu0 %v2199_v42  ;;  %5067 = vmatprep.mubr.msk.bf16.mxu0 %vm5801_vm4, %v5799_v53 }
 0x7c3   : > { %5091 = vmatprep.subr.bf16.mxu0 %v5799_v53 }
 0x7c4   : > { %v2008_v16 = vpop.f32.mrb[32].mxu1 }
 0x7c5   : > { %v5053_v52 = vpop.f32.mrb[33].mxu1 }
 0x7c6   : > { %v2011_v56 = vpop.f32.mrb[34].mxu1 }
 0x7c7   : > { %v2017_v18 = vpack.c.bf16 %v2011_v56, %v2008_v16  ;;  %v5054_v19 = vpop.f32.mrb[35].mxu1 }
 0x7c9   : > { %5068 = vmatmul.mubr.msk.bf16.gmra.mrb[44].mxu0 %vm1557_vm5, %v2017_v18 }
 0x7ca   : > { %5092 = vmatpush3.bf16.xpose.msra.mxu0 %v2202_v17  ;;  %5093 = vmatprep.mubr.msk.bf16.mxu0 %vm5801_vm4, %v5799_v53 }
 0x7cb   : > { %5123 = vmatprep.subr.bf16.mxu0 %v5799_v53 }
 0x7d1   : > { %5094 = vmatmul.mubr.msk.bf16.vlgmr.msra.gmra.mrb[48].mxu0 %vm1557_vm5, %v2175_v58 }
 0x7d2   : > { %5097 = vmatprep.mubr.msk.bf16.mxu0 %vm5801_vm4, %v5799_v53 }
 0x7d9   : > { %5098 = vmatmul.mubr.msk.bf16.gmra.mrb[52].mxu0 %vm1557_vm5, %v2177_v1 }
 0x7da   : > { %5101 = vmatprep.mubr.msk.bf16.mxu0 %vm5801_vm4, %v5799_v53 }
 0x7e1   : > { %5102 = vmatmul.mubr.msk.bf16.gmra.mrb[56].mxu0 %vm1557_vm5, %v2179_v8 }
 0x7e2   : > { %5127 = vmatprep.mubr.msk.bf16.mxu0 %vm5801_vm4, %v5799_v53 }
 0x7e4   : > { %v2151_v30 = vpop.f32.mrb[36].mxu1 }
 0x7e5   : > { %v5077_v31 = vpop.f32.mrb[37].mxu1 }
 0x7e6   : > { %v2154_v32 = vpop.f32.mrb[38].mxu1 }
 0x7e7   : > { %v5078_v35 = vpop.f32.mrb[39].mxu1 }
 0x7ee   : > { %v2159_v28 = vpop.f32.mrb[40].mxu1 }
 0x7ef   : > { %v5081_v9 = vpop.f32.mrb[41].mxu1 }
 0x7f0   : > { %v2162_v10 = vpop.f32.mrb[42].mxu1 }
 0x7f1   : > { %v5082_v40 = vpop.f32.mrb[43].mxu1 }
 0x7f6   : > { %v2167_v15 = vpop.f32.mrb[44].mxu1 }
 0x7f7   : > { %v5085_v37 = vpop.f32.mrb[45].mxu1 }
 0x7f8   : > { %v2170_v41 = vpop.f32.mrb[46].mxu1 }
 0x7f9   : > { %v5086_v43 = vpop.f32.mrb[47].mxu1 }
 0x88c   : > { %v2073_v33 = vpop.f32.mrb[36].mxu0 }
 0x88d   : > { %v6614_v44 = vadd.f32 %v2151_v30, %v2073_v33  ;;  %v5061_v48 = vpop.f32.mrb[37].mxu0 }
 0x88e   : > { %v2076_v50 = vpop.f32.mrb[38].mxu0 }
 0x88f   : > { %v6616_v54 = vadd.f32 %v2154_v32, %v2076_v50  ;;  %v5062_v55 = vpop.f32.mrb[39].mxu0 }
 0x894   : > { %v2081_v4 = vpop.f32.mrb[40].mxu0 }
 0x895   : > { %v6618_v25 = vadd.f32 %v2159_v28, %v2081_v4  ;;  %v5065_v27 = vpop.f32.mrb[41].mxu0 }
 0x896   : > { %v2084_v29 = vpop.f32.mrb[42].mxu0 }
 0x897   : > { %v6620_v57 = vadd.f32 %v2162_v10, %v2084_v29  ;;  %v5066_v14 = vpop.f32.mrb[43].mxu0 }
 0x89c   : > { %v2089_v62 = vpop.f32.mrb[44].mxu0 }
 0x89d   : > { %v6622_v63 = vadd.f32 %v2167_v15, %v2089_v62  ;;  %v5069_v11 = vpop.f32.mrb[45].mxu0 }
 0x89e   : > { %v2092_v6 = vpop.f32.mrb[46].mxu0 }
 0x89f   : > { %v6624_v7 = vadd.f32 %v2170_v41, %v2092_v6  ;;  %v5070_v13 = vpop.f32.mrb[47].mxu0 }
 0x8a4   : > { %v2238_v3 = vpop.f32.mrb[48].mxu0 }
 0x8a5   : > { %v2239_v39 = vadd.f32 %v2238_v3, %v6383_v36  ;;  %v5095_v42 = vpop.f32.mrb[49].mxu0 }
 0x8a6   : > { %v2241_v16 = vpop.f32.mrb[50].mxu0 }
 0x8a7   : > { %v2242_v52 = vadd.f32 %v2241_v16, %v6388_v38  ;;  %v5096_v60 = vpop.f32.mrb[51].mxu0  ;;  %v2261_v56 = vsel %vm1633_vm6, %v2239_v39, -inf }
 0x8a8   : > { %2262 = vmax.xlane.f32.xlu1 %v2261_v56 }
 0x8a9   : > { %v2264_v18 = vsel %vm1633_vm6, %v2242_v52, -inf }
 0x8aa   : > { %2265 = vmax.xlane.f32.xlu0 %v2264_v18 }
 0x8ac   : > { %v2246_v19 = vpop.f32.mrb[52].mxu0 }
 0x8ad   : > { %v2247_v17 = vadd.f32 %v2246_v19, %v6403_v49  ;;  %v5099_v58 = vpop.f32.mrb[53].mxu0 }
 0x8ae   : > { %v2249_v1 = vpop.f32.mrb[54].mxu0 }
 0x8af   : > { %v2250_v8 = vadd.f32 %v2249_v1, %v6408_v51  ;;  %v5100_v30 = vpop.f32.mrb[55].mxu0  ;;  %v2267_v36 = vsel %vm1633_vm6, %v2247_v17, -inf }
 0x8b0   : > { %2268 = vmax.xlane.f32.xlu0 %v2267_v36 }
 0x8b1   : > { %v2270_v38 = vsel %vm1633_vm6, %v2250_v8, -inf }
 0x8b4   : > { %2271 = vmax.xlane.f32.xlu0 %v2270_v38  ;;  %v2254_v31 = vpop.f32.mrb[56].mxu0  ;;  %v5314_v38 = vld [vmem:[%s6137_s28 + $0x20] sm:$0xff]  }
 0x8b5   : > { %v2255_v32 = vadd.f32 %v2254_v31, %v6418_v59  ;;  %v5103_v35 = vpop.f32.mrb[57].mxu0  ;;  %5124 = vmatpush3.bf16.msra.mxu0 %v5314_v38 }
 0x8b6   : > { %v2257_v28 = vpop.f32.mrb[58].mxu0  ;;  %5125 = vmatprep.subr.bf16.mxu0 %v5799_v53 }
 0x8b7   : > { %v2258_v9 = vadd.f32 %v2257_v28, %v6425_v0  ;;  %v5104_v10 = vpop.f32.mrb[59].mxu0  ;;  %v2273_v40 = vsel %vm1633_vm6, %v2255_v32, -inf }
 0x8b8   : > { %2274 = vmax.xlane.f32.xlu1 %v2273_v40 }
 0x8b9   : > { %v2276_v51 = vsel %vm1633_vm6, %v2258_v9, -inf }
 0x8ba   : > { %2277 = vmax.xlane.f32.xlu0 %v2276_v51 }
 0x8c9   : > { %2330 = vrot.lane.b32.xlu1 %v6310_v46, %s5803_s14 }
 0x935   : > { %v2263_v15 = vpop.xlane.xlu1 %2262 }
 0x936   : > { %v2279_v37 = vsub.f32 %v2239_v39, %v2263_v15 }
 0x937   : > { %v2266_v41 = vpop.xlane.xlu0 %2265 }
 0x938   : > { %v2285_v43 = vmul.f32 1.442695, %v2279_v37  ;;  %v2280_v33 = vsub.f32 %v2242_v52, %v2266_v41 }
 0x93a   : > { %5458 = vpow2.f32 %v2285_v43  ;;  %v2287_v48 = vmul.f32 1.442695, %v2280_v33 }
 0x93c   : > { %5460 = vpow2.f32 %v2287_v48 }
 0x93d   : > { %v2269_v50 = vpop.xlane.xlu0 %2268 }
 0x93e   : > { %v2281_v55 = vsub.f32 %v2247_v17, %v2269_v50 }
 0x940   : > { %v2289_v4 = vmul.f32 1.442695, %v2281_v55 }
 0x941   : > { %v2272_v27 = vpop.xlane.xlu0 %2271 }
 0x942   : > { %5462 = vpow2.f32 %v2289_v4  ;;  %v2282_v29 = vsub.f32 %v2250_v8, %v2272_v27 }
 0x944   : > { %v5459_v14 = vpop.eup %5458  ;;  %v2291_v62 = vmul.f32 1.442695, %v2282_v29 }
 0x945   : > { %v2275_v11 = vpop.xlane.xlu1 %2274  ;;  %v2297_v6 = vsel %vm1633_vm6, %v5459_v14, 0.0 }
 0x946   : > { %v5461_v13 = vpop.eup %5460  ;;  %5464 = vpow2.f32 %v2291_v62  ;;  %v2283_v3 = vsub.f32 %v2255_v32, %v2275_v11  ;;  %2298 = vadd.xlane.f32.xlu1 %v2297_v6 }
 0x947   : > { %v2278_v39 = vpop.xlane.xlu0 %2277  ;;  %v2300_v42 = vsel %vm1633_vm6, %v5461_v13, 0.0 }
 0x948   : > { %v2293_v16 = vmul.f32 1.442695, %v2283_v3  ;;  %v2284_v52 = vsub.f32 %v2258_v9, %v2278_v39  ;;  %2301 = vadd.xlane.f32.xlu0 %v2300_v42  ;;  %v5315_v42 = vld [vmem:[%s6137_s28 + $0x28] sm:$0xff]  }
 0x949   : > { %v2331_v60 = vpop.permute.xlu1 %2330  ;;  %5126 = vmatpush3.bf16.msra.mxu0 %v5315_v42 }
 0x94a   : > { %5466 = vpow2.f32 %v2293_v16  ;;  %v2295_v56 = vmul.f32 1.442695, %v2284_v52  ;;  %5106 = vmatpush3.bf16.msra.mxu1 %v2331_v60  ;;  %5157 = vmatprep.subr.bf16.mxu0 %v5799_v53 }
 0x94b   : > { %5107 = vmatprep.subr.bf16.mxu1 %v5799_v53 }
 0x94c   : > { %v5463_v18 = vpop.eup %5462  ;;  %5468 = vpow2.f32 %v2295_v56 }
 0x94d   : > { %v2303_v19 = vsel %vm1633_vm6, %v5463_v18, 0.0 }
 0x94e   : > { %2304 = vadd.xlane.f32.xlu1 %v2303_v19 }
 0x950   : > { %v5465_v17 = vpop.eup %5464 }
 0x951   : > { %v2306_v58 = vsel %vm1633_vm6, %v5465_v17, 0.0 }
 0x952   : > { %2307 = vadd.xlane.f32.xlu0 %v2306_v58 }
 0x954   : > { %v5467_v1 = vpop.eup %5466 }
 0x955   : > { %v2309_v8 = vsel %vm1633_vm6, %v5467_v1, 0.0 }
 0x956   : > { %v5469_v30 = vpop.eup %5468  ;;  %2310 = vadd.xlane.f32.xlu0 %v2309_v8 }
 0x957   : > { %v2312_v36 = vsel %vm1633_vm6, %v5469_v30, 0.0 }
 0x95a   : > { %2313 = vadd.xlane.f32.xlu0 %v2312_v36 }
 0x95f   : > { %2334 = vrot.lane.b32.xlu1 %v6338_v21, %s5803_s14 }
 0x963   : > { %2498 = vrot.lane.b32.xlu1 %v6312_v47, %s5804_s0 }
 0x967   : > { %2500 = vrot.lane.b32.xlu1 %v6325_v61, %s5804_s0 }
 0x96b   : > { %2502 = vrot.lane.b32.xlu1 %v6340_v22, %s5804_s0 }
 0x96f   : > { %2492 = vrot.lane.b32.xlu1 %v6308_v45, %s5804_s0 }
 0x970   : > { %2332 = vrot.lane.b32.xlu0 %v6323_v5, %s5803_s14 }
 0x973   : > { %2496 = vrot.lane.b32.xlu1 %v6336_v20, %s5804_s0 }
 0x974   : > { %2494 = vrot.lane.b32.xlu0 %v6321_v2, %s5804_s0 }
 0x9d3   : > { %v2299_v61 = vpop.xlane.xlu1 %2298 }
 0x9d5   : > { %v2302_v47 = vpop.xlane.xlu0 %2301 }
 0x9d6   : > { %5470 = vrcp.f32 %v2302_v47 }
 0x9d7   : > { %5472 = vrcp.f32 %v2299_v61 }
 0x9db   : > { %v2305_v45 = vpop.xlane.xlu1 %2304 }
 0x9df   : > { %v2308_v31 = vpop.xlane.xlu0 %2307  ;;  %v2335_v10 = vpop.permute.xlu1 %2334 }
 0x9e0   : > { %5474 = vrcp.f32 %v2308_v31  ;;  %v5471_v35 = vpop.eup %5470 }
 0x9e1   : > { %5476 = vrcp.f32 %v2305_v45  ;;  %v5473_v20 = vpop.eup %5472  ;;  %v2318_v9 = vmul.f32 %v5471_v35, %v5461_v13 }
 0x9e2   : > { %v2316_v2 = vmul.f32 %v5473_v20, %v5459_v14 }
 0x9e3   : > { %v2311_v22 = vpop.xlane.xlu0 %2310  ;;  %v2499_v37 = vpop.permute.xlu1 %2498 }
 0x9e4   : > { %v2327_v40 = vpack.c.bf16 %v2318_v9, %v2316_v2  ;;  %v2514_v33 = vsel %vm1557_vm5, %v2499_v37, 0 }
 0x9e7   : > { %v2314_v32 = vpop.xlane.xlu0 %2313  ;;  %v2501_v4 = vpop.permute.xlu1 %2500 }
 0x9e8   : > { %5478 = vrcp.f32 %v2314_v32  ;;  %v2517_v14 = vsel %vm1557_vm5, %v2501_v4, 0 }
 0x9e9   : > { %5480 = vrcp.f32 %v2311_v22  ;;  %v5614_v22 = vld [vmem:[%s7791_s24] sm:$0xff] }
 0x9ea   : > { %v5475_v51 = vpop.eup %5474 }
 0x9eb   : > { %v2333_v28 = vpop.permute.xlu0 %2332  ;;  %v5477_v15 = vpop.eup %5476  ;;  %v2322_v41 = vmul.f32 %v5475_v51, %v5465_v17 }
 0x9ec   : > { %5108 = vmatpush3.bf16.msra.mxu1 %v2333_v28  ;;  %v2320_v43 = vmul.f32 %v5477_v15, %v5463_v18  ;;  %v2503_v11 = vpop.permute.xlu1 %2502  ;;  %v5615_v28 = vld [vmem:[%s7791_s24 + $0x8] sm:$0xff] }
 0x9ed   : > { %5109 = vmatprep.subr.bf16.mxu1 %v5799_v53  ;;  %v2520_v6 = vsel %vm1557_vm5, %v2503_v11, 0 }
 0x9ee   : > { %v2328_v48 = vpack.c.bf16 %v2322_v41, %v2320_v43  ;;  %v5616_v41 = vld [vmem:[%s7791_s24 + $0x18] sm:$0xff] }
 0x9ef   : > { %v2495_v3 = vpop.permute.xlu0 %2494 }
 0x9f0   : > { %5110 = vmatpush3.bf16.msra.mxu1 %v2335_v10  ;;  %v2493_v13 = vpop.permute.xlu1 %2492 }
 0x9f1   : > { %5139 = vmatprep.subr.bf16.mxu1 %v5799_v53 }
 0x9f2   : > { %v5479_v50 = vpop.eup %5478 }
 0x9f3   : > { %5112 = vmatmul.mubr.msk.bf16.vlgmr.msra.gmra.mrb[48].mxu1 %vm1633_vm6, %v2327_v40  ;;  %v5481_v55 = vpop.eup %5480  ;;  %v2326_v27 = vmul.f32 %v5479_v50, %v5469_v30 }
 0x9f4   : > { %5115 = vmatprep.mubr.msk.bf16.mxu1 %vm5801_vm4, %v5799_v53  ;;  %v2324_v29 = vmul.f32 %v5481_v55, %v5467_v1  ;;  %v2497_v39 = vpop.permute.xlu1 %2496 }
 0x9f6   : > { %v2329_v62 = vpack.c.bf16 %v2326_v27, %v2324_v29 }
 0x9f9   : > { %5140 = vmatpush3.bf16.xpose.msra.mxu1 %v2514_v33 }
 0x9fa   : > { %5141 = vmatprep.subr.bf16.mxu1 %v5799_v53 }
 0x9fb   : > { %5116 = vmatmul.mubr.msk.bf16.gmra.mrb[52].mxu1 %vm1633_vm6, %v2328_v48 }
 0x9fc   : > { %5119 = vmatprep.mubr.msk.bf16.mxu1 %vm5801_vm4, %v5799_v53 }
 0xa01   : > { %5142 = vmatpush3.bf16.xpose.msra.mxu1 %v2517_v14 }
 0xa02   : > { %5143 = vmatprep.subr.bf16.mxu1 %v5799_v53 }
 0xa03   : > { %5120 = vmatmul.mubr.msk.bf16.gmra.mrb[56].mxu1 %vm1633_vm6, %v2329_v62 }
 0xa04   : > { %5145 = vmatprep.mubr.msk.bf16.mxu1 %vm5801_vm4, %v5799_v53 }
 0xa09   : > { %5144 = vmatpush3.bf16.xpose.msra.mxu1 %v2520_v6 }
 0xa0a   : > { %5175 = vmatprep.subr.bf16.mxu1 %v5799_v53 }
 0xa10   : > { %5146 = vmatmul.mubr.msk.bf16.vlgmr.msra.gmra.mrb[60].mxu1 %vm1557_vm5, %v2493_v13 }
 0xa11   : > { %5149 = vmatprep.mubr.msk.bf16.mxu1 %vm5801_vm4, %v5799_v53 }
 0xa18   : > { %5150 = vmatmul.mubr.msk.bf16.gmra.mrb[64].mxu1 %vm1557_vm5, %v2495_v3 }
 0xa19   : > { %5153 = vmatprep.mubr.msk.bf16.mxu1 %vm5801_vm4, %v5799_v53 }
 0xa20   : > { %5154 = vmatmul.mubr.msk.bf16.gmra.mrb[68].mxu1 %vm1557_vm5, %v2497_v39 }
 0xa21   : > { %5179 = vmatprep.mubr.msk.bf16.mxu1 %vm5801_vm4, %v5799_v53 }
 0xac6   : > { %v2382_v16 = vpop.f32.mrb[48].mxu1 }
 0xac7   : > { %v5113_v52 = vpop.f32.mrb[49].mxu1 }
 0xac8   : > { %v2385_v60 = vpop.f32.mrb[50].mxu1 }
 0xac9   : > { %v2405_v56 = vpack.c.bf16 %v2385_v60, %v2382_v16  ;;  %v5114_v18 = vpop.f32.mrb[51].mxu1 }
 0xacb   : > { %5128 = vmatmul.mubr.msk.bf16.vlgmr.msra.gmra.mrb[60].mxu0 %vm1557_vm5, %v2405_v56 }
 0xacc   : > { %5131 = vmatprep.mubr.msk.bf16.mxu0 %vm5801_vm4, %v5799_v53 }
 0xace   : > { %v2390_v19 = vpop.f32.mrb[52].mxu1 }
 0xacf   : > { %v5117_v17 = vpop.f32.mrb[53].mxu1 }
 0xad0   : > { %v2393_v58 = vpop.f32.mrb[54].mxu1 }
 0xad1   : > { %v2406_v1 = vpack.c.bf16 %v2393_v58, %v2390_v19  ;;  %v5118_v8 = vpop.f32.mrb[55].mxu1 }
 0xad3   : > { %5132 = vmatmul.mubr.msk.bf16.gmra.mrb[64].mxu0 %vm1557_vm5, %v2406_v1 }
 0xad4   : > { %5135 = vmatprep.mubr.msk.bf16.mxu0 %vm5801_vm4, %v5799_v53 }
 0xad6   : > { %v2398_v30 = vpop.f32.mrb[56].mxu1 }
 0xad7   : > { %v5121_v36 = vpop.f32.mrb[57].mxu1 }
 0xad8   : > { %v2401_v38 = vpop.f32.mrb[58].mxu1 }
 0xad9   : > { %v2407_v47 = vpack.c.bf16 %v2401_v38, %v2398_v30  ;;  %v5122_v61 = vpop.f32.mrb[59].mxu1 }
 0xadb   : > { %5136 = vmatmul.mubr.msk.bf16.gmra.mrb[68].mxu0 %vm1557_vm5, %v2407_v47 }
 0xadc   : > { %5163 = vmatprep.mubr.msk.bf16.mxu0 %vm5801_vm4, %v5799_v53 }
 0xae3   : > { %v2556_v31 = vpop.f32.mrb[60].mxu1 }
 0xae4   : > { %v2557_v45 = vadd.f32 %v5614_v22, %v2556_v31  ;;  %v5147_v32 = vpop.f32.mrb[61].mxu1 }
 0xae5   : > { %v2559_v35 = vpop.f32.mrb[62].mxu1 }
 0xae6   : > { %v2560_v20 = vadd.f32 %v5615_v28, %v2559_v35  ;;  %v5148_v9 = vpop.f32.mrb[63].mxu1  ;;  %v2579_v2 = vsel %vm1633_vm6, %v2557_v45, -inf }
 0xae7   : > { %2580 = vmax.xlane.f32.xlu0 %v2579_v2 }
 0xae8   : > { %v2582_v10 = vsel %vm1633_vm6, %v2560_v20, -inf }
 0xae9   : > { %2583 = vmax.xlane.f32.xlu1 %v2582_v10 }
 0xaeb   : > { %v2564_v40 = vpop.f32.mrb[64].mxu1 }
 0xaec   : > { %v2565_v51 = vadd.f32 %v2564_v40, %v6403_v49  ;;  %v5151_v15 = vpop.f32.mrb[65].mxu1 }
 0xaed   : > { %v2567_v37 = vpop.f32.mrb[66].mxu1 }
 0xaee   : > { %v2568_v43 = vadd.f32 %v5616_v41, %v2567_v37  ;;  %v5152_v33 = vpop.f32.mrb[67].mxu1  ;;  %v2585_v48 = vsel %vm1633_vm6, %v2565_v51, -inf }
 0xaef   : > { %2586 = vmax.xlane.f32.xlu0 %v2585_v48 }
 0xaf0   : > { %v2588_v50 = vsel %vm1633_vm6, %v2568_v43, -inf }
 0xaf3   : > { %2589 = vmax.xlane.f32.xlu0 %v2588_v50  ;;  %v2572_v55 = vpop.f32.mrb[68].mxu1 }
 0xaf4   : > { %v2573_v4 = vadd.f32 %v2572_v55, %v6418_v59  ;;  %v5155_v27 = vpop.f32.mrb[69].mxu1 }
 0xaf5   : > { %v2575_v29 = vpop.f32.mrb[70].mxu1 }
 0xaf6   : > { %v6718_v49 = vadd.f32 %v2575_v29, %v6425_v0  ;;  %v5156_v14 = vpop.f32.mrb[71].mxu1  ;;  %v2591_v62 = vsel %vm1633_vm6, %v2573_v4, -inf }
 0xaf7   : > { %2592 = vmax.xlane.f32.xlu0 %v2591_v62 }
 0xaf8   : > { %v2594_v11 = vsel %vm1633_vm6, %v6718_v49, -inf }
 0xaf9   : > { %2595 = vmax.xlane.f32.xlu1 %v2594_v11 }
 0xb74   : > { %v2581_v6 = vpop.xlane.xlu0 %2580 }
 0xb75   : > { %v2597_v13 = vsub.f32 %v2557_v45, %v2581_v6 }
 0xb76   : > { %v2584_v3 = vpop.xlane.xlu1 %2583 }
 0xb77   : > { %v2603_v39 = vmul.f32 1.442695, %v2597_v13  ;;  %v2598_v42 = vsub.f32 %v2560_v20, %v2584_v3 }
 0xb79   : > { %5482 = vpow2.f32 %v2603_v39  ;;  %v2605_v59 = vmul.f32 1.442695, %v2598_v42 }
 0xb7b   : > { %5484 = vpow2.f32 %v2605_v59 }
 0xb7c   : > { %v2587_v16 = vpop.xlane.xlu0 %2586 }
 0xb7d   : > { %v2599_v52 = vsub.f32 %v2565_v51, %v2587_v16 }
 0xb7f   : > { %v2607_v0 = vmul.f32 1.442695, %v2599_v52 }
 0xb80   : > { %v2590_v60 = vpop.xlane.xlu0 %2589 }
 0xb81   : > { %5486 = vpow2.f32 %v2607_v0  ;;  %v2600_v56 = vsub.f32 %v2568_v43, %v2590_v60 }
 0xb83   : > { %v6723_v18 = vpop.eup %5482  ;;  %v2609_v19 = vmul.f32 1.442695, %v2600_v56 }
 0xb84   : > { %v2593_v17 = vpop.xlane.xlu0 %2592  ;;  %v2615_v58 = vsel %vm1633_vm6, %v6723_v18, 0.0 }
 0xb85   : > { %v6727_v1 = vpop.eup %5484  ;;  %5488 = vpow2.f32 %v2609_v19  ;;  %v2601_v8 = vsub.f32 %v2573_v4, %v2593_v17  ;;  %2616 = vadd.xlane.f32.xlu0 %v2615_v58 }
 0xb86   : > { %v2618_v30 = vsel %vm1633_vm6, %v6727_v1, 0.0 }
 0xb87   : > { %v2611_v36 = vmul.f32 1.442695, %v2601_v8  ;;  %2619 = vadd.xlane.f32.xlu1 %v2618_v30 }
 0xb89   : > { %5490 = vpow2.f32 %v2611_v36 }
 0xb8b   : > { %v6731_v38 = vpop.eup %5486 }
 0xb8c   : > { %v2621_v47 = vsel %vm1633_vm6, %v6731_v38, 0.0 }
 0xb8d   : > { %2622 = vadd.xlane.f32.xlu0 %v2621_v47 }
 0xb8f   : > { %v6735_v61 = vpop.eup %5488 }
 0xb90   : > { %v2624_v31 = vsel %vm1633_vm6, %v6735_v61, 0.0 }
 0xb91   : > { %2625 = vadd.xlane.f32.xlu1 %v2624_v31 }
 0xb93   : > { %v6739_v22 = vpop.eup %5490 }
 0xb94   : > { %v2627_v45 = vsel %vm1633_vm6, %v6739_v22, 0.0 }
 0xb95   : > { %2628 = vadd.xlane.f32.xlu0 %v2627_v45 }
 0xb9e   : > { %v2463_v32 = vpop.f32.mrb[60].mxu0 }
 0xb9f   : > { %v6744_v35 = vadd.f32 %v2463_v32, %v6614_v44  ;;  %v5129_v28 = vpop.f32.mrb[61].mxu0 }
 0xba0   : > { %v2466_v20 = vpop.f32.mrb[62].mxu0 }
 0xba1   : > { %v6747_v9 = vadd.f32 %v2466_v20, %v6616_v54  ;;  %v5130_v2 = vpop.f32.mrb[63].mxu0  ;;  %v2596_v54 = vpop.xlane.xlu1 %2595 }
 0xba2   : > { %2650 = vrot.lane.b32.xlu1 %v6323_v5, %s5804_s0 }
 0xba6   : > { %v2471_v10 = vpop.f32.mrb[64].mxu0 }
 0xba7   : > { %v6752_v40 = vadd.f32 %v2471_v10, %v6618_v25  ;;  %v5133_v51 = vpop.f32.mrb[65].mxu0  ;;  %v2602_v25 = vsub.f32 %v6718_v49, %v2596_v54 }
 0xba8   : > { %v2474_v15 = vpop.f32.mrb[66].mxu0 }
 0xba9   : > { %v6755_v37 = vadd.f32 %v2474_v15, %v6620_v57  ;;  %v5134_v44 = vpop.f32.mrb[67].mxu0  ;;  %v2613_v50 = vmul.f32 1.442695, %v2602_v25 }
 0xbab   : > { %2648 = vrot.lane.b32.xlu0 %v6310_v46, %s5804_s0  ;;  %5492 = vpow2.f32 %v2613_v50  ;;  %v5316_v46 = vld [vmem:[%s6137_s28 + $0x30] sm:$0xff]   ;;  %v5618_v50 = vld [vmem:[#allocation2 + $0x8] sm:$0xff] }
 0xbac   : > { %5176 = vmatpush3.bf16.msra.mxu1 %v5316_v46 }
 0xbad   : > { %5177 = vmatprep.subr.bf16.mxu1 %v5799_v53 }
 0xbae   : > { %v2479_v41 = vpop.f32.mrb[68].mxu0 }
 0xbaf   : > { %v6760_v43 = vadd.f32 %v2479_v41, %v6622_v63  ;;  %v5137_v5 = vpop.f32.mrb[69].mxu0  ;;  %v5317_v63 = vld [vmem:[%s6137_s28 + $0x38] sm:$0xff]  }
 0xbb0   : > { %v2482_v33 = vpop.f32.mrb[70].mxu0  ;;  %5178 = vmatpush3.bf16.msra.mxu1 %v5317_v63  ;;  %v4664_v5 = vld [vmem:[%s7792_s20] ss:$0 sm:$0xff] }
 0xbb1   : > { %v6764_v48 = vadd.f32 %v2482_v33, %v6624_v7  ;;  %v5138_v57 = vpop.f32.mrb[71].mxu0 }
 0xbb5   : > { %v5493_v55 = vpop.eup %5492 }
 0xbb6   : > { %v2630_v4 = vsel %vm1633_vm6, %v5493_v55, 0.0 }
 0xbc6   : > { %2631 = vadd.xlane.f32.xlu1 %v2630_v4 }
 0xbd7   : > { %2652 = vrot.lane.b32.xlu1 %v6338_v21, %s5804_s0 }
 0xc12   : > { %v2617_v27 = vpop.xlane.xlu0 %2616 }
 0xc14   : > { %v2620_v7 = vpop.xlane.xlu1 %2619 }
 0xc15   : > { %5494 = vrcp.f32 %v2620_v7  ;;  %v5619_v7 = vld [vmem:[#allocation2 + $0x10] sm:$0xff] }
 0xc16   : > { %5496 = vrcp.f32 %v2617_v27 }
 0xc1a   : > { %v2623_v29 = vpop.xlane.xlu0 %2622 }
 0xc1e   : > { %v2626_v14 = vpop.xlane.xlu1 %2625 }
 0xc1f   : > { %5498 = vrcp.f32 %v2626_v14  ;;  %v5495_v21 = vpop.eup %5494 }
 0xc20   : > { %5500 = vrcp.f32 %v2623_v29  ;;  %v5497_v13 = vpop.eup %5496  ;;  %v2636_v3 = vmul.f32 %v5495_v21, %v6727_v1 }
 0xc21   : > { %v2634_v39 = vmul.f32 %v5497_v13, %v6723_v18 }
 0xc22   : > { %v2629_v49 = vpop.xlane.xlu0 %2628  ;;  %v2651_v11 = vpop.permute.xlu1 %2650 }
 0xc23   : > { %v2645_v59 = vpack.c.bf16 %v2636_v3, %v2634_v39 }
 0xc26   : > { %v2649_v62 = vpop.permute.xlu0 %2648 }
 0xc27   : > { %5158 = vmatpush3.bf16.msra.mxu0 %v2649_v62  ;;  %v5620_v62 = vld [vmem:[#allocation2 + $0x18] sm:$0xff] }
 0xc28   : > { %5159 = vmatprep.subr.bf16.mxu0 %v5799_v53 }
 0xc29   : > { %v5499_v16 = vpop.eup %5498 }
 0xc2a   : > { %v5501_v52 = vpop.eup %5500  ;;  %v2640_v0 = vmul.f32 %v5499_v16, %v6735_v61 }
 0xc2b   : > { %5160 = vmatpush3.bf16.msra.mxu0 %v2651_v11  ;;  %v2638_v60 = vmul.f32 %v5501_v52, %v6731_v38  ;;  %v5622_v52 = vld [vmem:[#allocation2 + $0x28] sm:$0xff] }
 0xc2c   : > { %5161 = vmatprep.subr.bf16.mxu0 %v5799_v53 }
 0xc2d   : > { %v2646_v56 = vpack.c.bf16 %v2640_v0, %v2638_v60 }
 0xc53   : > { %v2632_v6 = vpop.xlane.xlu1 %2631 }
 0xc54   : > { %5502 = vrcp.f32 %v2632_v6 }
 0xc55   : > { %5504 = vrcp.f32 %v2629_v49 }
 0xc57   : > { %v2653_v42 = vpop.permute.xlu1 %2652 }
 0xc58   : > { %5162 = vmatpush3.bf16.msra.mxu0 %v2653_v42 }
 0xc5b   : > { %5164 = vmatmul.mubr.msk.bf16.vlgmr.msra.gmra.mrb[72].mxu0 %vm1633_vm6, %v2645_v59 }
 0xc5c   : > { %5167 = vmatprep.mubr.msk.bf16.mxu0 %vm5801_vm4, %v5799_v53 }
 0xc5e   : > { %v5503_v19 = vpop.eup %5502 }
 0xc5f   : > { %v5505_v18 = vpop.eup %5504  ;;  %v2644_v17 = vmul.f32 %v5503_v19, %v5493_v55  ;;  %v5320_v19 = vld [vmem:[%s6106_s27 + $0x4] ss:$16 sps:$4 sm:$0xff]  }
 0xc60   : > { %v2642_v58 = vmul.f32 %v5505_v18, %v6739_v22  ;;  %v5321_v18 = vld [vmem:[%s6106_s27 + $0x8] ss:$16 sps:$4 sm:$0xff]   ;;  %3138 = vmatprep.subr.bf16.mxu0 %v5320_v19  ;;  %v5360_v19 = vld [vmem:[%s6106_s27 + $0xe0] ss:$16 sps:$4 sm:$0xff]  }
 0xc62   : > { %v2647_v1 = vpack.c.bf16 %v2644_v17, %v2642_v58  ;;  %v5323_v17 = vld [vmem:[%s6106_s27 + $0xc] ss:$16 sps:$4 sm:$0xff]  }
 0xc63   : > { %5168 = vmatmul.mubr.msk.bf16.gmra.mrb[76].mxu0 %vm1633_vm6, %v2646_v56  ;;  %v5318_v56 = vld [vmem:[%s6106_s27] ss:$16 sps:$4 sm:$0xff]   ;;  %v5329_v58 = vld [vmem:[%s6106_s27 + $0x2c] ss:$16 sps:$4 sm:$0xff]   ;;  %3201 = vmatprep.subr.bf16.mxu1 %v5323_v17 }
 0xc64   : > { %5171 = vmatprep.mubr.msk.bf16.mxu0 %vm5801_vm4, %v5799_v53  ;;  %3139 = vmatpush1.bf16.msra.mxu0 %v5318_v56  ;;  %v5365_v56 = vld [vmem:[%s6106_s27 + $0xec] ss:$16 sps:$4 sm:$0xff]  }
 0xc6b   : > { %5172 = vmatmul.mubr.msk.bf16.gmra.mrb[80].mxu0 %vm1633_vm6, %v2647_v1  ;;  %v5324_v1 = vld [vmem:[%s6106_s27 + $0x20] ss:$16 sps:$4 sm:$0xff]  }
 0xc6c   : > { %3170 = vmatprep.mubr.bf16.mxu0 %v5800_v34 }
 0xd2e   : > { %v2700_v8 = vpop.f32.mrb[72].mxu0 }
 0xd2f   : > { %v5165_v30 = vpop.f32.mrb[73].mxu0 }
 0xd30   : > { %v2703_v36 = vpop.f32.mrb[74].mxu0 }
 0xd31   : > { %v2723_v38 = vpack.c.bf16 %v2703_v36, %v2700_v8  ;;  %v5166_v47 = vpop.f32.mrb[75].mxu0  ;;  %v5327_v8 = vld [vmem:[%s6106_s27 + $0x28] ss:$16 sps:$4 sm:$0xff]  }
 0xd33   : > { %5180 = vmatmul.mubr.msk.bf16.vlgmr.msra.gmra.mrb[72].mxu1 %vm1557_vm5, %v2723_v38 }
 0xd34   : > { %5183 = vmatprep.mubr.msk.bf16.mxu1 %vm5801_vm4, %v5799_v53  ;;  %3202 = vmatpush1.bf16.msra.mxu1 %v5321_v18  ;;  %v5363_v18 = vld [vmem:[%s6106_s27 + $0xe8] ss:$16 sps:$4 sm:$0xff]  }
 0xd35   : > { %3203 = vmatprep.subr.bf16.mxu1 %v5329_v58 }
 0xd36   : > { %v2708_v61 = vpop.f32.mrb[76].mxu0 }
 0xd37   : > { %v5169_v31 = vpop.f32.mrb[77].mxu0 }
 0xd38   : > { %v2711_v45 = vpop.f32.mrb[78].mxu0  ;;  %3204 = vmatpush1.bf16.msra.mxu1 %v5327_v8 }
 0xd39   : > { %v2724_v22 = vpack.c.bf16 %v2711_v45, %v2708_v61  ;;  %v5170_v32 = vpop.f32.mrb[79].mxu0 }
 0xd3b   : > { %5184 = vmatmul.mubr.msk.bf16.gmra.mrb[76].mxu1 %vm1557_vm5, %v2724_v22 }
 0xd3c   : > { %5187 = vmatprep.mubr.msk.bf16.mxu1 %vm5801_vm4, %v5799_v53  ;;  %v5617_v53 = vld [vmem:[#allocation2] sm:$0xff] }
 0xd3e   : > { %v2716_v28 = vpop.f32.mrb[80].mxu0 }
 0xd3f   : > { %v5173_v20 = vpop.f32.mrb[81].mxu0 }
 0xd40   : > { %v2719_v2 = vpop.f32.mrb[82].mxu0 }
 0xd41   : > { %v2725_v10 = vpack.c.bf16 %v2719_v2, %v2716_v28  ;;  %v5174_v51 = vpop.f32.mrb[83].mxu0 }
 0xd43   : > { %5188 = vmatmul.mubr.msk.bf16.gmra.mrb[80].mxu1 %vm1557_vm5, %v2725_v10 }
 0xd44   : > { %3233 = vmatprep.mubr.bf16.mxu1 %v5800_v34 }
 0xe06   : > { %v2781_v15 = vpop.f32.mrb[72].mxu1 }
 0xe07   : > { %v2804_v44 = vadd.f32 %v2781_v15, %v6744_v35  ;;  %v5181_v54 = vpop.f32.mrb[73].mxu1 }
 0xe08   : > { %v2784_v41 = vpop.f32.mrb[74].mxu1 }
 0xe09   : > { %v2810_v25 = vadd.f32 %v5617_v53, %v2804_v44  ;;  %v2805_v33 = vadd.f32 %v2784_v41, %v6747_v9  ;;  %v5182_v57 = vpop.f32.mrb[75].mxu1 }
 0xe0b   : > { %v2811_v55 = vadd.f32 %v5618_v50, %v2805_v33  ;;  %v6802_v4 = vadd.f32 %v4664_v5, %v2810_v25  ;;  %v5332_v50 = vld [vmem:[%s6106_s27 + $0x44] ss:$16 sps:$4 sm:$0xff]  }
 0xe0d   : > { %7793 = vst [vmem:[#allocation16_spill] sm:$0xff] %v6802_v4  ;;  %2831 = vadd.xlane.f32.xlu1 %v6802_v4  ;;  %v6805_v46 = vadd.f32 %v4664_v5, %v2811_v55  ;;  %v5335_v55 = vld [vmem:[%s6106_s27 + $0x4c] ss:$16 sps:$4 sm:$0xff]  }
 0xe0e   : > { %v2789_v35 = vpop.f32.mrb[76].mxu1  ;;  %3205 = vmatprep.subr.bf16.mxu1 %v5335_v55  ;;  %v4666_v55 = vld [vmem:[%s7800_s30] ss:$0 sm:$0xff] }
 0xe0f   : > { %7794 = vst [vmem:[#allocation17_spill] sm:$0xff] %v6805_v46  ;;  %v2806_v63 = vadd.f32 %v2789_v35, %v6752_v40  ;;  %2833 = vadd.xlane.f32.xlu0 %v6805_v46  ;;  %v5185_v27 = vpop.f32.mrb[77].mxu1  ;;  %v5330_v35 = vld [vmem:[%s6106_s27 + $0x40] ss:$16 sps:$4 sm:$0xff]  }
 0xe10   : > { %v2792_v29 = vpop.f32.mrb[78].mxu1 }
 0xe11   : > { %v2812_v49 = vadd.f32 %v5619_v7, %v2806_v63  ;;  %v2807_v9 = vadd.f32 %v2792_v29, %v6755_v37  ;;  %v5186_v14 = vpop.f32.mrb[79].mxu1  ;;  %v5621_v37 = vld [vmem:[#allocation2 + $0x20] sm:$0xff]  ;;  %v5333_v63 = vld [vmem:[%s6106_s27 + $0x48] ss:$16 sps:$4 sm:$0xff]   ;;  %v5341_v7 = vld [vmem:[%s6106_s27 + $0x6c] ss:$16 sps:$4 sm:$0xff]  }
 0xe12   : > { %3206 = vmatpush1.bf16.msra.mxu1 %v5333_v63  ;;  %v5338_v29 = vld [vmem:[%s6106_s27 + $0x64] ss:$16 sps:$4 sm:$0xff]  }
 0xe13   : > { %v2813_v11 = vadd.f32 %v5620_v62, %v2807_v9  ;;  %v6810_v21 = vadd.f32 %v4664_v5, %v2812_v49  ;;  %v5336_v49 = vld [vmem:[%s6106_s27 + $0x60] ss:$16 sps:$4 sm:$0xff]   ;;  %v5339_v9 = vld [vmem:[%s6106_s27 + $0x68] ss:$16 sps:$4 sm:$0xff]   ;;  %3207 = vmatprep.subr.bf16.mxu1 %v5341_v7  ;;  %v5344_v14 = vld [vmem:[%s6106_s27 + $0x84] ss:$16 sps:$4 sm:$0xff]  }
 0xe14   : > { %v5347_v62 = vld [vmem:[%s6106_s27 + $0x8c] ss:$16 sps:$4 sm:$0xff]  }
 0xe15   : > { %7795 = vst [vmem:[#allocation18_spill] sm:$0xff] %v6810_v21  ;;  %2835 = vadd.xlane.f32.xlu0 %v6810_v21  ;;  %v6814_v3 = vadd.f32 %v4664_v5, %v2813_v11  ;;  %v5342_v11 = vld [vmem:[%s6106_s27 + $0x80] ss:$16 sps:$4 sm:$0xff]  }
 0xe16   : > { %v2797_v6 = vpop.f32.mrb[80].mxu1  ;;  %3208 = vmatpush1.bf16.msra.mxu1 %v5339_v9 }
 0xe17   : > { %v2808_v13 = vadd.f32 %v2797_v6, %v6760_v43  ;;  %v5189_v40 = vpop.f32.mrb[81].mxu1  ;;  %7796 = vst [vmem:[#allocation19_spill] sm:$0xff] %v6814_v3  ;;  %v5345_v6 = vld [vmem:[%s6106_s27 + $0x88] ss:$16 sps:$4 sm:$0xff]   ;;  %3209 = vmatprep.subr.bf16.mxu1 %v5347_v62 }
 0xe18   : > { %v2800_v39 = vpop.f32.mrb[82].mxu1  ;;  %v5353_v40 = vld [vmem:[%s6106_s27 + $0xac] ss:$16 sps:$4 sm:$0xff]  }
 0xe19   : > { %v2814_v42 = vadd.f32 %v5621_v37, %v2808_v13  ;;  %v2809_v59 = vadd.f32 %v2800_v39, %v6764_v48  ;;  %2837 = vadd.xlane.f32.xlu0 %v6814_v3  ;;  %v5190_v16 = vpop.f32.mrb[83].mxu1  ;;  %v5326_v48 = vld [vmem:[%s6106_s27 + $0x24] ss:$16 sps:$4 sm:$0xff]   ;;  %v5348_v39 = vld [vmem:[%s6106_s27 + $0xa0] ss:$16 sps:$4 sm:$0xff]  }
 0xe1a   : > { %3140 = vmatprep.subr.bf16.mxu0 %v5326_v48  ;;  %3210 = vmatpush1.bf16.msra.mxu1 %v5345_v6  ;;  %v5350_v13 = vld [vmem:[%s6106_s27 + $0xa4] ss:$16 sps:$4 sm:$0xff]   ;;  %v5351_v37 = vld [vmem:[%s6106_s27 + $0xa8] ss:$16 sps:$4 sm:$0xff]   ;;  %v5354_v16 = vld [vmem:[%s6106_s27 + $0xc0] ss:$16 sps:$4 sm:$0xff]  }
 0xe1b   : > { %v2815_v0 = vadd.f32 %v5622_v52, %v2809_v59  ;;  %v6818_v43 = vadd.f32 %v4664_v5, %v2814_v42  ;;  %3141 = vmatpush1.bf16.msra.mxu0 %v5324_v1  ;;  %3211 = vmatprep.subr.bf16.mxu1 %v5353_v40  ;;  %v5356_v42 = vld [vmem:[%s6106_s27 + $0xc4] ss:$16 sps:$4 sm:$0xff]   ;;  %v5359_v59 = vld [vmem:[%s6106_s27 + $0xcc] ss:$16 sps:$4 sm:$0xff]   ;;  %v5357_v52 = vld [vmem:[%s6106_s27 + $0xc8] ss:$16 sps:$4 sm:$0xff]  }
 0xe1c   : > { %3142 = vmatprep.subr.bf16.mxu0 %v5332_v50 }
 0xe1d   : > { %7797 = vst [vmem:[#allocation20_spill] sm:$0xff] %v6818_v43  ;;  %2839 = vadd.xlane.f32.xlu1 %v6818_v43  ;;  %v6821_v60 = vadd.f32 %v4664_v5, %v2815_v0  ;;  %v5362_v0 = vld [vmem:[%s6106_s27 + $0xe4] ss:$16 sps:$4 sm:$0xff]  }
 0xe1e   : > { %3212 = vmatpush1.bf16.msra.mxu1 %v5351_v37 }
 0xe1f   : > { %7798 = vst [vmem:[#allocation21_spill] sm:$0xff] %v6821_v60  ;;  %2841 = vadd.xlane.f32.xlu0 %v6821_v60  ;;  %3143 = vmatpush1.bf16.msra.mxu0 %v5330_v35 }
 0xe20   : > { %3144 = vmatprep.subr.bf16.mxu0 %v5338_v29  ;;  %3213 = vmatprep.subr.bf16.mxu1 %v5359_v59 }
 0xe22   : > { %3214 = vmatpush1.bf16.msra.mxu1 %v5357_v52 }
 0xe23   : > { %3145 = vmatpush1.bf16.msra.mxu0 %v5336_v49  ;;  %3215 = vmatprep.subr.bf16.mxu1 %v5365_v56 }
 0xe24   : > { %3146 = vmatprep.subr.bf16.mxu0 %v5344_v14 }
 0xe26   : > { %3216 = vmatpush1.bf16.msra.mxu1 %v5363_v18 }
 0xe27   : > { %3147 = vmatpush1.bf16.msra.mxu0 %v5342_v11 }
 0xe28   : > { %3148 = vmatprep.subr.bf16.mxu0 %v5350_v13 }
 0xe2b   : > { %3149 = vmatpush1.bf16.msra.mxu0 %v5348_v39 }
 0xe2c   : > { %3150 = vmatprep.subr.bf16.mxu0 %v5356_v42 }
 0xe2f   : > { %3151 = vmatpush1.bf16.msra.mxu0 %v5354_v16 }
 0xe30   : > { %3152 = vmatprep.subr.bf16.mxu0 %v5362_v0  ;;  %v2956_v0 = vld [vmem:[%s6152_s4] sm:$0xf] }
 0xe31   : > { %v6910_v56 = vrot.slane %v2956_v0, %v1274_v23 }
 0xe33   : > { %3153 = vmatpush1.bf16.msra.mxu0 %v5360_v19  ;;  %v6918_v19 = vrot.slane %v2956_v0, %v1278_v26 }
 0xe9a   : > { %v2832_v30 = vpop.xlane.xlu1 %2831 }
 0xe9b   : > { %v2843_v36 = vmul.f32 0.0078125, %v2832_v30 }
 0xe9c   : > { %v2834_v38 = vpop.xlane.xlu0 %2833 }
 0xe9d   : > { %v6833_v47 = vsub.f32 %v6802_v4, %v2843_v36  ;;  %v2844_v61 = vmul.f32 0.0078125, %v2834_v38  ;;  %v5383_v4 = vld [vmem:[%s6158_s5 + $0xe0] sm:$0xff]  }
 0xe9f   : > { %v6836_v31 = vsub.f32 %v6805_v46, %v2844_v61  ;;  %v2855_v45 = vmul.f32 %v6833_v47, %v6833_v47  ;;  %v5382_v46 = vld [vmem:[%s6158_s5 + $0x60] sm:$0xff]  }
 0xea1   : > { %2861 = vadd.xlane.f32.xlu1 %v2855_v45  ;;  %v2856_v22 = vmul.f32 %v6836_v31, %v6836_v31 }
 0xea2   : > { %v2836_v32 = vpop.xlane.xlu0 %2835 }
 0xea3   : > { %v2845_v28 = vmul.f32 0.0078125, %v2836_v32  ;;  %2863 = vadd.xlane.f32.xlu0 %v2856_v22 }
 0xea5   : > { %v6843_v20 = vsub.f32 %v6810_v21, %v2845_v28  ;;  %v4665_v28 = vld [vmem:[%s7799_s22] ss:$0 sm:$0xff] }
 0xea6   : > { %v2838_v2 = vpop.xlane.xlu0 %2837 }
 0xea7   : > { %v2846_v10 = vmul.f32 0.0078125, %v2838_v2  ;;  %v2857_v51 = vmul.f32 %v6843_v20, %v6843_v20 }
 0xea9   : > { %v6848_v15 = vsub.f32 %v6814_v3, %v2846_v10  ;;  %2865 = vadd.xlane.f32.xlu1 %v2857_v51 }
 0xeaa   : > { %v2840_v44 = vpop.xlane.xlu1 %2839 }
 0xeab   : > { %v2847_v54 = vmul.f32 0.0078125, %v2840_v44  ;;  %v2858_v41 = vmul.f32 %v6848_v15, %v6848_v15 }
 0xeac   : > { %v2842_v5 = vpop.xlane.xlu0 %2841 }
 0xead   : > { %v6853_v53 = vsub.f32 %v6818_v43, %v2847_v54  ;;  %v2848_v25 = vmul.f32 0.0078125, %v2842_v5  ;;  %2867 = vadd.xlane.f32.xlu0 %v2858_v41 }
 0xeaf   : > { %v6856_v33 = vsub.f32 %v6821_v60, %v2848_v25  ;;  %v2859_v57 = vmul.f32 %v6853_v53, %v6853_v53 }
 0xeb1   : > { %2869 = vadd.xlane.f32.xlu1 %v2859_v57  ;;  %v2860_v27 = vmul.f32 %v6856_v33, %v6856_v33 }
 0xeb3   : > { %2871 = vadd.xlane.f32.xlu0 %v2860_v27 }
 0xf2e   : > { %v2862_v17 = vpop.xlane.xlu1 %2861 }
 0xf2f   : > { %v2873_v48 = vmul.f32 0.0078125, %v2862_v17 }
 0xf30   : > { %v2864_v58 = vpop.xlane.xlu0 %2863 }
 0xf31   : > { %v2879_v1 = vadd.f32 1e-05, %v2873_v48  ;;  %v2874_v8 = vmul.f32 0.0078125, %v2864_v58 }
 0xf33   : > { %5506 = vrsqrt.f32 %v2879_v1  ;;  %v2880_v30 = vadd.f32 1e-05, %v2874_v8 }
 0xf35   : > { %5508 = vrsqrt.f32 %v2880_v30 }
 0xf36   : > { %v2866_v36 = vpop.xlane.xlu1 %2865 }
 0xf37   : > { %v2875_v38 = vmul.f32 0.0078125, %v2866_v36 }
 0xf39   : > { %v2881_v61 = vadd.f32 1e-05, %v2875_v38 }
 0xf3a   : > { %v2868_v45 = vpop.xlane.xlu0 %2867 }
 0xf3b   : > { %5510 = vrsqrt.f32 %v2881_v61  ;;  %v2876_v22 = vmul.f32 0.0078125, %v2868_v45 }
 0xf3d   : > { %v5507_v32 = vpop.eup %5506  ;;  %v2882_v2 = vadd.f32 1e-05, %v2876_v22 }
 0xf3e   : > { %v2891_v10 = vmul.f32 %v5507_v32, %v6833_v47  ;;  %v2870_v51 = vpop.xlane.xlu1 %2869 }
 0xf3f   : > { %v5509_v44 = vpop.eup %5508  ;;  %5512 = vrsqrt.f32 %v2882_v2  ;;  %v2877_v54 = vmul.f32 0.0078125, %v2870_v51 }
 0xf40   : > { %v2903_v41 = vmul.f32 %v4665_v28, %v2891_v10  ;;  %v2892_v5 = vmul.f32 %v5509_v44, %v6836_v31  ;;  %v2872_v25 = vpop.xlane.xlu0 %2871 }
 0xf41   : > { %v2883_v57 = vadd.f32 1e-05, %v2877_v54  ;;  %v2878_v50 = vmul.f32 0.0078125, %v2872_v25 }
 0xf42   : > { %v2904_v35 = vmul.f32 %v4665_v28, %v2892_v5  ;;  %v2915_v27 = vadd.f32 %v4666_v55, %v2903_v41 }
 0xf43   : > { %5514 = vrsqrt.f32 %v2883_v57  ;;  %v2884_v63 = vadd.f32 1e-05, %v2878_v50  ;;  %v5366_v57 = vld [vmem:[%s6158_s5 + $0x40] sm:$0xff]  }
 0xf44   : > { %v2916_v47 = vadd.f32 %v4666_v55, %v2904_v35  ;;  %v5367_v50 = vld [vmem:[%s6158_s5 + $0xc0] sm:$0xff]   ;;  %4875 = vmatprep.subr.bf16.mxu0 %v5366_v57 }
 0xf45   : > { %v5511_v29 = vpop.eup %5510  ;;  %5516 = vrsqrt.f32 %v2884_v63  ;;  %v5368_v63 = vld [vmem:[%s6158_s5] sm:$0xff]   ;;  %4909 = vmatprep.subr.bf16.mxu1 %v5367_v50 }
 0xf46   : > { %v2953_v7 = vpack.c.bf16 %v2916_v47, %v2915_v27  ;;  %v2893_v49 = vmul.f32 %v5511_v29, %v6843_v20  ;;  %v5369_v27 = vld [vmem:[%s6158_s5 + $0x80] sm:$0xff]  }
 0xf48   : > { %3171 = vmatmul.mubr.bf16.vlgmr.msra.gmra.mrb[84].mxu0 %v2953_v7  ;;  %3234 = vmatmul.mubr.bf16.vlgmr.msra.gmra.mrb[84].mxu1 %v2953_v7  ;;  %v2905_v14 = vmul.f32 %v4665_v28, %v2893_v49 }
 0xf49   : > { %v5513_v31 = vpop.eup %5512  ;;  %3180 = vmatprep.mubr.bf16.mxu0 %v5800_v34  ;;  %3243 = vmatprep.mubr.bf16.mxu1 %v5800_v34 }
 0xf4a   : > { %v2894_v9 = vmul.f32 %v5513_v31, %v6848_v15  ;;  %v2917_v6 = vadd.f32 %v4666_v55, %v2905_v14  ;;  %4876 = vmatpush3.bf16.msra.mxu0 %v5368_v63  ;;  %4910 = vmatpush3.bf16.msra.mxu1 %v5369_v27 }
 0xf4c   : > { %v2906_v62 = vmul.f32 %v4665_v28, %v2894_v9 }
 0xf4d   : > { %v5515_v11 = vpop.eup %5514 }
 0xf4e   : > { %v2918_v13 = vadd.f32 %v4666_v55, %v2906_v62  ;;  %v2895_v40 = vmul.f32 %v5515_v11, %v6853_v53  ;;  %v2972_v53 = vsub.s32 3, %v6296_v12 }
 0xf4f   : > { %v5517_v39 = vpop.eup %5516 }
 0xf50   : > { %v2954_v37 = vpack.c.bf16 %v2918_v13, %v2917_v6  ;;  %v2896_v20 = vmul.f32 %v5517_v39, %v6856_v33  ;;  %v2907_v42 = vmul.f32 %v4665_v28, %v2895_v40  ;;  %v6914_v33 = vrot.slane %v2956_v0, %v1282_v24  ;;  %v5370_v39 = vld [vmem:[%s6158_s5 + $0x48] sm:$0xff]  }
 0xf51   : > { %4877 = vmatprep.subr.bf16.mxu0 %v5370_v39 }
 0xf52   : > { %3181 = vmatmul.mubr.bf16.gmra.mrb[88].mxu0 %v2954_v37  ;;  %3244 = vmatmul.mubr.bf16.gmra.mrb[88].mxu1 %v2954_v37  ;;  %v2908_v59 = vmul.f32 %v4665_v28, %v2896_v20  ;;  %v2919_v16 = vadd.f32 %v4666_v55, %v2907_v42  ;;  %v5371_v20 = vld [vmem:[%s6158_s5 + $0xc8] sm:$0xff]  }
 0xf53   : > { %3190 = vmatprep.mubr.bf16.mxu0 %v5800_v34  ;;  %3253 = vmatprep.mubr.bf16.mxu1 %v5800_v34  ;;  %v6920_v34 = vrot.slane %v2956_v0, %v2972_v53  ;;  %v5372_v42 = vld [vmem:[%s6158_s5 + $0x8] sm:$0xff]   ;;  %v5374_v53 = vld [vmem:[%s6158_s5 + $0x50] sm:$0xff]  }
 0xf54   : > { %v2920_v15 = vadd.f32 %v4666_v55, %v2908_v59  ;;  %v5373_v59 = vld [vmem:[%s6158_s5 + $0x88] sm:$0xff]   ;;  %4911 = vmatprep.subr.bf16.mxu1 %v5371_v20  ;;  %4878 = vmatpush3.bf16.msra.mxu0 %v5372_v42 }
 0xf55   : > { %4912 = vmatpush3.bf16.msra.mxu1 %v5373_v59  ;;  %4879 = vmatprep.subr.bf16.mxu0 %v5374_v53 }
 0xf56   : > { %v2955_v52 = vpack.c.bf16 %v2920_v15, %v2919_v16 }
 0xf5a   : > { %3191 = vmatmul.mubr.bf16.gmra.mrb[92].mxu0 %v2955_v52  ;;  %3254 = vmatmul.mubr.bf16.gmra.mrb[92].mxu1 %v2955_v52 }
0x101b   : > { %v3172_v18 = vpop.f32.mrb[84].mxu0  ;;  %v3235_v17 = vpop.f32.mrb[84].mxu1 }
0x101c   : > { %v6923_v48 = vadd.f32 %v3172_v18, %v6910_v56  ;;  %v6926_v58 = vadd.f32 %v3235_v17, %v6914_v33  ;;  %v3174_v23 = vpop.f32.mrb[85].mxu0  ;;  %v3237_v1 = vpop.f32.mrb[85].mxu1 }
0x101d   : > { %v6929_v8 = vadd.f32 %v3174_v23, %v6918_v19  ;;  %v6932_v24 = vadd.f32 %v3237_v1, %v6920_v34  ;;  %v3176_v12 = vpop.f32.mrb[86].mxu0  ;;  %v3239_v26 = vpop.f32.mrb[86].mxu1  ;;  %v5375_v1 = vld [vmem:[%s6158_s5 + $0xd0] sm:$0xff]  }
0x101e   : > { %v6935_v30 = vmul.f32 0.70710677, %v6923_v48  ;;  %v6938_v36 = vmul.f32 0.70710677, %v6926_v58  ;;  %v3178_v5 = vpop.f32.mrb[87].mxu0  ;;  %v3241_v25 = vpop.f32.mrb[87].mxu1  ;;  %v6971_v29 = vadd.f32 %v3176_v12, %v6910_v56  ;;  %v6978_v31 = vadd.f32 %v3239_v26, %v6914_v33  ;;  %4913 = vmatprep.subr.bf16.mxu1 %v5375_v1 }
0x101f   : > { %v6941_v38 = vmul.f32 0.70710677, %v6929_v8  ;;  %v6944_v61 = vmul.f32 0.70710677, %v6932_v24  ;;  %v6988_v6 = vadd.f32 %v3178_v5, %v6918_v19  ;;  %v7005_v16 = vadd.f32 %v3241_v25, %v6920_v34  ;;  %v5376_v12 = vld [vmem:[%s6158_s5 + $0x10] sm:$0xff]  }
0x1020   : > { %v6947_v45 = vand.u32 2147483647, %v6935_v30  ;;  %v6950_v22 = vand.u32 2147483647, %v6938_v36  ;;  %v6985_v11 = vmul.f32 0.70710677, %v6971_v29  ;;  %4880 = vmatpush3.bf16.msra.mxu0 %v5376_v12 }
0x1021   : > { %v6953_v32 = vand.u32 2147483647, %v6941_v38  ;;  %v6956_v28 = vand.u32 2147483647, %v6944_v61  ;;  %v6996_v37 = vmul.f32 0.70710677, %v6978_v31 }
0x1022   : > { %v3336_v2 = vmul.f32 0.3275911, %v6947_v45  ;;  %v3338_v10 = vmul.f32 0.3275911, %v6950_v22  ;;  %v7002_v15 = vand.u32 2147483647, %v6985_v11 }
0x1023   : > { %v3337_v51 = vmul.f32 0.3275911, %v6953_v32  ;;  %v3339_v44 = vmul.f32 0.3275911, %v6956_v28  ;;  %v7008_v52 = vand.u32 2147483647, %v6996_v37 }
0x1024   : > { %v3360_v54 = vadd.f32 1.0, %v3336_v2  ;;  %v3362_v41 = vadd.f32 1.0, %v3338_v10  ;;  %v7011_v0 = vmul.f32 0.70710677, %v6988_v6  ;;  %v3648_v18 = vsub.f32 0.0, %v6947_v45  ;;  %v5378_v12 = vld [vmem:[%s6158_s5 + $0x58] sm:$0xff]  }
0x1025   : > { %v6964_v55 = vpop.f32.mrb[88].mxu0  ;;  %v6966_v35 = vpop.f32.mrb[88].mxu1  ;;  %v3361_v47 = vadd.f32 1.0, %v3337_v51  ;;  %v3363_v62 = vadd.f32 1.0, %v3339_v44  ;;  %v3650_v17 = vsub.f32 0.0, %v6950_v22  ;;  %v3652_v59 = vsub.f32 0.0, %v7002_v15  ;;  %4881 = vmatprep.subr.bf16.mxu0 %v5378_v12 }
0x1026   : > { %5518 = vrcp.f32 %v3360_v54  ;;  %v6973_v7 = vpop.f32.mrb[89].mxu0  ;;  %v6975_v49 = vpop.f32.mrb[89].mxu1  ;;  %v3340_v23 = vmul.f32 0.3275911, %v7002_v15  ;;  %v3342_v26 = vmul.f32 0.3275911, %v7008_v52  ;;  %v3672_v27 = vmul.f32 %v3648_v18, %v6947_v45 }
0x1027   : > { %5520 = vrcp.f32 %v3362_v41  ;;  %v6980_v9 = vpop.f32.mrb[90].mxu0  ;;  %v6982_v14 = vpop.f32.mrb[90].mxu1  ;;  %v7021_v2 = vand.u32 2147483647, %v7011_v0  ;;  %v7026_v44 = vmul.f32 0.70710677, %v7005_v16 }
0x1028   : > { %v6990_v13 = vpop.f32.mrb[91].mxu0  ;;  %v6992_v40 = vpop.f32.mrb[91].mxu1  ;;  %5522 = vrcp.f32 %v3361_v47  ;;  %v3364_v51 = vadd.f32 1.0, %v3340_v23  ;;  %v3366_v5 = vadd.f32 1.0, %v3342_v26  ;;  %v3674_v47 = vmul.f32 %v3650_v17, %v6950_v22  ;;  %v5377_v23 = vld [vmem:[%s6158_s5 + $0x90] sm:$0xff]   ;;  %v5379_v26 = vld [vmem:[%s6158_s5 + $0xd8] sm:$0xff]  }
0x1029   : > { %7801 = vst [vmem:[#allocation22_spill] sm:$0xff] %v6992_v40  ;;  %5524 = vrcp.f32 %v3363_v62  ;;  %7803 = vst [vmem:[#allocation24_spill] sm:$0xff] %v7026_v44  ;;  %v3341_v25 = vmul.f32 0.3275911, %v7021_v2  ;;  %v7042_v62 = vand.u32 2147483647, %v7026_v44  ;;  %4914 = vmatpush3.bf16.msra.mxu1 %v5377_v23 }
0x102a   : > { %5526 = vrcp.f32 %v3364_v51  ;;  %v5380_v51 = vld [vmem:[%s6158_s5 + $0x18] sm:$0xff]   ;;  %v3700_v21 = vmul.f32 1.442695, %v3674_v47  ;;  %4915 = vmatprep.subr.bf16.mxu1 %v5379_v26  ;;  %v5384_v47 = vld [vmem:[%s6158_s5 + $0x20] sm:$0xff]   ;;  %v5387_v26 = vld [vmem:[%s6158_s5 + $0xe8] sm:$0xff]   ;;  %vm3792_vm7 = vcmp.lt.f32.partialorder %v6935_v30, 0.0 }
0x102b   : > { %5528 = vrcp.f32 %v3366_v5  ;;  %v3365_v45 = vadd.f32 1.0, %v3341_v25  ;;  %v3343_v18 = vmul.f32 0.3275911, %v7042_v62  ;;  %v3696_v5 = vmul.f32 1.442695, %v3672_v27  ;;  %v5381_v25 = vld [vmem:[%s6158_s5 + $0x98] sm:$0xff]   ;;  %4882 = vmatpush3.bf16.msra.mxu0 %v5380_v51 }
0x102c   : > { %v3654_v27 = vsub.f32 0.0, %v7008_v52  ;;  %4883 = vmatprep.subr.bf16.mxu0 %v5382_v46  ;;  %vm3794_vm8 = vcmp.lt.f32.partialorder %v6938_v36, 0.0  ;;  %vm3796_vm9 = vcmp.lt.f32.partialorder %v6985_v11, 0.0  ;;  %vm3798_vm10 = vcmp.lt.f32.partialorder %v6996_v37, 0.0 }
0x102d   : > { %v7023_v10 = vpop.f32.mrb[92].mxu0  ;;  %v7028_v54 = vpop.f32.mrb[92].mxu1  ;;  %5530 = vrcp.f32 %v3365_v45  ;;  %v7073_v45 = vadd.f32 %v6964_v55, %v6910_v56  ;;  %4916 = vmatpush3.bf16.msra.mxu1 %v5381_v25  ;;  %v5386_v55 = vld [vmem:[%s6158_s5 + $0x68] sm:$0xff]   ;;  %vm3793_vm11 = vcmp.lt.f32.partialorder %v6941_v38, 0.0  ;;  %vm3795_vm12 = vcmp.lt.f32.partialorder %v6944_v61, 0.0 }
0x102e   : > { %7802 = vst [vmem:[#allocation23_spill] sm:$0xff] %v7023_v10  ;;  %7804 = vst [vmem:[#allocation25_spill] sm:$0xff] %v7028_v54  ;;  %v7030_v41 = vpop.f32.mrb[93].mxu0  ;;  %v7033_v57 = vpop.f32.mrb[93].mxu1  ;;  %5532 = vpow2.f32 %v3696_v5  ;;  %4917 = vmatprep.subr.bf16.mxu1 %v5383_v4  ;;  %v5388_v5 = vld [vmem:[%s6158_s5 + $0x28] sm:$0xff]   ;;  %v5396_v10 = vld [vmem:[%s6158_s5 + $0x38] sm:$0xff]  }
0x102f   : > { %7805 = vst [vmem:[#allocation26_spill] sm:$0xff] %v7030_v41  ;;  %7806 = vst [vmem:[#allocation27_spill] sm:$0xff] %v7033_v57  ;;  %v7035_v50 = vpop.f32.mrb[94].mxu0  ;;  %v7044_v39 = vpop.f32.mrb[94].mxu1  ;;  %5534 = vpow2.f32 %v3700_v21  ;;  %4884 = vmatpush3.bf16.msra.mxu0 %v5384_v47  ;;  %v5391_v57 = vld [vmem:[%s6158_s5 + $0xf0] sm:$0xff]   ;;  %vm3797_vm13 = vcmp.lt.f32.partialorder %v7011_v0, 0.0 }
0x1030   : > { %7807 = vst [vmem:[#allocation28_spill] sm:$0xff] %v7035_v50  ;;  %v7037_v63 = vpop.eup %5518  ;;  %7808 = vst [vmem:[#allocation29_spill] sm:$0xff] %v7044_v39  ;;  %v7050_v53 = vpop.f32.mrb[95].mxu0  ;;  %4885 = vmatprep.subr.bf16.mxu0 %v5386_v55 }
0x1031   : > { %v7046_v20 = vpop.eup %5520  ;;  %v3432_v42 = vmul.f32 1.0614054, %v7037_v63  ;;  %7809 = vst [vmem:[#allocation30_spill] sm:$0xff] %v7050_v53  ;;  %v7054_v17 = vpop.f32.mrb[95].mxu1  ;;  %v3676_v53 = vmul.f32 %v3652_v59, %v7002_v15  ;;  %v5385_v15 = vld [vmem:[%s6158_s5 + $0xa0] sm:$0xff]  }
0x1032   : > { %v3434_v22 = vmul.f32 1.0614054, %v7046_v20  ;;  %7810 = vst [vmem:[#allocation31_spill] sm:$0xff] %v7054_v17  ;;  %v7060_v60 = vpop.eup %5522  ;;  %4918 = vmatpush3.bf16.msra.mxu1 %v5385_v15  ;;  %v3649_v15 = vsub.f32 0.0, %v6953_v32 }
0x1033   : > { %v4699_v1 = vadd.f32 -1.4531521, %v3432_v42  ;;  %v7066_v42 = vpop.eup %5524  ;;  %v3433_v23 = vmul.f32 1.0614054, %v7060_v60  ;;  %v3704_v46 = vmul.f32 1.442695, %v3676_v53  ;;  %4919 = vmatprep.subr.bf16.mxu1 %v5387_v26  ;;  %4886 = vmatpush3.bf16.msra.mxu0 %v5388_v5 }
0x1034   : > { %v4701_v43 = vadd.f32 -1.4531521, %v3434_v22  ;;  %v3435_v12 = vmul.f32 1.0614054, %v7066_v42  ;;  %v7082_v51 = vpop.eup %5526  ;;  %v5394_v26 = vld [vmem:[%s6158_s5 + $0x78] sm:$0xff]  }
0x1035   : > { %v3480_v3 = vmul.f32 %v7037_v63, %v4699_v1  ;;  %v3367_v1 = vadd.f32 1.0, %v3343_v18  ;;  %v3678_v18 = vmul.f32 %v3654_v27, %v7008_v52  ;;  %v7090_v21 = vpop.eup %5528  ;;  %v4700_v25 = vadd.f32 -1.4531521, %v3433_v23  ;;  %v5389_v52 = vld [vmem:[%s6158_s5 + $0xa8] sm:$0xff]   ;;  %v5390_v27 = vld [vmem:[%s6158_s5 + $0x70] sm:$0xff]  }
0x1036   : > { %v3482_v17 = vmul.f32 %v7046_v20, %v4701_v43  ;;  %v3438_v53 = vmul.f32 1.0614054, %v7090_v21  ;;  %v4702_v47 = vadd.f32 -1.4531521, %v3435_v12  ;;  %4887 = vmatprep.subr.bf16.mxu0 %v5390_v27  ;;  %4920 = vmatpush3.bf16.msra.mxu1 %v5389_v52  ;;  %v5395_v27 = vld [vmem:[%s6158_s5 + $0xf8] sm:$0xff]  }
0x1037   : > { %v3504_v22 = vadd.f32 1.4214138, %v3480_v3  ;;  %5536 = vrcp.f32 %v3367_v1  ;;  %v3708_v55 = vmul.f32 1.442695, %v3678_v18  ;;  %v3481_v54 = vmul.f32 %v7060_v60, %v4700_v25  ;;  %4921 = vmatprep.subr.bf16.mxu1 %v5391_v57 }
0x1038   : > { %v3506_v43 = vadd.f32 1.4214138, %v3482_v17  ;;  %v7087_v17 = vmul.f32 0.70710677, %v7073_v45  ;;  %v4705_v1 = vadd.f32 -1.4531521, %v3438_v53  ;;  %v3483_v53 = vmul.f32 %v7066_v42, %v4702_v47 }
0x1039   : > { %v3528_v59 = vmul.f32 %v7037_v63, %v3504_v22  ;;  %v3436_v22 = vmul.f32 1.0614054, %v7082_v51  ;;  %5538 = vpow2.f32 %v3704_v46  ;;  %v3505_v57 = vadd.f32 1.4214138, %v3481_v54 }
0x103a   : > { %v3530_v3 = vmul.f32 %v7046_v20, %v3506_v43  ;;  %7811 = vst [vmem:[#allocation32_spill] sm:$0xff] %v7087_v17  ;;  %v7105_v12 = vand.u32 2147483647, %v7087_v17  ;;  %5540 = vpow2.f32 %v3708_v55  ;;  %v3673_v46 = vmul.f32 %v3649_v15, %v6953_v32 }
0x103b   : > { %v4723_v4 = vadd.f32 -0.28449672, %v3528_v59  ;;  %v4703_v50 = vadd.f32 -1.4531521, %v3436_v22  ;;  %v7098_v59 = vpop.eup %5530  ;;  %v7130_v55 = vmul.f32 0.5, %v6926_v58 }
0x103c   : > { %v4725_v43 = vadd.f32 -0.28449672, %v3530_v3  ;;  %v5392_v3 = vld [vmem:[%s6158_s5 + $0x30] sm:$0xff]   ;;  %v3437_v18 = vmul.f32 1.0614054, %v7098_v59  ;;  %v5533_v44 = vpop.eup %5532 }
0x103d   : > { %v3576_v39 = vmul.f32 %v7037_v63, %v4723_v4  ;;  %v3484_v4 = vmul.f32 %v7082_v51, %v4703_v50  ;;  %v3651_v50 = vsub.f32 0.0, %v6956_v28  ;;  %4888 = vmatpush3.bf16.msra.mxu0 %v5392_v3  ;;  %v5535_v52 = vpop.eup %5534  ;;  %v3507_v3 = vadd.f32 1.4214138, %v3483_v53 }
0x103e   : > { %v3578_v23 = vmul.f32 %v7046_v20, %v4725_v43  ;;  %v3486_v43 = vmul.f32 %v7090_v21, %v4705_v1  ;;  %v4704_v1 = vadd.f32 -1.4531521, %v3437_v18  ;;  %4889 = vmatprep.subr.bf16.mxu0 %v5394_v26  ;;  %v3698_v58 = vmul.f32 1.442695, %v3673_v46 }
0x103f   : > { %v3600_v41 = vadd.f32 0.2548296, %v3576_v39  ;;  %v5393_v39 = vld [vmem:[%s6158_s5 + $0xb0] sm:$0xff]   ;;  %v3508_v17 = vadd.f32 1.4214138, %v3484_v4  ;;  %v3531_v53 = vmul.f32 %v7066_v42, %v3507_v3 }
0x1040   : > { %v3602_v22 = vadd.f32 0.2548296, %v3578_v23  ;;  %v3510_v25 = vadd.f32 1.4214138, %v3486_v43  ;;  %4922 = vmatpush3.bf16.msra.mxu1 %v5393_v39  ;;  %v3675_v43 = vmul.f32 %v3651_v50, %v6956_v28  ;;  %v3485_v26 = vmul.f32 %v7098_v59, %v4704_v1 }
0x1041   : > { %v3624_v5 = vmul.f32 %v7037_v63, %v3600_v41  ;;  %v3532_v41 = vmul.f32 %v7082_v51, %v3508_v17  ;;  %v3344_v63 = vmul.f32 0.3275911, %v7105_v12  ;;  %4923 = vmatprep.subr.bf16.mxu1 %v5395_v27  ;;  %v7127_v17 = vmul.f32 0.5, %v6923_v48  ;;  %4890 = vmatpush3.bf16.msra.mxu0 %v5396_v10 }
0x1042   : > { %v3626_v23 = vmul.f32 %v7046_v20, %v3602_v22  ;;  %v3534_v4 = vmul.f32 %v7090_v21, %v3510_v25  ;;  %v5397_v20 = vld [vmem:[%s6158_s5 + $0xb8] sm:$0xff]   ;;  %v7122_v22 = vpop.eup %5536  ;;  %v3529_v28 = vmul.f32 %v7060_v60, %v3505_v57  ;;  %v3702_v50 = vmul.f32 1.442695, %v3675_v43 }
0x1043   : > { %v3744_v40 = vmul.f32 %v5533_v44, %v3624_v5  ;;  %v4727_v44 = vadd.f32 -0.28449672, %v3532_v41  ;;  %v3368_v15 = vadd.f32 1.0, %v3344_v63  ;;  %v3439_v48 = vmul.f32 1.0614054, %v7122_v22  ;;  %v5539_v41 = vpop.eup %5538 }
0x1044   : > { %v3746_v47 = vmul.f32 %v5535_v52, %v3626_v23  ;;  %v4729_v54 = vadd.f32 -0.28449672, %v3534_v4  ;;  %4924 = vmatpush3.bf16.msra.mxu1 %v5397_v20  ;;  %v3509_v23 = vadd.f32 1.4214138, %v3485_v26  ;;  %v3653_v52 = vsub.f32 0.0, %v7021_v2  ;;  %v5541_v20 = vpop.eup %5540 }
0x1045   : > { %v3768_v18 = vsub.f32 1.0, %v3744_v40  ;;  %v3580_v32 = vmul.f32 %v7082_v51, %v4727_v44  ;;  %v3268_v40 = vmul.f32 0.5, %v6971_v29  ;;  %5542 = vrcp.f32 %v3368_v15 }
0x1046   : > { %v3770_v39 = vsub.f32 1.0, %v3746_v47  ;;  %v3582_v5 = vmul.f32 %v7090_v21, %v4729_v54  ;;  %v4724_v47 = vadd.f32 -0.28449672, %v3529_v28  ;;  %v4706_v4 = vadd.f32 -1.4531521, %v3439_v48 }
0x1047   : > { %v3604_v27 = vadd.f32 0.2548296, %v3580_v32  ;;  %v3816_v25 = vsub.f32 0.0, %v3768_v18  ;;  %v4726_v46 = vadd.f32 -0.28449672, %v3531_v53  ;;  %v3270_v43 = vmul.f32 0.5, %v6978_v31 }
0x1048   : > { %v3606_v10 = vadd.f32 0.2548296, %v3582_v5  ;;  %v3818_v63 = vsub.f32 0.0, %v3770_v39  ;;  %v7147_v29 = vadd.f32 %v6966_v35, %v6914_v33  ;;  %5544 = vpow2.f32 %v3698_v58 }
0x1049   : > { %v3628_v1 = vmul.f32 %v7082_v51, %v3604_v27  ;;  %v3533_v44 = vmul.f32 %v7098_v59, %v3509_v23  ;;  %v3840_v54 = vsel %vm3792_vm7, %v3816_v25, %v3768_v18  ;;  %v3677_v26 = vmul.f32 %v3653_v52, %v7021_v2 }
0x104a   : > { %v3630_v57 = vmul.f32 %v7090_v21, %v3606_v10  ;;  %v3842_v31 = vsel %vm3794_vm8, %v3818_v63, %v3770_v39  ;;  %v3577_v35 = vmul.f32 %v7060_v60, %v4724_v47  ;;  %v3487_v15 = vmul.f32 %v7122_v22, %v4706_v4 }
0x104b   : > { %v3748_v3 = vmul.f32 %v5539_v41, %v3628_v1  ;;  %v3579_v28 = vmul.f32 %v7066_v42, %v4726_v46  ;;  %5546 = vpow2.f32 %v3702_v50  ;;  %v7161_v30 = vmul.f32 0.70710677, %v7147_v29 }
0x104c   : > { %v3750_v51 = vmul.f32 %v5541_v20, %v3630_v57  ;;  %v3864_v18 = vadd.f32 1.0, %v3840_v54  ;;  %v4728_v58 = vadd.f32 -0.28449672, %v3533_v44  ;;  %v7165_v2 = vadd.f32 %v6973_v7, %v6918_v19 }
0x104d   : > { %v3772_v21 = vsub.f32 1.0, %v3748_v3  ;;  %v3866_v36 = vadd.f32 1.0, %v3842_v31  ;;  %v3706_v53 = vmul.f32 1.442695, %v3677_v26  ;;  %v7170_v27 = vand.u32 2147483647, %v7161_v30 }
0x104e   : > { %v3774_v32 = vsub.f32 1.0, %v3750_v51  ;;  %v3601_v50 = vadd.f32 0.2548296, %v3577_v35  ;;  %v3511_v25 = vadd.f32 1.4214138, %v3487_v15  ;;  %v3655_v7 = vsub.f32 0.0, %v7042_v62 }
0x104f   : > { %v3820_v5 = vsub.f32 0.0, %v3772_v21  ;;  %v7174_v1 = vpop.eup %5542  ;;  %v3603_v52 = vadd.f32 0.2548296, %v3579_v28  ;;  %v3346_v63 = vmul.f32 0.3275911, %v7170_v27  ;;  %v7179_v11 = vmul.f32 %v3864_v18, %v7127_v17 }
0x1050   : > { %v3822_v48 = vsub.f32 0.0, %v3774_v32  ;;  %v3581_v57 = vmul.f32 %v7098_v59, %v4728_v58  ;;  %v7185_v4 = vmul.f32 0.70710677, %v7165_v2  ;;  %v7188_v37 = vmul.f32 %v3866_v36, %v7130_v55 }
0x1051   : > { %v3844_v39 = vsel %vm3796_vm9, %v3820_v5, %v3772_v21  ;;  %7812 = vst [vmem:[#allocation33_spill] sm:$0xff] %v7179_v11  ;;  %5548 = vpow2.f32 %v3706_v53  ;;  %v3370_v46 = vadd.f32 1.0, %v3346_v63  ;;  %v3625_v51 = vmul.f32 %v7060_v60, %v3601_v50  ;;  %v7824_v11 = vld [vmem:[#allocation32_spill] sm:$0xff] }
0x1052   : > { %v3868_v10 = vadd.f32 1.0, %v3844_v39  ;;  %v3846_v23 = vsel %vm3798_vm10, %v3822_v48, %v3774_v32  ;;  %7813 = vst [vmem:[#allocation34_spill] sm:$0xff] %v7188_v37  ;;  %v5545_v3 = vpop.eup %5544  ;;  %v7197_v44 = vand.u32 2147483647, %v7185_v4  ;;  %v3679_v55 = vmul.f32 %v3655_v7, %v7042_v62 }
0x1053   : > { %v3870_v41 = vadd.f32 1.0, %v3846_v23  ;;  %v3627_v21 = vmul.f32 %v7066_v42, %v3603_v52  ;;  %v3605_v26 = vadd.f32 0.2548296, %v3581_v57  ;;  %5550 = vrcp.f32 %v3370_v46 }
0x1054   : > { %v7181_v47 = vmul.f32 %v3868_v10, %v3268_v40  ;;  %v3535_v40 = vmul.f32 %v7122_v22, %v3511_v25  ;;  %v3345_v60 = vmul.f32 0.3275911, %v7197_v44  ;;  %v3745_v35 = vmul.f32 %v5545_v3, %v3625_v51 }
0x1055   : > { %v7190_v20 = vmul.f32 %v3870_v41, %v3270_v43  ;;  %v3440_v43 = vmul.f32 1.0614054, %v7174_v1  ;;  %v5547_v31 = vpop.eup %5546  ;;  %v7207_v28 = vadd.f32 %v6975_v49, %v6920_v34  ;;  %v3710_v5 = vmul.f32 1.442695, %v3679_v55 }
0x1056   : > { %v4730_v32 = vadd.f32 -0.28449672, %v3535_v40  ;;  %v3369_v15 = vadd.f32 1.0, %v3345_v60  ;;  %v7211_v62 = vadd.f32 %v6980_v9, %v6910_v56  ;;  %v7215_v42 = vadd.f32 %v6982_v14, %v6914_v33 }
0x1057   : > { %7814 = vst [vmem:[#allocation35_spill] sm:$0xff] %v7190_v20  ;;  %v4707_v18 = vadd.f32 -1.4531521, %v3440_v43  ;;  %v3747_v48 = vmul.f32 %v5547_v31, %v3627_v21  ;;  %v3629_v58 = vmul.f32 %v7098_v59, %v3605_v26  ;;  %v7219_v36 = vmul.f32 0.5, %v6929_v8 }
0x1058   : > { %5552 = vrcp.f32 %v3369_v15  ;;  %v7222_v49 = vmul.f32 0.5, %v6932_v24  ;;  %v7225_v39 = vmul.f32 0.70710677, %v7207_v28  ;;  %v7228_v9 = vmul.f32 0.70710677, %v7211_v62 }
0x1059   : > { %v3769_v53 = vsub.f32 1.0, %v3745_v35  ;;  %v3583_v14 = vmul.f32 %v7122_v22, %v4730_v32  ;;  %v3656_v50 = vsub.f32 0.0, %v7105_v12  ;;  %v7233_v59 = vmul.f32 0.70710677, %v7215_v42 }
0x105a   : > { %5554 = vpow2.f32 %v3710_v5  ;;  %v3488_v8 = vmul.f32 %v7174_v1, %v4707_v18  ;;  %v7237_v24 = vand.u32 2147483647, %v7225_v39  ;;  %v7240_v23 = vand.u32 2147483647, %v7228_v9 }
0x105b   : > { %v5549_v10 = vpop.eup %5548  ;;  %v3771_v25 = vsub.f32 1.0, %v3747_v48  ;;  %v7244_v41 = vand.u32 2147483647, %v7233_v59  ;;  %v7248_v7 = vmul.f32 0.5, %v6988_v6  ;;  %v3817_v3 = vsub.f32 0.0, %v3769_v53 }
0x105c   : > { %v3749_v52 = vmul.f32 %v5549_v10, %v3629_v58  ;;  %v3347_v63 = vmul.f32 0.3275911, %v7237_v24  ;;  %v3348_v57 = vmul.f32 0.3275911, %v7240_v23  ;;  %v3607_v51 = vadd.f32 0.2548296, %v3583_v14 }
0x105d   : > { %v7252_v46 = vpop.eup %5550  ;;  %v3680_v40 = vmul.f32 %v3656_v50, %v7105_v12  ;;  %v3350_v55 = vmul.f32 0.3275911, %v7244_v41  ;;  %v3512_v43 = vadd.f32 1.4214138, %v3488_v8  ;;  %v7259_v6 = vadd.f32 %v6990_v13, %v6918_v19 }
0x105e   : > { %v3442_v21 = vmul.f32 1.0614054, %v7252_v46  ;;  %v3371_v26 = vadd.f32 1.0, %v3347_v63  ;;  %v3819_v60 = vsub.f32 0.0, %v3771_v25  ;;  %v3773_v31 = vsub.f32 1.0, %v3749_v52  ;;  %v7816_v52 = vld [vmem:[#allocation23_spill] sm:$0xff] }
0x105f   : > { %v7262_v35 = vmul.f32 0.5, %v7005_v16  ;;  %v3372_v32 = vadd.f32 1.0, %v3348_v57  ;;  %v3374_v12 = vadd.f32 1.0, %v3350_v55  ;;  %v3631_v18 = vmul.f32 %v7122_v22, %v3607_v51  ;;  %v7815_v22 = vld [vmem:[#allocation22_spill] sm:$0xff] }
0x1060   : > { %v4709_v15 = vadd.f32 -1.4531521, %v3442_v21  ;;  %5556 = vrcp.f32 %v3371_v26  ;;  %v7269_v48 = vmul.f32 0.5, %v7073_v45  ;;  %v3712_v13 = vmul.f32 1.442695, %v3680_v40 }
0x1061   : > { %5558 = vrcp.f32 %v3372_v32  ;;  %v3841_v58 = vsel %vm3793_vm11, %v3817_v3, %v3769_v53  ;;  %v3536_v16 = vmul.f32 %v7174_v1, %v3512_v43  ;;  %v7276_v50 = vmul.f32 0.70710677, %v7259_v6 }
0x1062   : > { %v7265_v5 = vpop.eup %5552  ;;  %v3843_v10 = vsel %vm3795_vm12, %v3819_v60, %v3771_v25  ;;  %v3821_v8 = vsub.f32 0.0, %v3773_v31  ;;  %v7282_v45 = vadd.f32 %v7815_v22, %v6920_v34  ;;  %v7286_v63 = vadd.f32 %v7816_v52, %v6910_v56 }
0x1063   : > { %v3441_v14 = vmul.f32 1.0614054, %v7265_v5  ;;  %v3490_v53 = vmul.f32 %v7252_v46, %v4709_v15  ;;  %5560 = vrcp.f32 %v3374_v12  ;;  %v7290_v3 = vand.u32 2147483647, %v7276_v50 }
0x1064   : > { %7817 = vst [vmem:[#allocation22_spill] sm:$0xff] %v7286_v63  ;;  %v5555_v38 = vpop.eup %5554  ;;  %5562 = vpow2.f32 %v3712_v13  ;;  %v3658_v61 = vsub.f32 0.0, %v7170_v27  ;;  %v7294_v25 = vmul.f32 0.70710677, %v7282_v45  ;;  %v3865_v40 = vadd.f32 1.0, %v3841_v58 }
0x1065   : > { %v4708_v57 = vadd.f32 -1.4531521, %v3441_v14  ;;  %v3751_v51 = vmul.f32 %v5555_v38, %v3631_v18  ;;  %v4731_v55 = vadd.f32 -0.28449672, %v3536_v16  ;;  %v3349_v21 = vmul.f32 0.3275911, %v7290_v3 }
0x1066   : > { %v3867_v26 = vadd.f32 1.0, %v3843_v10  ;;  %v7299_v60 = vmul.f32 0.5, %v7147_v29  ;;  %v7302_v32 = vand.u32 2147483647, %v7294_v25  ;;  %v7305_v15 = vmul.f32 0.70710677, %v7286_v63 }
0x1067   : > { %v3489_v43 = vmul.f32 %v7265_v5, %v4708_v57  ;;  %v3845_v12 = vsel %vm3797_vm13, %v3821_v8, %v3773_v31  ;;  %v7819_v18 = vld [vmem:[#allocation24_spill] sm:$0xff]  ;;  %v3514_v13 = vadd.f32 1.4214138, %v3490_v53  ;;  %v3373_v16 = vadd.f32 1.0, %v3349_v21 }
0x1068   : > { %7818 = vst [vmem:[#allocation23_spill] sm:$0xff] %v7305_v15  ;;  %vm3799_vm14 = vcmp.lt.f32.partialorder %v7819_v18, 0.0  ;;  %v3775_v14 = vsub.f32 1.0, %v3751_v51  ;;  %v3682_v10 = vmul.f32 %v3658_v61, %v7170_v27  ;;  %v3351_v29 = vmul.f32 0.3275911, %v7302_v32 }
0x1069   : > { %v3513_v58 = vadd.f32 1.4214138, %v3489_v43  ;;  %v7313_v22 = vand.u32 2147483647, %v7305_v15  ;;  %v7318_v38 = vmul.f32 %v3865_v40, %v7219_v36  ;;  %v3584_v0 = vmul.f32 %v7174_v1, %v4731_v55  ;;  %v7821_v15 = vld [vmem:[#allocation25_spill] sm:$0xff] }
0x106a   : > { %v7315_v52 = vpop.eup %5556  ;;  %v3657_v31 = vsub.f32 0.0, %v7197_v44  ;;  %5564 = vrcp.f32 %v3373_v16  ;;  %v7325_v53 = vmul.f32 %v3867_v26, %v7222_v49  ;;  %v3375_v57 = vadd.f32 1.0, %v3351_v29 }
0x106b   : > { %v7322_v8 = vpop.eup %5558  ;;  %v3443_v27 = vmul.f32 1.0614054, %v7315_v52  ;;  %v3352_v51 = vmul.f32 0.3275911, %v7313_v22  ;;  %v7329_v61 = vadd.f32 1.0, %v3845_v12  ;;  %v3538_v36 = vmul.f32 %v7252_v46, %v3514_v13 }
0x106c   : > { %7820 = vst [vmem:[#allocation24_spill] sm:$0xff] %v7325_v53  ;;  %v3537_v40 = vmul.f32 %v7265_v5, %v3513_v58  ;;  %v3444_v55 = vmul.f32 1.0614054, %v7322_v8  ;;  %v3823_v43 = vsub.f32 0.0, %v3775_v14  ;;  %v3716_v21 = vmul.f32 1.442695, %v3682_v10 }
0x106d   : > { %v4710_v16 = vadd.f32 -1.4531521, %v3443_v27  ;;  %5566 = vrcp.f32 %v3375_v57  ;;  %v7334_v54 = vpop.eup %5560  ;;  %v3608_v49 = vadd.f32 0.2548296, %v3584_v0  ;;  %v3681_v26 = vmul.f32 %v3657_v31, %v7197_v44 }
0x106e   : > { %v3659_v29 = vsub.f32 0.0, %v7237_v24  ;;  %v4711_v17 = vadd.f32 -1.4531521, %v3444_v55  ;;  %v5563_v12 = vpop.eup %5562  ;;  %v3446_v13 = vmul.f32 1.0614054, %v7334_v54  ;;  %v3376_v58 = vadd.f32 1.0, %v3352_v51 }
0x106f   : > { %v3491_v63 = vmul.f32 %v7315_v52, %v4710_v16  ;;  %v7342_v37 = vadd.f32 %v7821_v15, %v6914_v33  ;;  %v4733_v10 = vadd.f32 -0.28449672, %v3538_v36  ;;  %v4732_v27 = vadd.f32 -0.28449672, %v3537_v40 }
0x1070   : > { %v3492_v57 = vmul.f32 %v7322_v8, %v4711_v17  ;;  %v3660_v0 = vsub.f32 0.0, %v7240_v23  ;;  %v7348_v44 = vsel %vm3799_vm14, %v3823_v43, %v3775_v14  ;;  %5568 = vpow2.f32 %v3716_v21 }
0x1071   : > { %7822 = vst [vmem:[#allocation25_spill] sm:$0xff] %v7342_v37  ;;  %v3515_v31 = vadd.f32 1.4214138, %v3491_v63  ;;  %v4713_v55 = vadd.f32 -1.4531521, %v3446_v13  ;;  %v3632_v16 = vmul.f32 %v7174_v1, %v3608_v49  ;;  %v3683_v36 = vmul.f32 %v3659_v29, %v7237_v24 }
0x1072   : > { %v3714_v51 = vmul.f32 1.442695, %v3681_v26  ;;  %v3516_v20 = vadd.f32 1.4214138, %v3492_v57  ;;  %v7352_v15 = vmul.f32 0.70710677, %v7342_v37  ;;  %5570 = vrcp.f32 %v3376_v58 }
0x1073   : > { %v3494_v17 = vmul.f32 %v7334_v54, %v4713_v55  ;;  %v3662_v40 = vsub.f32 0.0, %v7244_v41  ;;  %v3586_v14 = vmul.f32 %v7252_v46, %v4733_v10  ;;  %v3585_v63 = vmul.f32 %v7265_v5, %v4732_v27 }
0x1074   : > { %7823 = vst [vmem:[#allocation36_spill] sm:$0xff] %v7352_v15  ;;  %v7357_v18 = vpop.eup %5564  ;;  %v3684_v1 = vmul.f32 %v3660_v0, %v7240_v23  ;;  %v7363_v43 = vand.u32 2147483647, %v7352_v15  ;;  %v3539_v21 = vmul.f32 %v7315_v52, %v3515_v31  ;;  %v3540_v24 = vmul.f32 %v7322_v8, %v3516_v20 }
0x1075   : > { %v3518_v49 = vadd.f32 1.4214138, %v3494_v17  ;;  %v3445_v26 = vmul.f32 1.0614054, %v7357_v18  ;;  %v7368_v29 = vmul.f32 %v5563_v12, %v3632_v16  ;;  %5572 = vpow2.f32 %v3714_v51 }
0x1076   : > { %v3661_v13 = vsub.f32 0.0, %v7290_v3  ;;  %v3354_v58 = vmul.f32 0.3275911, %v7363_v43  ;;  %v3718_v23 = vmul.f32 1.442695, %v3683_v36  ;;  %v3663_v0 = vsub.f32 0.0, %v7302_v32 }
0x1077   : > { %v7372_v10 = vpop.eup %5566  ;;  %v3542_v27 = vmul.f32 %v7334_v54, %v3518_v49  ;;  %v4712_v57 = vadd.f32 -1.4531521, %v3445_v26  ;;  %v3610_v31 = vadd.f32 0.2548296, %v3586_v14  ;;  %v3720_v20 = vmul.f32 1.442695, %v3684_v1 }
0x1078   : > { %v3686_v55 = vmul.f32 %v3662_v40, %v7244_v41  ;;  %v3447_v12 = vmul.f32 1.0614054, %v7372_v10  ;;  %v3609_v16 = vadd.f32 0.2548296, %v3585_v63  ;;  %v4734_v51 = vadd.f32 -0.28449672, %v3539_v21 }
0x1079   : > { %v4735_v17 = vadd.f32 -0.28449672, %v3540_v24  ;;  %v3493_v37 = vmul.f32 %v7357_v18, %v4712_v57  ;;  %v3776_v15 = vsub.f32 1.0, %v7368_v29  ;;  %v3685_v36 = vmul.f32 %v3661_v13, %v7290_v3 }
0x107a   : > { %v4714_v53 = vadd.f32 -1.4531521, %v3447_v12  ;;  %v3378_v49 = vadd.f32 1.0, %v3354_v58  ;;  %v5569_v26 = vpop.eup %5568  ;;  %vm3800_vm15 = vcmp.lt.f32.partialorder %v7824_v11, 0.0  ;;  %5574 = vpow2.f32 %v3718_v23 }
0x107b   : > { %v4737_v14 = vadd.f32 -0.28449672, %v3542_v27  ;;  %v3517_v1 = vadd.f32 1.4214138, %v3493_v37  ;;  %v3687_v41 = vmul.f32 %v3663_v0, %v7302_v32  ;;  %v3634_v40 = vmul.f32 %v7252_v46, %v3610_v31 }
0x107c   : > { %5576 = vpow2.f32 %v3720_v20  ;;  %v3724_v63 = vmul.f32 1.442695, %v3686_v55  ;;  %v3495_v21 = vmul.f32 %v7372_v10, %v4714_v53  ;;  %v7385_v24 = vpop.eup %5570  ;;  %v3633_v3 = vmul.f32 %v7265_v5, %v3609_v16  ;;  %v7825_v53 = vld [vmem:[#allocation26_spill] sm:$0xff] }
0x107d   : > { %v3587_v29 = vmul.f32 %v7315_v52, %v4734_v51  ;;  %v3588_v13 = vmul.f32 %v7322_v8, %v4735_v17  ;;  %v3541_v58 = vmul.f32 %v7357_v18, %v3517_v1  ;;  %v3824_v23 = vsub.f32 0.0, %v3776_v15 }
0x107e   : > { %v3722_v37 = vmul.f32 1.442695, %v3685_v36  ;;  %v3519_v27 = vadd.f32 1.4214138, %v3495_v21  ;;  %5578 = vrcp.f32 %v3378_v49  ;;  %v3590_v46 = vmul.f32 %v7334_v54, %v4737_v14 }
0x107f   : > { %v4736_v32 = vadd.f32 -0.28449672, %v3541_v58  ;;  %v3726_v57 = vmul.f32 1.442695, %v3687_v41  ;;  %v7394_v0 = vadd.f32 %v7825_v53, %v6918_v19  ;;  %v5573_v31 = vpop.eup %5572  ;;  %v3754_v5 = vmul.f32 %v5569_v26, %v3634_v40 }
0x1080   : > { %5580 = vpow2.f32 %v3724_v63  ;;  %v3543_v20 = vmul.f32 %v7372_v10, %v3519_v27  ;;  %v3448_v55 = vmul.f32 1.0614054, %v7385_v24  ;;  %v3753_v12 = vmul.f32 %v5573_v31, %v3633_v3 }
0x1081   : > { %v3611_v16 = vadd.f32 0.2548296, %v3587_v29  ;;  %v3612_v51 = vadd.f32 0.2548296, %v3588_v13  ;;  %v3589_v17 = vmul.f32 %v7357_v18, %v4736_v32  ;;  %v7401_v36 = vmul.f32 %v7329_v61, %v7248_v7 }
0x1082   : > { %v7404_v49 = vmul.f32 0.5, %v7165_v2  ;;  %5582 = vpow2.f32 %v3722_v37  ;;  %v4738_v14 = vadd.f32 -0.28449672, %v3543_v20  ;;  %v3871_v26 = vadd.f32 1.0, %v7348_v44 }
0x1083   : > { %vm3802_vm0 = vcmp.lt.f32.partialorder %v7161_v30, 0.0  ;;  %v3614_v1 = vadd.f32 0.2548296, %v3590_v46  ;;  %5584 = vpow2.f32 %v3726_v57  ;;  %v7409_v41 = vmul.f32 0.70710677, %v7394_v0 }
0x1084   : > { %v3848_v40 = vsel %vm3800_vm15, %v3824_v23, %v3776_v15  ;;  %v3778_v63 = vsub.f32 1.0, %v3754_v5  ;;  %vm3801_vm1 = vcmp.lt.f32.partialorder %v7185_v4, 0.0  ;;  %v3591_v2 = vmul.f32 %v7372_v10, %v4738_v14  ;;  %v5575_v61 = vpop.eup %5574  ;;  %v7826_v14 = vld [vmem:[#allocation27_spill] sm:$0xff] }
0x1085   : > { %v4715_v7 = vadd.f32 -1.4531521, %v3448_v55  ;;  %v3777_v21 = vsub.f32 1.0, %v3753_v12  ;;  %v3635_v44 = vmul.f32 %v7315_v52, %v3611_v16  ;;  %v3636_v3 = vmul.f32 %v7322_v8, %v3612_v51 }
0x1086   : > { %v3613_v29 = vadd.f32 0.2548296, %v3589_v17  ;;  %v5577_v13 = vpop.eup %5576  ;;  %v7418_v58 = vmul.f32 0.5, %v7207_v28  ;;  %v3615_v37 = vadd.f32 0.2548296, %v3591_v2  ;;  %v3664_v11 = vsub.f32 0.0, %v7313_v22 }
0x1087   : > { %v7422_v15 = vand.u32 2147483647, %v7409_v41  ;;  %v7425_v23 = vmul.f32 %v3871_v26, %v7262_v35  ;;  %v3872_v27 = vadd.f32 1.0, %v3848_v40  ;;  %v7428_v46 = vmul.f32 0.5, %v7211_v62 }
0x1088   : > { %v3638_v52 = vmul.f32 %v7334_v54, %v3614_v1  ;;  %v7431_v8 = vpop.eup %5578  ;;  %v3826_v32 = vsub.f32 0.0, %v3778_v63  ;;  %v7434_v28 = vmul.f32 0.5, %v7215_v42  ;;  %v3496_v57 = vmul.f32 %v7385_v24, %v4715_v7 }
0x1089   : > { %v3353_v53 = vmul.f32 0.3275911, %v7422_v15  ;;  %v3825_v31 = vsub.f32 0.0, %v3777_v21  ;;  %v3755_v5 = vmul.f32 %v5575_v61, %v3635_v44  ;;  %v3756_v35 = vmul.f32 %v5577_v13, %v3636_v3 }
0x108a   : > { %v3637_v20 = vmul.f32 %v7357_v18, %v3613_v29  ;;  %v5581_v55 = vpop.eup %5580  ;;  %v7440_v62 = vmul.f32 0.5, %v7259_v6  ;;  %v3639_v54 = vmul.f32 %v7372_v10, %v3615_v37  ;;  %v3688_v12 = vmul.f32 %v3664_v11, %v7313_v22 }
0x108b   : > { %v3377_v16 = vadd.f32 1.0, %v3353_v53  ;;  %v7445_v42 = vmul.f32 %v3872_v27, %v7269_v48  ;;  %v3758_v51 = vmul.f32 %v5581_v55, %v3638_v52  ;;  %v3450_v17 = vmul.f32 1.0614054, %v7431_v8  ;;  %v7827_v48 = vld [vmem:[#allocation28_spill] sm:$0xff] }
0x108c   : > { %v7450_v26 = vadd.f32 %v7826_v14, %v6920_v34  ;;  %v5583_v18 = vpop.eup %5582  ;;  %v3850_v6 = vsel %vm3802_vm0, %v3826_v32, %v3778_v63  ;;  %vm3803_vm2 = vcmp.lt.f32.partialorder %v7225_v39, 0.0  ;;  %vm3804_vm3 = vcmp.lt.f32.partialorder %v7228_v9, 0.0 }
0x108d   : > { %v3520_v22 = vadd.f32 1.4214138, %v3496_v57  ;;  %5586 = vrcp.f32 %v3377_v16  ;;  %v7458_v10 = vadd.f32 %v7827_v48, %v6910_v56  ;;  %v5585_v1 = vpop.eup %5584  ;;  %v3849_v40 = vsel %vm3801_vm1, %v3825_v31, %v3777_v21 }
0x108e   : > { %v3779_v2 = vsub.f32 1.0, %v3755_v5  ;;  %v3780_v7 = vsub.f32 1.0, %v3756_v35  ;;  %v3757_v61 = vmul.f32 %v5583_v18, %v3637_v20  ;;  %vm3806_vm4 = vcmp.lt.f32.partialorder %v7233_v59, 0.0  ;;  %v7830_v59 = vld [vmem:[#allocation31_spill] sm:$0xff] }
0x108f   : > { %v3759_v30 = vmul.f32 %v5585_v1, %v3639_v54  ;;  %v3728_v63 = vmul.f32 1.442695, %v3688_v12  ;;  %v3666_v44 = vsub.f32 0.0, %v7363_v43  ;;  %v7465_v3 = vmul.f32 0.70710677, %v7450_v26 }
0x1090   : > { %v3874_v29 = vadd.f32 1.0, %v3850_v6  ;;  %v3782_v13 = vsub.f32 1.0, %v3758_v51  ;;  %v4717_v56 = vadd.f32 -1.4531521, %v3450_v17  ;;  %v7468_v37 = vmul.f32 0.70710677, %v7458_v10 }
0x1091   : > { %v3873_v4 = vadd.f32 1.0, %v3849_v40  ;;  %vm3805_vm5 = vcmp.lt.f32.partialorder %v7276_v50, 0.0  ;;  %v7472_v21 = vmul.f32 0.5, %v7282_v45  ;;  %v3544_v11 = vmul.f32 %v7385_v24, %v3520_v22  ;;  %v7828_v17 = vld [vmem:[#allocation29_spill] sm:$0xff] }
0x1092   : > { %v7476_v27 = vand.u32 2147483647, %v7465_v3  ;;  %v3827_v52 = vsub.f32 0.0, %v3779_v2  ;;  %v3828_v32 = vsub.f32 0.0, %v3780_v7  ;;  %v3781_v57 = vsub.f32 1.0, %v3757_v61 }
0x1093   : > { %vm3807_vm6 = vcmp.lt.f32.partialorder %v7294_v25, 0.0  ;;  %v7480_v53 = vand.u32 2147483647, %v7468_v37  ;;  %v3783_v31 = vsub.f32 1.0, %v3759_v30  ;;  %5588 = vpow2.f32 %v3728_v63 }
0x1094   : > { %v3690_v5 = vmul.f32 %v3666_v44, %v7363_v43  ;;  %v3355_v45 = vmul.f32 0.3275911, %v7476_v27  ;;  %v7485_v35 = vmul.f32 %v3874_v29, %v7299_v60  ;;  %v3830_v20 = vsub.f32 0.0, %v3782_v13  ;;  %v7829_v44 = vld [vmem:[#allocation30_spill] sm:$0xff] }
0x1095   : > { %v3498_v55 = vmul.f32 %v7431_v8, %v4717_v56  ;;  %v3356_v54 = vmul.f32 0.3275911, %v7480_v53  ;;  %v7490_v12 = vmul.f32 %v3873_v4, %v7404_v49  ;;  %v4739_v16 = vadd.f32 -0.28449672, %v3544_v11 }
0x1096   : > { %v3379_v51 = vadd.f32 1.0, %v3355_v45  ;;  %v7494_v14 = vadd.f32 %v7828_v17, %v6914_v33  ;;  %v3851_v43 = vsel %vm3803_vm2, %v3827_v52, %v3779_v2  ;;  %v3852_v60 = vsel %vm3804_vm3, %v3828_v32, %v3780_v7 }
0x1097   : > { %v3829_v18 = vsub.f32 0.0, %v3781_v57  ;;  %v3380_v6 = vadd.f32 1.0, %v3356_v54  ;;  %v7500_v22 = vpop.eup %5586  ;;  %v3831_v48 = vsub.f32 0.0, %v3783_v31  ;;  %v7502_v1 = vmul.f32 1.442695, %v3690_v5  ;;  %v7831_v54 = vld [vmem:[#allocation33_spill] sm:$0xff] }
0x1098   : > { %5590 = vrcp.f32 %v3379_v51  ;;  %v7505_v49 = vmul.f32 0.70710677, %v7494_v14  ;;  %v3854_v33 = vsel %vm3806_vm4, %v3830_v20, %v3782_v13  ;;  %v3522_v40 = vadd.f32 1.4214138, %v3498_v55 }
0x1099   : > { %v3449_v39 = vmul.f32 1.0614054, %v7500_v22  ;;  %5592 = vrcp.f32 %v3380_v6  ;;  %v3875_v9 = vadd.f32 1.0, %v3851_v43  ;;  %v3876_v2 = vadd.f32 1.0, %v3852_v60 }
0x109a   : > { %v3592_v7 = vmul.f32 %v7385_v24, %v4739_v16  ;;  %v7512_v61 = vand.u32 2147483647, %v7505_v49  ;;  %v3853_v30 = vsel %vm3805_vm5, %v3829_v18, %v3781_v57  ;;  %v7518_v29 = vadd.f32 %v7829_v44, %v6918_v19  ;;  %v7833_v44 = vld [vmem:[#allocation24_spill] sm:$0xff] }
0x109b   : > { %v4716_v63 = vadd.f32 -1.4531521, %v3449_v39  ;;  %v7522_v13 = vadd.f32 %v7830_v59, %v6920_v34  ;;  %v3878_v56 = vadd.f32 1.0, %v3854_v33  ;;  %v3855_v4 = vsel %vm3807_vm6, %v3831_v48, %v3783_v31 }
0x109c   : > { %v3358_v11 = vmul.f32 0.3275911, %v7512_v61  ;;  %v3977_v52 = vpack.c.bf16 %v7401_v36, %v7318_v38  ;;  %v3546_v50 = vmul.f32 %v7431_v8, %v3522_v40  ;;  %v3665_v19 = vsub.f32 0.0, %v7422_v15 }
0x109d   : > { %v3497_v32 = vmul.f32 %v7500_v22, %v4716_v63  ;;  %v7533_v57 = vmul.f32 0.70710677, %v7518_v29  ;;  %v5589_v34 = vpop.eup %5588  ;;  %v3877_v5 = vadd.f32 1.0, %v3853_v30  ;;  %v3616_v45 = vadd.f32 0.2548296, %v3592_v7 }
0x109e   : > { %v3382_v20 = vadd.f32 1.0, %v3358_v11  ;;  %v7536_v25 = vmul.f32 0.70710677, %v7522_v13  ;;  %4212 = vmatprep.mubr.bf16.mxu0 %v3977_v52  ;;  %v3899_v31 = vmul.f32 %v3875_v9, %v7418_v58  ;;  %v3879_v38 = vadd.f32 1.0, %v3855_v4 }
0x109f   : > { %v3668_v36 = vsub.f32 0.0, %v7480_v53  ;;  %v7541_v55 = vand.u32 2147483647, %v7533_v57  ;;  %v7832_v16 = vpack.c.bf16 %v7181_v47, %v7831_v54  ;;  %v3900_v51 = vmul.f32 %v3876_v2, %v7428_v46 }
0x10a0   : > { %v3521_v17 = vadd.f32 1.4214138, %v3497_v32  ;;  %5594 = vrcp.f32 %v3382_v20  ;;  %v7548_v43 = vand.u32 2147483647, %v7536_v25  ;;  %v7551_v60 = vmul.f32 %v3878_v56, %v7434_v28 }
0x10a1   : > { %4213 = vmatmul.mubr.bf16.vlgmr.msra.gmra.mrb[96].mxu0 %v7832_v16  ;;  %v4741_v58 = vadd.f32 -0.28449672, %v3546_v50  ;;  %v3667_v18 = vsub.f32 0.0, %v7476_v27  ;;  %v3357_v6 = vmul.f32 0.3275911, %v7541_v55  ;;  %v3901_v47 = vmul.f32 %v3877_v5, %v7440_v62  ;;  %v7834_v50 = vld [vmem:[#allocation35_spill] sm:$0xff] }
0x10a2   : > { %v7555_v48 = vpop.eup %5590  ;;  %v3640_v33 = vmul.f32 %v7385_v24, %v3616_v45  ;;  %v3689_v46 = vmul.f32 %v3665_v19, %v7422_v15  ;;  %v3359_v40 = vmul.f32 0.3275911, %v7548_v43  ;;  %v3903_v28 = vmul.f32 %v3879_v38, %v7472_v21 }
0x10a3   : > { %v7561_v39 = vpop.eup %5592  ;;  %v3451_v9 = vmul.f32 1.0614054, %v7555_v48  ;;  %v3692_v2 = vmul.f32 %v3668_v36, %v7480_v53  ;;  %v3381_v7 = vadd.f32 1.0, %v3357_v6  ;;  %v3545_v30 = vmul.f32 %v7500_v22, %v3521_v17 }
0x10a4   : > { %v3452_v63 = vmul.f32 1.0614054, %v7561_v39  ;;  %v3383_v62 = vadd.f32 1.0, %v3359_v40  ;;  %v3979_v24 = vpack.c.bf16 %v7425_v23, %v7833_v44  ;;  %v3594_v15 = vmul.f32 %v7431_v8, %v4741_v58  ;;  %v7835_v23 = vld [vmem:[#allocation34_spill] sm:$0xff] }
0x10a5   : > { %v4718_v59 = vadd.f32 -1.4531521, %v3451_v9  ;;  %v3691_v56 = vmul.f32 %v3667_v18, %v7476_v27  ;;  %5596 = vrcp.f32 %v3381_v7  ;;  %v3670_v4 = vsub.f32 0.0, %v7512_v61 }
0x10a6   : > { %v4719_v21 = vadd.f32 -1.4531521, %v3452_v63  ;;  %5598 = vrcp.f32 %v3383_v62  ;;  %4269 = vmatprep.mubr.bf16.mxu1 %v3979_v24  ;;  %v3981_v53 = vpack.c.bf16 %v3901_v47, %v7490_v12  ;;  %v3736_v52 = vmul.f32 1.442695, %v3692_v2 }
0x10a7   : > { %5600 = vpow2.f32 %v7502_v1  ;;  %v3499_v11 = vmul.f32 %v7555_v48, %v4718_v59  ;;  %v7836_v32 = vpack.c.bf16 %v7834_v50, %v7835_v23  ;;  %v3983_v19 = vpack.c.bf16 %v3903_v28, %v3899_v31 }
0x10a8   : > { %v4740_v5 = vadd.f32 -0.28449672, %v3545_v30  ;;  %v3500_v27 = vmul.f32 %v7561_v39, %v4719_v21  ;;  %4220 = vmatprep.mubr.bf16.mxu0 %v3981_v53  ;;  %v3980_v45 = vpack.c.bf16 %v3900_v51, %v7445_v42  ;;  %v3982_v20 = vpack.c.bf16 %v7551_v60, %v7485_v35 }
0x10a9   : > { %4270 = vmatmul.mubr.bf16.vlgmr.msra.gmra.mrb[96].mxu1 %v7836_v32  ;;  %v3760_v12 = vmul.f32 %v5589_v34, %v3640_v33  ;;  %v3730_v38 = vmul.f32 1.442695, %v3689_v46  ;;  %v3523_v1 = vadd.f32 1.4214138, %v3499_v11  ;;  %v3618_v54 = vadd.f32 0.2548296, %v3594_v15 }
0x10aa   : > { %4277 = vmatprep.mubr.bf16.mxu1 %v3983_v19  ;;  %v7583_v36 = vpop.eup %5594  ;;  %v3734_v16 = vmul.f32 1.442695, %v3691_v56  ;;  %v3524_v17 = vadd.f32 1.4214138, %v3500_v27  ;;  %v3694_v31 = vmul.f32 %v3670_v4, %v7512_v61  ;;  %4221 = vmatmul.mubr.bf16.gmra.mrb[100].mxu0 %v3980_v45  ;;  %5602 = vpow2.f32 %v3736_v52 }
0x10ab   : > { %v3547_v58 = vmul.f32 %v7555_v48, %v3523_v1  ;;  %v3454_v42 = vmul.f32 1.0614054, %v7583_v36  ;;  %v3669_v51 = vsub.f32 0.0, %v7541_v55  ;;  %v3593_v35 = vmul.f32 %v7500_v22, %v4740_v5  ;;  %v7837_v5 = vld [vmem:[#allocation23_spill] sm:$0xff] }
0x10ac   : > { %v3548_v34 = vmul.f32 %v7561_v39, %v3524_v17  ;;  %v3671_v60 = vsub.f32 0.0, %v7548_v43  ;;  %5604 = vpow2.f32 %v3730_v38  ;;  %v3784_v47 = vsub.f32 1.0, %v3760_v12 }
0x10ad   : > { %v4742_v18 = vadd.f32 -0.28449672, %v3547_v58  ;;  %v4721_v6 = vadd.f32 -1.4531521, %v3454_v42  ;;  %5606 = vpow2.f32 %v3734_v16  ;;  %v3740_v33 = vmul.f32 1.442695, %v3694_v31 }
0x10ae   : > { %v4743_v61 = vadd.f32 -0.28449672, %v3548_v34  ;;  %v3642_v40 = vmul.f32 %v7431_v8, %v3618_v54  ;;  %v3693_v2 = vmul.f32 %v3669_v51, %v7541_v55  ;;  %v3617_v30 = vadd.f32 0.2548296, %v3593_v35  ;;  %v7838_v34 = vld [vmem:[#allocation22_spill] sm:$0xff] }
0x10af   : > { %v7592_v46 = vpop.eup %5596  ;;  %v3595_v28 = vmul.f32 %v7555_v48, %v4742_v18  ;;  %v3502_v9 = vmul.f32 %v7583_v36, %v4721_v6  ;;  %v3695_v44 = vmul.f32 %v3671_v60, %v7548_v43  ;;  %v3832_v56 = vsub.f32 0.0, %v3784_v47 }
0x10b0   : > { %v7598_v7 = vpop.eup %5598  ;;  %v3596_v63 = vmul.f32 %v7561_v39, %v4743_v61  ;;  %v3453_v62 = vmul.f32 1.0614054, %v7592_v46  ;;  %5608 = vpow2.f32 %v3740_v33  ;;  %v3738_v11 = vmul.f32 1.442695, %v3693_v2 }
0x10b1   : > { %4278 = vmatmul.mubr.bf16.gmra.mrb[100].mxu1 %v3982_v20  ;;  %v5601_v24 = vpop.eup %5600  ;;  %v3619_v15 = vadd.f32 0.2548296, %v3595_v28  ;;  %v3526_v59 = vadd.f32 1.4214138, %v3502_v9  ;;  %v3455_v8 = vmul.f32 1.0614054, %v7598_v7  ;;  %v3641_v50 = vmul.f32 %v7500_v22, %v3617_v30 }
0x10b2   : > { %v3620_v21 = vadd.f32 0.2548296, %v3596_v63  ;;  %v4720_v4 = vadd.f32 -1.4531521, %v3453_v62  ;;  %v3762_v55 = vmul.f32 %v5601_v24, %v3642_v40  ;;  %v3742_v32 = vmul.f32 1.442695, %v3695_v44 }
0x10b3   : > { %v3550_v53 = vmul.f32 %v7583_v36, %v3526_v59  ;;  %v4722_v52 = vadd.f32 -1.4531521, %v3455_v8  ;;  %vm3808_vm7 = vcmp.lt.f32.partialorder %v7837_v5, 0.0  ;;  %v3643_v27 = vmul.f32 %v7555_v48, %v3619_v15  ;;  %v7839_v8 = vld [vmem:[#allocation36_spill] sm:$0xff] }
0x10b4   : > { %v3644_v23 = vmul.f32 %v7561_v39, %v3620_v21  ;;  %v3501_v43 = vmul.f32 %v7592_v46, %v4720_v4  ;;  %v5603_v19 = vpop.eup %5602  ;;  %v3856_v12 = vsel %vm3808_vm7, %v3832_v56, %v3784_v47  ;;  %v3786_v16 = vsub.f32 1.0, %v3762_v55 }
0x10b5   : > { %v4745_v45 = vadd.f32 -0.28449672, %v3550_v53  ;;  %v3503_v20 = vmul.f32 %v7598_v7, %v4722_v52  ;;  %5610 = vpow2.f32 %v3738_v11  ;;  %v3280_v60 = vmul.f32 0.5, %v7838_v34 }
0x10b6   : > { %v3764_v38 = vmul.f32 %v5603_v19, %v3644_v23  ;;  %v3525_v1 = vadd.f32 1.4214138, %v3501_v43  ;;  %v5605_v54 = vpop.eup %5604  ;;  %5612 = vpow2.f32 %v3742_v32  ;;  %v3880_v18 = vadd.f32 1.0, %v3856_v12  ;;  %v7840_v32 = vld [vmem:[#allocation25_spill] sm:$0xff] }
0x10b7   : > { %v3598_v22 = vmul.f32 %v7583_v36, %v4745_v45  ;;  %v3527_v39 = vadd.f32 1.4214138, %v3503_v20  ;;  %v5607_v17 = vpop.eup %5606  ;;  %v3761_v31 = vmul.f32 %v5605_v54, %v3641_v50  ;;  %v3834_v61 = vsub.f32 0.0, %v3786_v16 }
0x10b8   : > { %v3788_v58 = vsub.f32 1.0, %v3764_v38  ;;  %v3549_v42 = vmul.f32 %v7592_v46, %v3525_v1  ;;  %v3763_v51 = vmul.f32 %v5607_v17, %v3643_v27  ;;  %vm3812_vm8 = vcmp.lt.f32.partialorder %v7468_v37, 0.0 }
0x10b9   : > { %v3622_v48 = vadd.f32 0.2548296, %v3598_v22  ;;  %v3551_v35 = vmul.f32 %v7598_v7, %v3527_v39  ;;  %v3785_v9 = vsub.f32 1.0, %v3761_v31  ;;  %v3284_v2 = vmul.f32 0.5, %v7458_v10 }
0x10ba   : > { %v3836_v6 = vsub.f32 0.0, %v3788_v58  ;;  %v4744_v47 = vadd.f32 -0.28449672, %v3549_v42  ;;  %v5609_v28 = vpop.eup %5608  ;;  %v3787_v62 = vsub.f32 1.0, %v3763_v51  ;;  %v3904_v59 = vmul.f32 %v3880_v18, %v3280_v60 }
0x10bb   : > { %v3646_v33 = vmul.f32 %v7583_v36, %v3622_v48  ;;  %v4746_v40 = vadd.f32 -0.28449672, %v3551_v35  ;;  %vm3810_vm9 = vcmp.lt.f32.partialorder %v7839_v8, 0.0  ;;  %v3833_v55 = vsub.f32 0.0, %v3785_v9 }
0x10bc   : > { %v3860_v30 = vsel %vm3812_vm8, %v3836_v6, %v3788_v58  ;;  %v3597_v63 = vmul.f32 %v7592_v46, %v4744_v47  ;;  %v3858_v37 = vsel %vm3810_vm9, %v3834_v61, %v3786_v16  ;;  %v3835_v11 = vsub.f32 0.0, %v3787_v62 }
0x10bd   : > { %v3884_v44 = vadd.f32 1.0, %v3860_v30  ;;  %v3766_v24 = vmul.f32 %v5609_v28, %v3646_v33  ;;  %v3599_v15 = vmul.f32 %v7598_v7, %v4746_v40  ;;  %v3282_v19 = vmul.f32 0.5, %v7840_v32 }
0x10be   : > { %v3621_v56 = vadd.f32 0.2548296, %v3597_v63  ;;  %v3882_v5 = vadd.f32 1.0, %v3858_v37  ;;  %vm3814_vm10 = vcmp.lt.f32.partialorder %v7505_v49, 0.0  ;;  %vm3809_vm11 = vcmp.lt.f32.partialorder %v7409_v41, 0.0 }
0x10bf   : > { %v3908_v21 = vmul.f32 %v3884_v44, %v3284_v2  ;;  %v3790_v36 = vsub.f32 1.0, %v3766_v24  ;;  %v3623_v4 = vadd.f32 0.2548296, %v3599_v15  ;;  %v5611_v10 = vpop.eup %5610  ;;  %vm3811_vm12 = vcmp.lt.f32.partialorder %v7465_v3, 0.0  ;;  %v4779_v15 = vld [vmem:[%s7842_s1] ss:$0 sm:$0xff] }
0x10c0   : > { %v3645_v53 = vmul.f32 %v7592_v46, %v3621_v56  ;;  %v5613_v43 = vpop.eup %5612  ;;  %v3857_v46 = vsel %vm3809_vm11, %v3833_v55, %v3785_v9  ;;  %v3286_v12 = vmul.f32 0.5, %v7494_v14  ;;  %v3906_v16 = vmul.f32 %v3882_v5, %v3282_v19  ;;  %v7843_v56 = vld [vmem:[#allocation16_spill] sm:$0xff] }
0x10c1   : > { %v3838_v52 = vsub.f32 0.0, %v3790_v36  ;;  %v3647_v50 = vmul.f32 %v7598_v7, %v3623_v4  ;;  %v3984_v23 = vpack.c.bf16 %v3908_v21, %v3904_v59  ;;  %v3859_v7 = vsel %vm3811_vm12, %v3835_v11, %v3787_v62 }
0x10c2   : > { %v3765_v27 = vmul.f32 %v5611_v10, %v3645_v53  ;;  %v3881_v17 = vadd.f32 1.0, %v3857_v46  ;;  %vm3813_vm13 = vcmp.lt.f32.partialorder %v7533_v57, 0.0  ;;  %v3883_v31 = vadd.f32 1.0, %v3859_v7  ;;  %v7844_v53 = vld [vmem:[#allocation17_spill] sm:$0xff] }
0x10c3   : > { %v3862_v45 = vsel %vm3814_vm10, %v3838_v52, %v3790_v36  ;;  %v3767_v20 = vmul.f32 %v5613_v43, %v3647_v50  ;;  %vm3815_vm14 = vcmp.lt.f32.partialorder %v7536_v25, 0.0  ;;  %v3281_v58 = vmul.f32 0.5, %v7394_v0 }
0x10c4   : > { %v3886_v38 = vadd.f32 1.0, %v3862_v45  ;;  %v3789_v1 = vsub.f32 1.0, %v3765_v27  ;;  %v3285_v14 = vmul.f32 0.5, %v7518_v29  ;;  %v3283_v48 = vmul.f32 0.5, %v7450_v26  ;;  %v7845_v27 = vld [vmem:[#allocation18_spill] sm:$0xff] }
0x10c5   : > { %v3791_v54 = vsub.f32 1.0, %v3767_v20  ;;  %v3287_v35 = vmul.f32 0.5, %v7522_v13  ;;  %v3905_v60 = vmul.f32 %v3881_v17, %v3281_v58 }
0x10c6   : > { %v3910_v22 = vmul.f32 %v3886_v38, %v3286_v12  ;;  %v3837_v39 = vsub.f32 0.0, %v3789_v1  ;;  %v3907_v57 = vmul.f32 %v3883_v31, %v3283_v48  ;;  %v7846_v12 = vld [vmem:[#allocation19_spill] sm:$0xff] }
0x10c7   : > { %v3839_v49 = vsub.f32 0.0, %v3791_v54 }
0x10c8   : > { %v3861_v41 = vsel %vm3813_vm13, %v3837_v39, %v3789_v1  ;;  %v3986_v3 = vpack.c.bf16 %v3910_v22, %v3906_v16 }
0x10c9   : > { %v3885_v42 = vadd.f32 1.0, %v3861_v41  ;;  %v3863_v51 = vsel %vm3815_vm14, %v3839_v49, %v3791_v54 }
0x10ca   : > { %v3887_v34 = vadd.f32 1.0, %v3863_v51  ;;  %v7847_v51 = vld [vmem:[#allocation20_spill] sm:$0xff] }
0x10cb   : > { %v3909_v18 = vmul.f32 %v3885_v42, %v3285_v14 }
0x10cc   : > { %v3911_v6 = vmul.f32 %v3887_v34, %v3287_v35 }
0x10cd   : > { %v3985_v47 = vpack.c.bf16 %v3909_v18, %v3905_v60  ;;  %v7848_v60 = vld [vmem:[#allocation21_spill] sm:$0xff] }
0x10ce   : > { %v3987_v61 = vpack.c.bf16 %v3911_v6, %v3907_v57 }
0x10cf   : > { %4228 = vmatprep.mubr.bf16.mxu0 %v3985_v47 }
0x10d0   : > { %4285 = vmatprep.mubr.bf16.mxu1 %v3987_v61  ;;  %4229 = vmatmul.mubr.bf16.gmra.mrb[104].mxu0 %v3984_v23 }
0x10d1   : > { %4286 = vmatmul.mubr.bf16.gmra.mrb[104].mxu1 %v3986_v3 }
0x1174   : > { %v4891_v0 = vpop.f32.mrb[96].mxu0 }
0x1175   : > { %v4892_v29 = vpop.f32.mrb[97].mxu0 }
0x1176   : > { %v4893_v25 = vadd.f32 %v4892_v29, %v4891_v0  ;;  %v4894_v33 = vpop.f32.mrb[98].mxu0 }
0x1177   : > { %v4895_v40 = vpop.f32.mrb[99].mxu0 }
0x1178   : > { %v4896_v26 = vadd.f32 %v4895_v40, %v4894_v33 }
0x117c   : > { %v4925_v28 = vpop.f32.mrb[96].mxu1 }
0x117d   : > { %v4926_v13 = vpop.f32.mrb[97].mxu1  ;;  %v4897_v63 = vpop.f32.mrb[100].mxu0 }
0x117e   : > { %v4927_v9 = vadd.f32 %v4926_v13, %v4925_v28  ;;  %v4928_v2 = vpop.f32.mrb[98].mxu1  ;;  %v4898_v24 = vpop.f32.mrb[101].mxu0 }
0x117f   : > { %v4929_v30 = vpop.f32.mrb[99].mxu1  ;;  %v4899_v59 = vadd.f32 %v4898_v24, %v4897_v63  ;;  %v4900_v8 = vpop.f32.mrb[102].mxu0  ;;  %v4782_v24 = vld [vmem:[%s7850_s29] ss:$0 sm:$0xff] (!%p4780_p7) }
0x1180   : > { %v4272_v62 = vadd.f32 %v4927_v9, %v4893_v25  ;;  %v4930_v44 = vadd.f32 %v4929_v30, %v4928_v2  ;;  %v4901_v36 = vpop.f32.mrb[103].mxu0 }
0x1181   : > { %v4902_v4 = vadd.f32 %v4901_v36, %v4900_v8 }
0x1182   : > { %v4294_v37 = vadd.f32 %v4272_v62, %v7843_v56  ;;  %v4275_v21 = vadd.f32 %v4930_v44, %v4896_v26  ;;  %v4781_v62 = vld [vmem:[%s7849_s3] ss:$0 sm:$0xff] (!%p4780_p7) }
0x1184   : > { %v4307_v55 = vadd.f32 %v4779_v15, %v4294_v37  ;;  %v4295_v10 = vadd.f32 %v4275_v21, %v7844_v53  ;;  %v4931_v11 = vpop.f32.mrb[100].mxu1 }
0x1185   : > { %v4932_v52 = vpop.f32.mrb[101].mxu1 }
0x1186   : > { %4313 = vst [vmem:[#allocation2] sm:$0xff] %v4307_v55  ;;  %v4308_v50 = vadd.f32 %v4779_v15, %v4295_v10  ;;  %v4933_v23 = vadd.f32 %v4932_v52, %v4931_v11  ;;  %v4934_v43 = vpop.f32.mrb[102].mxu1 }
0x1187   : > { %v4935_v32 = vpop.f32.mrb[103].mxu1 }
0x1188   : > { %4314 = vst [vmem:[#allocation2 + $0x8] sm:$0xff] %v4308_v50  ;;  %v4280_v19 = vadd.f32 %v4933_v23, %v4899_v59  ;;  %v4936_v5 = vadd.f32 %v4935_v32, %v4934_v43  ;;  %4325 = vadd.xlane.f32.xlu0 (!%p4780_p7), %v4308_v50 }
0x118a   : > { %v4296_v45 = vadd.f32 %v4280_v19, %v7845_v27  ;;  %v4283_v20 = vadd.f32 %v4936_v5, %v4902_v4 }
0x118c   : > { %v4309_v46 = vadd.f32 %v4779_v15, %v4296_v45  ;;  %v4297_v38 = vadd.f32 %v4283_v20, %v7846_v12 }
0x118e   : > { %4315 = vst [vmem:[#allocation2 + $0x10] sm:$0xff] %v4309_v46  ;;  %v4310_v1 = vadd.f32 %v4779_v15, %v4297_v38 }
0x1190   : > { %4316 = vst [vmem:[#allocation2 + $0x18] sm:$0xff] %v4310_v1 }
0x11a3   : > { %v4903_v7 = vpop.f32.mrb[104].mxu0 }
0x11a4   : > { %v4937_v54 = vpop.f32.mrb[104].mxu1  ;;  %v4904_v16 = vpop.f32.mrb[105].mxu0 }
0x11a5   : > { %v4905_v22 = vadd.f32 %v4904_v16, %v4903_v7  ;;  %v4938_v39 = vpop.f32.mrb[105].mxu1  ;;  %v4906_v17 = vpop.f32.mrb[106].mxu0 }
0x11a6   : > { %v4939_v49 = vadd.f32 %v4938_v39, %v4937_v54  ;;  %v4940_v31 = vpop.f32.mrb[106].mxu1  ;;  %v4907_v41 = vpop.f32.mrb[107].mxu0 }
0x11a7   : > { %v4908_v3 = vadd.f32 %v4907_v41, %v4906_v17  ;;  %v4941_v58 = vpop.f32.mrb[107].mxu1 }
0x11a8   : > { %v4288_v14 = vadd.f32 %v4939_v49, %v4905_v22  ;;  %v4942_v42 = vadd.f32 %v4941_v58, %v4940_v31 }
0x11aa   : > { %v4298_v48 = vadd.f32 %v4288_v14, %v7847_v51  ;;  %v4291_v35 = vadd.f32 %v4942_v42, %v4908_v3  ;;  %4322 = sbr.rel (%p4780_p7) target bundleno = 4838 (0x12e6), region = 136 }
0x11ac   : > { %v4311_v34 = vadd.f32 %v4779_v15, %v4298_v48  ;;  %v4299_v18 = vadd.f32 %v4291_v35, %v7848_v60 }
0x11ae   : > { %4317 = vst [vmem:[#allocation2 + $0x20] sm:$0xff] %v4311_v34  ;;  %v4312_v57 = vadd.f32 %v4779_v15, %v4299_v18  ;;  %4353 = vadd.xlane.f32.xlu0 (!%p4780_p7), %v4311_v34 }
0x11b0   : > { %4318 = vst [vmem:[#allocation2 + $0x28] sm:$0xff] %v4312_v57 }
0x1215   : > { %v4326_v6 = vpop.xlane.xlu0 %4325 }
0x1216   : > { %v4327_v47 = vmul.f32 0.0078125, %v4326_v6 }
0x1218   : > { %v4328_v61 = vsub.f32 %v4308_v50, %v4327_v47 }
0x121a   : > { %v4329_v25 = vmul.f32 %v4328_v61, %v4328_v61 }
0x121c   : > { %4330 = vadd.xlane.f32.xlu1 %v4329_v25 }
0x123b   : > { %v4354_v0 = vpop.xlane.xlu0 %4353 }
0x123c   : > { %v4355_v29 = vmul.f32 0.0078125, %v4354_v0 }
0x123e   : > { %v4356_v33 = vsub.f32 %v4311_v34, %v4355_v29 }
0x1240   : > { %v4357_v40 = vmul.f32 %v4356_v33, %v4356_v33 }
0x1242   : > { %4358 = vadd.xlane.f32.xlu1 %v4357_v40 }
0x12a9   : > { %v4331_v26 = vpop.xlane.xlu1 %4330 }
0x12aa   : > { %v4332_v28 = vmul.f32 0.0078125, %v4331_v26 }
0x12ac   : > { %v4333_v13 = vadd.f32 1e-05, %v4332_v28 }
0x12ae   : > { %5623 = vrsqrt.f32 %v4333_v13 }
0x12b8   : > { %v5624_v63 = vpop.eup %5623 }
0x12b9   : > { %v4335_v44 = vmul.f32 %v5624_v63, %v4328_v61 }
0x12bb   : > { %v4342_v15 = vmul.f32 %v4781_v62, %v4335_v44 }
0x12bd   : > { %v4349_v8 = vadd.f32 %v4782_v24, %v4342_v15 }
0x12bf   : > { %4350 = vst [vmem:[#allocation9] sm:$0xff] %v4349_v8 }
0x12cf   : > { %v4359_v9 = vpop.xlane.xlu1 %4358 }
0x12d0   : > { %v4360_v2 = vmul.f32 0.0078125, %v4359_v9 }
0x12d2   : > { %v4361_v30 = vadd.f32 1e-05, %v4360_v2 }
0x12d4   : > { %5625 = vrsqrt.f32 %v4361_v30 }
0x12de   : > { %v5626_v59 = vpop.eup %5625 }
0x12df   : > { %v4363_v56 = vmul.f32 %v5626_v59, %v4356_v33 }
0x12e1   : > { %v4370_v37 = vmul.f32 %v4781_v62, %v4363_v56 }
0x12e3   : > { %v4377_v21 = vadd.f32 %v4782_v24, %v4370_v37 }
0x12e5   : > { %4378 = vst [vmem:[#allocation9 + $0x8] sm:$0xff] %v4377_v21 }
0x12e6 PF: > { %p5216_p12 = scmp.eq.s32.totalorder %s5952_s6, 1  ;;  %s5805_s20 = smov [#allocation9]  }
0x12e7   : > { %s4385_s27 = sshll.u32 %s5805_s20, 4  ;;  %s4386_s27 = int_to_ptr.vmem [resolvable:$true] %s4385_s27 }
0x12e8   : > { %s5717_s25 = scalar_lea.vmem %s4386_s27, 256  ;;  %p5724_p6 = scmp.lt.s32.totalorder %s4386_s27, %s4386_s27 }
0x12e9   : > { %p5718_p2 = scmp.ne.s32.totalorder %s4386_s27, %s5717_s25  ;;  %p5725_p4 = scmp.lt.s32.totalorder %s5717_s25, %s5717_s25 }
0x12eb   : > { %p5719_p3 = pnand %p5718_p2, %p5216_p12  ;;  %p5726_p1 = por %p5725_p4, %p5724_p6 }
0x12ed   : > { %p5720_p5 = pneg %p5719_p3 }
0x12ef   : > { %p5727_p11 = pnand %p5726_p1, %p5720_p5 }
0x12f1   : > { %5730 = shalt.err (!%p5727_p11)
}
0x12f2   : > { %s7851_s0 = sld [smem:[#allocation53_spill]] }
0x12f8   : > { %s5731_s30 = scalar_lea.hbm %s7851_s0, 256 }
0x12f9   : > { %p5732_p13 = scmp.ne.s32.totalorder %s7851_s0, %s5731_s30  ;;  %p5737_p8 = scmp.lt.u32.totalorder %s5731_s30, %s7851_s0 }
0x12fb   : > { %p5733_p10 = pnand %p5732_p13, %p5216_p12 }
0x12fd   : > { %p5734_p9 = pneg %p5733_p10 }
0x12ff   : > { %p5739_p0 = pnand %p5737_p8, %p5734_p9 }
0x1301   : > { %5742 = shalt.err (!%p5739_p0)
}
0x1302   : > { %s5806_s21 = smov 128   ;;  %s5807_s9 = smov 8  }
0x1303   : > { %5202 = dma.vmem_to_hbm [thread:$0]  (%p5216_p12), %s4386_s27, 256, %s7851_s0, [#allocation5], %s5806_s21, %s5806_s21, %s5807_s9  }
0x1304   : > { %5768 = dma.done.wait (%p5216_p12), [#allocation5], 256  }
0x1305   : > { %5770 = vsyncadd (%p5216_p12), [#allocation5], 4294967040 }
0x1306 PF: > { %s7852_s28 = sld [smem:[#allocation14_spill]]  ;;  %s7853_s29 = sld [smem:[#allocation13_spill]] }
0x1307   : > { %s7854_s27 = sld [smem:[#allocation15_spill]]  ;;  %s7855_s5 = smov %s5777_s26 }
0x130c   : > { %p38_p7 = scmp.ge.s32.totalorder %s7852_s28, 4   ;;  %s7856_s26 = smov %s7853_s29 }
0x130e   :  { %40 = sbr.rel (!%p38_p7) target bundleno = 24 (0x18), region = 212 }
0x1315   :  { %4401 = vsyncpa [#allocation4], 1 }
0x1316   :  { %4403 = vsyncpa [#allocation4 + $0x1], 1 }
0x1317   :  { %4404 = vsyncpa [#allocation7], 1 }
0x1318   :  { %4406 = vsyncpa [#allocation7 + $0x1], 1 }
0x1319   :  { %4407 = vsyncpa [#allocation5], 1 }
0x131a   :  { %4409 = vsyncpa [#allocation5 + $0x1], 1 }

</bundles_post_ra>
